<compile_context>
chip_gen: v7x
topology: tpu7x:2x2x1
jax: 0.10.0
libtpu: 0.0.40
codegen_flags: <defaults>
</compile_context>

<pallas_src>
import math
import numpy as np

import jax
import jax.numpy as jnp
from jax import lax
from jax.experimental import pallas as pl
from jax.experimental.pallas import tpu as pltpu  # noqa: F401  (TPU backend)

# ---- static problem sizes (small, consistent with the module's forward) ----
B, S, H, FF, W, L, VOCAB = 2, 16, 32, 128, 8, 6, 50
BS = B * S            # flattened subtoken rows (32)
BW = B * W            # flattened word rows     (16)
NEG_INF = -1e9
LN_EPS = 1e-12

# ---------------- packed-slab layouts (all offsets are static) --------------
# data slab (per call), f32, shape (BS + BW, DCOLS):
#   rows [0, BS)       : x_flat lanes [0,H) | additive attn bias lanes [H,H+BS)
#   rows [BS, BS + BW) : sel one-hot [0,BS) | gold one-hots | scalar masks
DCOLS = 64
C_X, C_ABIAS = 0, H
C_SEL, C_T1H, C_T1HN = 0, 32, 38
C_VALID, C_VALIDN, C_NOTLAST, C_ISFIRST, C_ISLASTV, C_ISPOSL = 44, 45, 46, 47, 48, 49
DATA_ROWS = BS + BW

# constant vector slab, f32, shape (CVEC_ROWS, 128): one vector per row.
(R_BQKV, R_BO, R_LN1G, R_LN1B, R_B1, R_B2, R_LN2G, R_LN2B,
 R_BOUT, R_START, R_END) = range(11)
R_WOUT, R_TRANS, C_TRANS = 16, 16, 8     # w_out rows 16..47 (lanes 0..5),
CVEC_ROWS = 48                           # trans  rows 16..21 (lanes 8..13)

# encoder weight slab, bf16, shape (ENCW_ROWS, 128):
#   rows [0,H) wqkv | [H,2H) wo | [2H,3H) w1 | [3H,3H+FF) w2
ENCW_ROWS = 3 * H + FF

# output slab, f32, shape (BW, OCOLS): first_subword | logits | word_mask | ll
OCOLS = 128
O_FS, O_LOGITS, O_WM, O_LL = 0, H, H + L, H + L + 1


def _layer_norm(x, g, b):
    mu = jnp.mean(x, axis=-1, keepdims=True)
    var = jnp.mean((x - mu) ** 2, axis=-1, keepdims=True)
    return (x - mu) * lax.rsqrt(var + LN_EPS) * g + b


# --------------------------------------------------------------------------
# Fused kernel: encoder layer -> select_first_subword -> Linear -> CRF -logL
# --------------------------------------------------------------------------
def bert_crf_kernel(data_ref, encw_ref, cvec_ref, out_ref):
    f32, bf16 = jnp.float32, jnp.bfloat16

    # ----- unpack per-call data slab (one DMA) ------------------------------
    x = data_ref[0:BS, C_X:C_X + H]                       # (BS, H)  f32
    bias = data_ref[0:BS, C_ABIAS:C_ABIAS + BS]           # (BS, BS) additive
    wr0 = BS                                              # word rows start
    sel = data_ref[wr0:wr0 + BW, C_SEL:C_SEL + BS]        # (BW, BS) one-hot
    t1h = data_ref[wr0:wr0 + BW, C_T1H:C_T1H + L]         # gold tags one-hot
    t1h_nxt = data_ref[wr0:wr0 + BW, C_T1HN:C_T1HN + L]   # next-position tags
    valid = data_ref[wr0:wr0 + BW, C_VALID:C_VALID + 1]
    valid_nx = data_ref[wr0:wr0 + BW, C_VALIDN:C_VALIDN + 1]
    not_last = data_ref[wr0:wr0 + BW, C_NOTLAST:C_NOTLAST + 1]
    is_first = data_ref[wr0:wr0 + BW, C_ISFIRST:C_ISFIRST + 1]
    is_lastv = data_ref[wr0:wr0 + BW, C_ISLASTV:C_ISLASTV + 1]
    is_posl = data_ref[wr0:wr0 + BW, C_ISPOSL:C_ISPOSL + 1]

    # ----- unpack constant slabs (one DMA each) -----------------------------
    wqkv = encw_ref[0:H, 0:3 * H]                         # (H, 3H)  bf16
    wo = encw_ref[H:2 * H, 0:H]                           # (H, H)   bf16
    w1 = encw_ref[2 * H:3 * H, 0:FF]                      # (H, FF)  bf16
    w2 = encw_ref[3 * H:3 * H + FF, 0:H]                  # (FF, H)  bf16

    bqkv = cvec_ref[R_BQKV:R_BQKV + 1, 0:3 * H]
    bo = cvec_ref[R_BO:R_BO + 1, 0:H]
    ln1_g = cvec_ref[R_LN1G:R_LN1G + 1, 0:H]
    ln1_b = cvec_ref[R_LN1B:R_LN1B + 1, 0:H]
    b1 = cvec_ref[R_B1:R_B1 + 1, 0:FF]
    b2 = cvec_ref[R_B2:R_B2 + 1, 0:H]
    ln2_g = cvec_ref[R_LN2G:R_LN2G + 1, 0:H]
    ln2_b = cvec_ref[R_LN2B:R_LN2B + 1, 0:H]
    b_out = cvec_ref[R_BOUT:R_BOUT + 1, 0:L]
    start = cvec_ref[R_START:R_START + 1, 0:L]
    end = cvec_ref[R_END:R_END + 1, 0:L]
    w_out = cvec_ref[R_WOUT:R_WOUT + H, 0:L]              # (H, L)   f32
    trans = cvec_ref[R_TRANS:R_TRANS + L, C_TRANS:C_TRANS + L]  # (L, L) f32

    # ---------------- encoder layer on the flattened batch ------------------
    # TODO(synk): pretrained multi-layer multi-head scibert replaced by one
    # deterministic single-head post-LN encoder layer.
    qkv = jnp.dot(x.astype(bf16), wqkv, preferred_element_type=f32) + bqkv
    q, k, v = qkv[:, 0:H], qkv[:, H:2 * H], qkv[:, 2 * H:3 * H]

    scores = jnp.einsum('qd,kd->qk', q, k, preferred_element_type=f32)
    scores = scores * (1.0 / math.sqrt(H)) + bias
    m = jnp.max(scores, axis=-1, keepdims=True)
    e = jnp.exp(scores - m)
    attn = e * pl.reciprocal(jnp.sum(e, axis=-1, keepdims=True), approx=True)
    ctx = jnp.dot(attn, v, preferred_element_type=f32)                 # (BS,H)
    attn_out = jnp.dot(ctx.astype(bf16), wo, preferred_element_type=f32) + bo

    h1 = _layer_norm(x + attn_out, ln1_g, ln1_b)
    ff = jnp.dot(h1.astype(bf16), w1, preferred_element_type=f32) + b1
    ff = jax.nn.gelu(ff, approximate=True)
    ff = jnp.dot(ff.astype(bf16), w2, preferred_element_type=f32) + b2
    h = _layer_norm(h1 + ff, ln2_g, ln2_b)                             # (BS,H)

    # ---------------- select_first_subword + output Linear ------------------
    gathered = jnp.dot(sel, h, preferred_element_type=f32)             # (BW,H)
    padded = jnp.where(valid > 0.0, gathered, -1.0)                    # pad=-1
    logits = jnp.dot(padded, w_out, preferred_element_type=f32) + b_out
    wm = valid          # word_mask == validity mask (no float-equality reduce)

    # ---------------- CRF log-likelihood (AllenNLP forward) -----------------
    # Partition function: batched forward recursion, fully on VPU (no MXU).
    logits3 = logits.reshape(B, W, L)       # 8-row split => near-free relayout
    wm3 = wm.reshape(B, W, 1)
    t_max = jnp.max(trans, axis=0, keepdims=True)          # (1, L)
    exp_trans = jnp.exp(trans - t_max)                     # (L, L), hoisted
    alpha = start + logits3[:, 0, :]                       # (B, L)
    for i in range(1, W):                                  # W static & tiny
        a_max = jnp.max(alpha, axis=-1, keepdims=True)     # (B, 1)
        ea = jnp.exp(alpha - a_max)                        # (B, L)
        # inner[b, j] = sum_k ea[b, k] * exp_trans[k, j]   (VPU, unrolled k)
        inner = ea[:, 0:1] * exp_trans[0:1, :]
        for kk in range(1, L):
            inner = inner + ea[:, kk:kk + 1] * exp_trans[kk:kk + 1, :]
        new_alpha = logits3[:, i, :] + a_max + t_max + jnp.log(inner)
        mi = wm3[:, i, :]                                  # (B, 1)
        alpha = new_alpha * mi + alpha * (1.0 - mi)
    stops = alpha + end
    s_max = jnp.max(stops, axis=-1, keepdims=True)
    log_z = s_max + jnp.log(jnp.sum(jnp.exp(stops - s_max),
                                    axis=-1, keepdims=True))           # (B, 1)

    # Gold path score: fully flat (BW, L) with precomputed position masks.
    emit_all = jnp.sum(logits * t1h, axis=-1, keepdims=True)           # (BW,1)
    start_term = jnp.sum(start * t1h * is_first, keepdims=True)        # (1,1)
    emit_term = jnp.sum(emit_all * wm * not_last, keepdims=True)
    row_trans = jnp.dot(t1h, trans, preferred_element_type=f32)        # (BW,L)
    pair = jnp.sum(row_trans * t1h_nxt, axis=-1, keepdims=True)        # (BW,1)
    trans_term = jnp.sum(pair * valid_nx * not_last, keepdims=True)
    end_term = jnp.sum(end * t1h * is_lastv, keepdims=True)
    last_emit_term = jnp.sum(emit_all * wm * is_posl, keepdims=True)

    total = (start_term + emit_term + trans_term + end_term + last_emit_term
             - jnp.sum(log_z, keepdims=True))                          # (1,1)

    # ---------------- single lane-dense output slab (one writeback DMA) -----
    out_ref[:, O_FS:O_FS + H] = padded
    out_ref[:, O_LOGITS:O_LOGITS + L] = logits
    out_ref[:, O_WM:O_WM + 1] = wm
    out_ref[:, O_LL:O_LL + 1] = jnp.broadcast_to(total, (BW, 1))
    out_ref[:, O_LL + 1:OCOLS] = jnp.zeros((BW, OCOLS - O_LL - 1), f32)


# --------------------------------------------------------------------------
# Wrapper: single fused pallas_call, no grid (single step, no double buffers)
# --------------------------------------------------------------------------
@jax.jit
def bert_crf_forward(packed, input_ids, attention_mask, word_slab):
    # glue: embedding + position lookup, flattened to (B*S, H)
    x = packed['emb'][input_ids] + packed['pos'][None, :, :]        # (B, S, H)
    x_flat = x.reshape(BS, H).astype(jnp.float32)

    # glue: additive attention bias = block-diagonal over batch + key padding
    batch_id = jnp.arange(BS, dtype=jnp.int32) // S
    same = (batch_id[:, None] == batch_id[None, :]).astype(jnp.float32)
    key_valid = attention_mask.astype(jnp.float32).reshape(1, BS)
    attn_bias = (1.0 - same * key_valid) * NEG_INF                   # (BS, BS)

    tok_rows = jnp.concatenate([x_flat, attn_bias], axis=1)         # (BS, 64)
    data = jnp.concatenate([tok_rows, word_slab], axis=0)           # (48, 64)

    out = pl.pallas_call(
        bert_crf_kernel,
        out_shape=jax.ShapeDtypeStruct((BW, OCOLS), jnp.float32),
    )(data, packed['encw'], packed['cvec'])

    fs = out[:, O_FS:O_FS + H].reshape(B, W, H)
    logits = out[:, O_LOGITS:O_LOGITS + L].reshape(B, W, L)
    word_mask = (out[:, O_WM] > 0.5).reshape(B, W)
    loss = -out[0, O_LL]                                            # -crf(...)
    return {'logits': logits, 'mask': word_mask, 'loss': loss,
            'first_subword': fs}


# --------------------------------------------------------------------------
# Deterministic parameter init + one-time slab packing
# --------------------------------------------------------------------------
def init_params(key):
    ks = jax.random.split(key, 10)

    def nrm(k, shape, scale=0.02):
        return (scale * jax.random.normal(k, shape)).astype(jnp.float32)

    return {
        'emb': nrm(ks[0], (VOCAB, H)), 'pos': nrm(ks[1], (S, H)),
        'wqkv': nrm(ks[2], (H, 3 * H)), 'bqkv': jnp.zeros((1, 3 * H), jnp.float32),
        'wo': nrm(ks[3], (H, H)), 'bo': jnp.zeros((1, H), jnp.float32),
        'ln1_g': jnp.ones((1, H), jnp.float32), 'ln1_b': jnp.zeros((1, H), jnp.float32),
        'w1': nrm(ks[4], (H, FF)), 'b1': jnp.zeros((1, FF), jnp.float32),
        'w2': nrm(ks[5], (FF, H)), 'b2': jnp.zeros((1, H), jnp.float32),
        'ln2_g': jnp.ones((1, H), jnp.float32), 'ln2_b': jnp.zeros((1, H), jnp.float32),
        'w_out': nrm(ks[6], (H, L)), 'b_out': jnp.zeros((1, L), jnp.float32),
        'crf_trans': nrm(ks[7], (L, L), 0.1),
        'crf_start': nrm(ks[8], (1, L), 0.1),
        'crf_end': nrm(ks[9], (1, L), 0.1),
    }


def pack_params(p):
    """Pack the constant weights once into two lane-dense VMEM slabs."""
    encw = jnp.zeros((ENCW_ROWS, 128), jnp.bfloat16)
    encw = encw.at[0:H, 0:3 * H].set(p['wqkv'].astype(jnp.bfloat16))
    encw = encw.at[H:2 * H, 0:H].set(p['wo'].astype(jnp.bfloat16))
    encw = encw.at[2 * H:3 * H, 0:FF].set(p['w1'].astype(jnp.bfloat16))
    encw = encw.at[3 * H:3 * H + FF, 0:H].set(p['w2'].astype(jnp.bfloat16))

    cvec = jnp.zeros((CVEC_ROWS, 128), jnp.float32)
    cvec = cvec.at[R_BQKV, 0:3 * H].set(p['bqkv'][0])
    cvec = cvec.at[R_BO, 0:H].set(p['bo'][0])
    cvec = cvec.at[R_LN1G, 0:H].set(p['ln1_g'][0])
    cvec = cvec.at[R_LN1B, 0:H].set(p['ln1_b'][0])
    cvec = cvec.at[R_B1, 0:FF].set(p['b1'][0])
    cvec = cvec.at[R_B2, 0:H].set(p['b2'][0])
    cvec = cvec.at[R_LN2G, 0:H].set(p['ln2_g'][0])
    cvec = cvec.at[R_LN2B, 0:H].set(p['ln2_b'][0])
    cvec = cvec.at[R_BOUT, 0:L].set(p['b_out'][0])
    cvec = cvec.at[R_START, 0:L].set(p['crf_start'][0])
    cvec = cvec.at[R_END, 0:L].set(p['crf_end'][0])
    cvec = cvec.at[R_WOUT:R_WOUT + H, 0:L].set(p['w_out'])
    cvec = cvec.at[R_TRANS:R_TRANS + L, C_TRANS:C_TRANS + L].set(p['crf_trans'])
    return {'encw': encw, 'cvec': cvec, 'emb': p['emb'], 'pos': p['pos']}


if __name__ == "__main__":
    key = jax.random.PRNGKey(0)
    pk, dk = jax.random.split(key)
    params = init_params(pk)
    packed = pack_params(params)

    # synthetic batch (what collate_fn / tokenize_and_track would produce)
    tok_lens = [14, 11]                               # valid subtokens / example
    word_idx = [[0, 2, 3, 5, 7, 8, 10, 12],           # first-subtoken pos, ex 0
                [0, 1, 4, 6, 8, 9]]                   # ex 1
    seq_length = [len(wi) for wi in word_idx]

    input_ids = jax.random.randint(dk, (B, S), 1, VOCAB).astype(jnp.int32)
    pos_ids = jnp.arange(S)[None, :]
    attention_mask = (pos_ids < jnp.array(tok_lens)[:, None]).astype(jnp.float32)
    input_ids = jnp.where(attention_mask > 0, input_ids, 0)

    # gold labels y (padded with 0), as one-hot for the CRF kernel
    rng = np.random.RandomState(0)
    y_np = np.zeros((B, W), np.int32)
    for b in range(B):
        y_np[b, :seq_length[b]] = rng.randint(0, L, size=seq_length[b])

    # host-side glue replacing masked_select/split/pad_sequence + label one-hot:
    # one packed word-level slab (selector, gold one-hots, position/valid masks)
    word_np = np.zeros((BW, DCOLS), np.float32)
    for b in range(B):
        n = seq_length[b]
        for wi, s_pos in enumerate(word_idx[b]):
            r = b * W + wi
            word_np[r, C_SEL + b * S + s_pos] = 1.0           # selector one-hot
            word_np[r, C_VALID] = 1.0                         # word validity
        for wi in range(W):
            r = b * W + wi
            word_np[r, C_T1H + y_np[b, wi]] = 1.0             # gold tag one-hot
            if wi + 1 < W:
                word_np[r, C_T1HN + y_np[b, wi + 1]] = 1.0    # next-tag one-hot
                word_np[r, C_NOTLAST] = 1.0
                if wi + 1 < n:
                    word_np[r, C_VALIDN] = 1.0
            if wi == 0:
                word_np[r, C_ISFIRST] = 1.0
            if wi == n - 1:
                word_np[r, C_ISLASTV] = 1.0                   # last VALID word
            if wi == W - 1:
                word_np[r, C_ISPOSL] = 1.0                    # last position
    word_slab = jnp.asarray(word_np)

    out = bert_crf_forward(packed, input_ids, attention_mask, word_slab)
    jax.block_until_ready(out)
    assert out['logits'].shape == (B, W, L)
    assert out['mask'].shape == (B, W)
    assert out['first_subword'].shape == (B, W, H)
    assert bool(jnp.isfinite(out['loss']))
    print("KERNEL_OK")
</pallas_src>

<mosaic_0001>
module attributes {stable_mosaic.version = 11 : i64} {
  func.func @bert_crf_kernel(%arg0: memref<48x64xf32, #tpu.memory_space<vmem>>, %arg1: memref<224x128xbf16, #tpu.memory_space<vmem>>, %arg2: memref<48x128xf32, #tpu.memory_space<vmem>>, %arg3: memref<16x128xf32, #tpu.memory_space<vmem>>) attributes {dimension_semantics = [], scalar_prefetch = 0 : i64, scratch_operands = 0 : i64, tpu.core_type = #tpu.core_type<tc>} {
    %c0 = arith.constant 0 : index
    %c0_0 = arith.constant 0 : index
    %0 = vector.load %arg0[%c0, %c0_0] : memref<48x64xf32, #tpu.memory_space<vmem>>, vector<32x32xf32>
    %c0_1 = arith.constant 0 : index
    %c32 = arith.constant 32 : index
    %1 = vector.load %arg0[%c0_1, %c32] : memref<48x64xf32, #tpu.memory_space<vmem>>, vector<32x32xf32>
    %c32_2 = arith.constant 32 : index
    %c0_3 = arith.constant 0 : index
    %2 = vector.load %arg0[%c32_2, %c0_3] : memref<48x64xf32, #tpu.memory_space<vmem>>, vector<16x32xf32>
    %c32_4 = arith.constant 32 : index
    %c32_5 = arith.constant 32 : index
    %3 = vector.load %arg0[%c32_4, %c32_5] : memref<48x64xf32, #tpu.memory_space<vmem>>, vector<16x6xf32>
    %c32_6 = arith.constant 32 : index
    %c38 = arith.constant 38 : index
    %4 = vector.load %arg0[%c32_6, %c38] : memref<48x64xf32, #tpu.memory_space<vmem>>, vector<16x6xf32>
    %c32_7 = arith.constant 32 : index
    %c44 = arith.constant 44 : index
    %5 = vector.load %arg0[%c32_7, %c44] : memref<48x64xf32, #tpu.memory_space<vmem>>, vector<16x1xf32>
    %c32_8 = arith.constant 32 : index
    %c45 = arith.constant 45 : index
    %6 = vector.load %arg0[%c32_8, %c45] : memref<48x64xf32, #tpu.memory_space<vmem>>, vector<16x1xf32>
    %c32_9 = arith.constant 32 : index
    %c46 = arith.constant 46 : index
    %7 = vector.load %arg0[%c32_9, %c46] : memref<48x64xf32, #tpu.memory_space<vmem>>, vector<16x1xf32>
    %c32_10 = arith.constant 32 : index
    %c47 = arith.constant 47 : index
    %8 = vector.load %arg0[%c32_10, %c47] : memref<48x64xf32, #tpu.memory_space<vmem>>, vector<16x1xf32>
    %c32_11 = arith.constant 32 : index
    %c48 = arith.constant 48 : index
    %9 = vector.load %arg0[%c32_11, %c48] : memref<48x64xf32, #tpu.memory_space<vmem>>, vector<16x1xf32>
    %c32_12 = arith.constant 32 : index
    %c49 = arith.constant 49 : index
    %10 = vector.load %arg0[%c32_12, %c49] : memref<48x64xf32, #tpu.memory_space<vmem>>, vector<16x1xf32>
    %c0_13 = arith.constant 0 : index
    %c0_14 = arith.constant 0 : index
    %11 = vector.load %arg1[%c0_13, %c0_14] : memref<224x128xbf16, #tpu.memory_space<vmem>>, vector<32x96xbf16>
    %c32_15 = arith.constant 32 : index
    %c0_16 = arith.constant 0 : index
    %12 = vector.load %arg1[%c32_15, %c0_16] : memref<224x128xbf16, #tpu.memory_space<vmem>>, vector<32x32xbf16>
    %c64 = arith.constant 64 : index
    %c0_17 = arith.constant 0 : index
    %13 = vector.load %arg1[%c64, %c0_17] : memref<224x128xbf16, #tpu.memory_space<vmem>>, vector<32x128xbf16>
    %c96 = arith.constant 96 : index
    %c0_18 = arith.constant 0 : index
    %14 = vector.load %arg1[%c96, %c0_18] : memref<224x128xbf16, #tpu.memory_space<vmem>>, vector<128x32xbf16>
    %c0_19 = arith.constant 0 : index
    %c0_20 = arith.constant 0 : index
    %15 = vector.load %arg2[%c0_19, %c0_20] : memref<48x128xf32, #tpu.memory_space<vmem>>, vector<1x96xf32>
    %c1 = arith.constant 1 : index
    %c0_21 = arith.constant 0 : index
    %16 = vector.load %arg2[%c1, %c0_21] : memref<48x128xf32, #tpu.memory_space<vmem>>, vector<1x32xf32>
    %c2 = arith.constant 2 : index
    %c0_22 = arith.constant 0 : index
    %17 = vector.load %arg2[%c2, %c0_22] : memref<48x128xf32, #tpu.memory_space<vmem>>, vector<1x32xf32>
    %c3 = arith.constant 3 : index
    %c0_23 = arith.constant 0 : index
    %18 = vector.load %arg2[%c3, %c0_23] : memref<48x128xf32, #tpu.memory_space<vmem>>, vector<1x32xf32>
    %c4 = arith.constant 4 : index
    %c0_24 = arith.constant 0 : index
    %19 = vector.load %arg2[%c4, %c0_24] : memref<48x128xf32, #tpu.memory_space<vmem>>, vector<1x128xf32>
    %c5 = arith.constant 5 : index
    %c0_25 = arith.constant 0 : index
    %20 = vector.load %arg2[%c5, %c0_25] : memref<48x128xf32, #tpu.memory_space<vmem>>, vector<1x32xf32>
    %c6 = arith.constant 6 : index
    %c0_26 = arith.constant 0 : index
    %21 = vector.load %arg2[%c6, %c0_26] : memref<48x128xf32, #tpu.memory_space<vmem>>, vector<1x32xf32>
    %c7 = arith.constant 7 : index
    %c0_27 = arith.constant 0 : index
    %22 = vector.load %arg2[%c7, %c0_27] : memref<48x128xf32, #tpu.memory_space<vmem>>, vector<1x32xf32>
    %c8 = arith.constant 8 : index
    %c0_28 = arith.constant 0 : index
    %23 = vector.load %arg2[%c8, %c0_28] : memref<48x128xf32, #tpu.memory_space<vmem>>, vector<1x6xf32>
    %c9 = arith.constant 9 : index
    %c0_29 = arith.constant 0 : index
    %24 = vector.load %arg2[%c9, %c0_29] : memref<48x128xf32, #tpu.memory_space<vmem>>, vector<1x6xf32>
    %c10 = arith.constant 10 : index
    %c0_30 = arith.constant 0 : index
    %25 = vector.load %arg2[%c10, %c0_30] : memref<48x128xf32, #tpu.memory_space<vmem>>, vector<1x6xf32>
    %c16 = arith.constant 16 : index
    %c0_31 = arith.constant 0 : index
    %26 = vector.load %arg2[%c16, %c0_31] : memref<48x128xf32, #tpu.memory_space<vmem>>, vector<32x6xf32>
    %c16_32 = arith.constant 16 : index
    %c8_33 = arith.constant 8 : index
    %27 = vector.load %arg2[%c16_32, %c8_33] : memref<48x128xf32, #tpu.memory_space<vmem>>, vector<6x6xf32>
    %28 = arith.truncf %0 : vector<32x32xf32> to vector<32x32xbf16>
    %cst = arith.constant dense<0.000000e+00> : vector<32x96xf32>
    %29 = tpu.matmul %28, %11, %cst {dimension_numbers = #tpu.dot_dimension_numbers<[1], [0], [0], [1], [0, 0, 1, 1], [], []>} : vector<32x32xbf16>, vector<32x96xbf16>, vector<32x96xf32> -> vector<32x96xf32>
    %30 = vector.broadcast %15 : vector<1x96xf32> to vector<32x96xf32>
    %31 = arith.addf %29, %30 : vector<32x96xf32>
    %32 = vector.extract_strided_slice %31 {offsets = [0, 0], sizes = [32, 32], strides = [1, 1]} : vector<32x96xf32> to vector<32x32xf32>
    %33 = vector.extract_strided_slice %31 {offsets = [0, 32], sizes = [32, 32], strides = [1, 1]} : vector<32x96xf32> to vector<32x32xf32>
    %34 = vector.extract_strided_slice %31 {offsets = [0, 64], sizes = [32, 32], strides = [1, 1]} : vector<32x96xf32> to vector<32x32xf32>
    "tpu.trace_start"() <{level = 10 : i32, message = "qd,kd->qk"}> : () -> ()
    %cst_34 = arith.constant dense<0.000000e+00> : vector<32x32xf32>
    %35 = tpu.matmul %32, %33, %cst_34 {dimension_numbers = #tpu.dot_dimension_numbers<[1], [1], [0], [0], [0, 0, 1, 0], [], []>} : vector<32x32xf32>, vector<32x32xf32>, vector<32x32xf32> -> vector<32x32xf32>
    "tpu.trace_stop"() : () -> ()
    %cst_35 = arith.constant 0.176776692 : f32
    %36 = vector.broadcast %cst_35 : f32 to vector<32x32xf32>
    %37 = arith.mulf %35, %36 : vector<32x32xf32>
    %38 = arith.addf %37, %1 : vector<32x32xf32>
    %cst_36 = arith.constant dense<0xFF800000> : vector<32xf32>
    %39 = vector.multi_reduction <maximumf>, %38, %cst_36 [1] : vector<32x32xf32> to vector<32xf32>
    %40 = vector.shape_cast %39 : vector<32xf32> to vector<32x1xf32>
    %41 = vector.broadcast %40 : vector<32x1xf32> to vector<32x32xf32>
    %42 = arith.subf %38, %41 : vector<32x32xf32>
    %43 = math.exp %42 : vector<32x32xf32>
    %cst_37 = arith.constant dense<0.000000e+00> : vector<32xf32>
    %44 = vector.multi_reduction <add>, %43, %cst_37 [1] : vector<32x32xf32> to vector<32xf32>
    %45 = vector.shape_cast %44 : vector<32xf32> to vector<32x1xf32>
    %46 = tpu.reciprocal %45 {approx = true} : vector<32x1xf32> -> vector<32x1xf32>
    %47 = vector.broadcast %46 : vector<32x1xf32> to vector<32x32xf32>
    %48 = arith.mulf %43, %47 : vector<32x32xf32>
    %cst_38 = arith.constant dense<0.000000e+00> : vector<32x32xf32>
    %49 = tpu.matmul %48, %34, %cst_38 {dimension_numbers = #tpu.dot_dimension_numbers<[1], [0], [0], [1], [0, 0, 1, 1], [], []>} : vector<32x32xf32>, vector<32x32xf32>, vector<32x32xf32> -> vector<32x32xf32>
    %50 = arith.truncf %49 : vector<32x32xf32> to vector<32x32xbf16>
    %cst_39 = arith.constant dense<0.000000e+00> : vector<32x32xf32>
    %51 = tpu.matmul %50, %12, %cst_39 {dimension_numbers = #tpu.dot_dimension_numbers<[1], [0], [0], [1], [0, 0, 1, 1], [], []>} : vector<32x32xbf16>, vector<32x32xbf16>, vector<32x32xf32> -> vector<32x32xf32>
    %52 = vector.broadcast %16 : vector<1x32xf32> to vector<32x32xf32>
    %53 = arith.addf %51, %52 : vector<32x32xf32>
    %54 = arith.addf %0, %53 : vector<32x32xf32>
    %cst_40 = arith.constant dense<0.000000e+00> : vector<32xf32>
    %55 = vector.multi_reduction <add>, %54, %cst_40 [1] : vector<32x32xf32> to vector<32xf32>
    %56 = vector.shape_cast %55 : vector<32xf32> to vector<32x1xf32>
    %cst_41 = arith.constant 3.200000e+01 : f32
    %57 = vector.broadcast %cst_41 : f32 to vector<32x1xf32>
    %58 = arith.divf %56, %57 : vector<32x1xf32>
    %59 = vector.broadcast %58 : vector<32x1xf32> to vector<32x32xf32>
    %60 = arith.subf %54, %59 : vector<32x32xf32>
    %61 = arith.mulf %60, %60 : vector<32x32xf32>
    %cst_42 = arith.constant dense<0.000000e+00> : vector<32xf32>
    %62 = vector.multi_reduction <add>, %61, %cst_42 [1] : vector<32x32xf32> to vector<32xf32>
    %63 = vector.shape_cast %62 : vector<32xf32> to vector<32x1xf32>
    %cst_43 = arith.constant 3.200000e+01 : f32
    %64 = vector.broadcast %cst_43 : f32 to vector<32x1xf32>
    %65 = arith.divf %63, %64 : vector<32x1xf32>
    %66 = vector.broadcast %58 : vector<32x1xf32> to vector<32x32xf32>
    %67 = arith.subf %54, %66 : vector<32x32xf32>
    %cst_44 = arith.constant 9.99999996E-13 : f32
    %68 = vector.broadcast %cst_44 : f32 to vector<32x1xf32>
    %69 = arith.addf %65, %68 : vector<32x1xf32>
    %70 = math.rsqrt %69 : vector<32x1xf32>
    %71 = vector.broadcast %70 : vector<32x1xf32> to vector<32x32xf32>
    %72 = arith.mulf %67, %71 : vector<32x32xf32>
    %73 = vector.broadcast %17 : vector<1x32xf32> to vector<32x32xf32>
    %74 = arith.mulf %72, %73 : vector<32x32xf32>
    %75 = vector.broadcast %18 : vector<1x32xf32> to vector<32x32xf32>
    %76 = arith.addf %74, %75 : vector<32x32xf32>
    %77 = arith.truncf %76 : vector<32x32xf32> to vector<32x32xbf16>
    %cst_45 = arith.constant dense<0.000000e+00> : vector<32x128xf32>
    %78 = tpu.matmul %77, %13, %cst_45 {dimension_numbers = #tpu.dot_dimension_numbers<[1], [0], [0], [1], [0, 0, 1, 1], [], []>} : vector<32x32xbf16>, vector<32x128xbf16>, vector<32x128xf32> -> vector<32x128xf32>
    %79 = vector.broadcast %19 : vector<1x128xf32> to vector<32x128xf32>
    %80 = arith.addf %78, %79 : vector<32x128xf32>
    %81 = arith.mulf %80, %80 : vector<32x128xf32>
    %82 = arith.mulf %80, %81 : vector<32x128xf32>
    %cst_46 = arith.constant 4.471500e-02 : f32
    %83 = vector.broadcast %cst_46 : f32 to vector<32x128xf32>
    %84 = arith.mulf %83, %82 : vector<32x128xf32>
    %85 = arith.addf %80, %84 : vector<32x128xf32>
    %cst_47 = arith.constant 0.797884583 : f32
    %86 = vector.broadcast %cst_47 : f32 to vector<32x128xf32>
    %87 = arith.mulf %86, %85 : vector<32x128xf32>
    %88 = math.tanh %87 : vector<32x128xf32>
    %cst_48 = arith.constant 1.000000e+00 : f32
    %89 = vector.broadcast %cst_48 : f32 to vector<32x128xf32>
    %90 = arith.addf %89, %88 : vector<32x128xf32>
    %cst_49 = arith.constant 5.000000e-01 : f32
    %91 = vector.broadcast %cst_49 : f32 to vector<32x128xf32>
    %92 = arith.mulf %91, %90 : vector<32x128xf32>
    %93 = arith.mulf %80, %92 : vector<32x128xf32>
    %94 = arith.truncf %93 : vector<32x128xf32> to vector<32x128xbf16>
    %cst_50 = arith.constant dense<0.000000e+00> : vector<32x32xf32>
    %95 = tpu.matmul %94, %14, %cst_50 {dimension_numbers = #tpu.dot_dimension_numbers<[1], [0], [0], [1], [0, 0, 1, 1], [], []>} : vector<32x128xbf16>, vector<128x32xbf16>, vector<32x32xf32> -> vector<32x32xf32>
    %96 = vector.broadcast %20 : vector<1x32xf32> to vector<32x32xf32>
    %97 = arith.addf %95, %96 : vector<32x32xf32>
    %98 = arith.addf %76, %97 : vector<32x32xf32>
    %cst_51 = arith.constant dense<0.000000e+00> : vector<32xf32>
    %99 = vector.multi_reduction <add>, %98, %cst_51 [1] : vector<32x32xf32> to vector<32xf32>
    %100 = vector.shape_cast %99 : vector<32xf32> to vector<32x1xf32>
    %cst_52 = arith.constant 3.200000e+01 : f32
    %101 = vector.broadcast %cst_52 : f32 to vector<32x1xf32>
    %102 = arith.divf %100, %101 : vector<32x1xf32>
    %103 = vector.broadcast %102 : vector<32x1xf32> to vector<32x32xf32>
    %104 = arith.subf %98, %103 : vector<32x32xf32>
    %105 = arith.mulf %104, %104 : vector<32x32xf32>
    %cst_53 = arith.constant dense<0.000000e+00> : vector<32xf32>
    %106 = vector.multi_reduction <add>, %105, %cst_53 [1] : vector<32x32xf32> to vector<32xf32>
    %107 = vector.shape_cast %106 : vector<32xf32> to vector<32x1xf32>
    %cst_54 = arith.constant 3.200000e+01 : f32
    %108 = vector.broadcast %cst_54 : f32 to vector<32x1xf32>
    %109 = arith.divf %107, %108 : vector<32x1xf32>
    %110 = vector.broadcast %102 : vector<32x1xf32> to vector<32x32xf32>
    %111 = arith.subf %98, %110 : vector<32x32xf32>
    %cst_55 = arith.constant 9.99999996E-13 : f32
    %112 = vector.broadcast %cst_55 : f32 to vector<32x1xf32>
    %113 = arith.addf %109, %112 : vector<32x1xf32>
    %114 = math.rsqrt %113 : vector<32x1xf32>
    %115 = vector.broadcast %114 : vector<32x1xf32> to vector<32x32xf32>
    %116 = arith.mulf %111, %115 : vector<32x32xf32>
    %117 = vector.broadcast %21 : vector<1x32xf32> to vector<32x32xf32>
    %118 = arith.mulf %116, %117 : vector<32x32xf32>
    %119 = vector.broadcast %22 : vector<1x32xf32> to vector<32x32xf32>
    %120 = arith.addf %118, %119 : vector<32x32xf32>
    %cst_56 = arith.constant dense<0.000000e+00> : vector<16x32xf32>
    %121 = tpu.matmul %2, %120, %cst_56 {dimension_numbers = #tpu.dot_dimension_numbers<[1], [0], [0], [1], [0, 0, 1, 1], [], []>} : vector<16x32xf32>, vector<32x32xf32>, vector<16x32xf32> -> vector<16x32xf32>
    %cst_57 = arith.constant 0.000000e+00 : f32
    %122 = vector.broadcast %cst_57 : f32 to vector<16x1xf32>
    %123 = arith.cmpf ogt, %5, %122 : vector<16x1xf32>
    %cst_58 = arith.constant -1.000000e+00 : f32
    %124 = vector.shape_cast %123 : vector<16x1xi1> to vector<16x1xi1>
    %125 = vector.broadcast %124 : vector<16x1xi1> to vector<16x32xi1>
    %126 = vector.broadcast %cst_58 : f32 to vector<16x32xf32>
    %127 = arith.select %125, %121, %126 : vector<16x32xi1>, vector<16x32xf32>
    %cst_59 = arith.constant dense<0.000000e+00> : vector<16x6xf32>
    %128 = tpu.matmul %127, %26, %cst_59 {dimension_numbers = #tpu.dot_dimension_numbers<[1], [0], [0], [1], [0, 0, 1, 1], [], []>} : vector<16x32xf32>, vector<32x6xf32>, vector<16x6xf32> -> vector<16x6xf32>
    %129 = vector.broadcast %23 : vector<1x6xf32> to vector<16x6xf32>
    %130 = arith.addf %128, %129 : vector<16x6xf32>
    %131 = vector.shape_cast %130 : vector<16x6xf32> to vector<2x8x6xf32>
    %132 = vector.shape_cast %5 : vector<16x1xf32> to vector<2x8x1xf32>
    %cst_60 = arith.constant dense<0xFF800000> : vector<6xf32>
    %133 = vector.multi_reduction <maximumf>, %27, %cst_60 [0] : vector<6x6xf32> to vector<6xf32>
    %134 = vector.shape_cast %133 : vector<6xf32> to vector<1x6xf32>
    %135 = vector.broadcast %134 : vector<1x6xf32> to vector<6x6xf32>
    %136 = arith.subf %27, %135 : vector<6x6xf32>
    %137 = math.exp %136 : vector<6x6xf32>
    %138 = vector.extract_strided_slice %131 {offsets = [0, 0, 0], sizes = [2, 1, 6], strides = [1, 1, 1]} : vector<2x8x6xf32> to vector<2x1x6xf32>
    %139 = vector.shape_cast %138 : vector<2x1x6xf32> to vector<2x6xf32>
    %140 = vector.broadcast %24 : vector<1x6xf32> to vector<2x6xf32>
    %141 = arith.addf %140, %139 : vector<2x6xf32>
    %cst_61 = arith.constant dense<0xFF800000> : vector<2xf32>
    %142 = vector.multi_reduction <maximumf>, %141, %cst_61 [1] : vector<2x6xf32> to vector<2xf32>
    %143 = vector.shape_cast %142 : vector<2xf32> to vector<2x1xf32>
    %144 = vector.broadcast %143 : vector<2x1xf32> to vector<2x6xf32>
    %145 = arith.subf %141, %144 : vector<2x6xf32>
    %146 = math.exp %145 : vector<2x6xf32>
    %147 = vector.extract_strided_slice %146 {offsets = [0, 0], sizes = [2, 1], strides = [1, 1]} : vector<2x6xf32> to vector<2x1xf32>
    %148 = vector.extract_strided_slice %137 {offsets = [0, 0], sizes = [1, 6], strides = [1, 1]} : vector<6x6xf32> to vector<1x6xf32>
    %149 = vector.broadcast %147 : vector<2x1xf32> to vector<2x6xf32>
    %150 = vector.broadcast %148 : vector<1x6xf32> to vector<2x6xf32>
    %151 = arith.mulf %149, %150 : vector<2x6xf32>
    %152 = vector.extract_strided_slice %146 {offsets = [0, 1], sizes = [2, 1], strides = [1, 1]} : vector<2x6xf32> to vector<2x1xf32>
    %153 = vector.extract_strided_slice %137 {offsets = [1, 0], sizes = [1, 6], strides = [1, 1]} : vector<6x6xf32> to vector<1x6xf32>
    %154 = vector.broadcast %152 : vector<2x1xf32> to vector<2x6xf32>
    %155 = vector.broadcast %153 : vector<1x6xf32> to vector<2x6xf32>
    %156 = arith.mulf %154, %155 : vector<2x6xf32>
    %157 = arith.addf %151, %156 : vector<2x6xf32>
    %158 = vector.extract_strided_slice %146 {offsets = [0, 2], sizes = [2, 1], strides = [1, 1]} : vector<2x6xf32> to vector<2x1xf32>
    %159 = vector.extract_strided_slice %137 {offsets = [2, 0], sizes = [1, 6], strides = [1, 1]} : vector<6x6xf32> to vector<1x6xf32>
    %160 = vector.broadcast %158 : vector<2x1xf32> to vector<2x6xf32>
    %161 = vector.broadcast %159 : vector<1x6xf32> to vector<2x6xf32>
    %162 = arith.mulf %160, %161 : vector<2x6xf32>
    %163 = arith.addf %157, %162 : vector<2x6xf32>
    %164 = vector.extract_strided_slice %146 {offsets = [0, 3], sizes = [2, 1], strides = [1, 1]} : vector<2x6xf32> to vector<2x1xf32>
    %165 = vector.extract_strided_slice %137 {offsets = [3, 0], sizes = [1, 6], strides = [1, 1]} : vector<6x6xf32> to vector<1x6xf32>
    %166 = vector.broadcast %164 : vector<2x1xf32> to vector<2x6xf32>
    %167 = vector.broadcast %165 : vector<1x6xf32> to vector<2x6xf32>
    %168 = arith.mulf %166, %167 : vector<2x6xf32>
    %169 = arith.addf %163, %168 : vector<2x6xf32>
    %170 = vector.extract_strided_slice %146 {offsets = [0, 4], sizes = [2, 1], strides = [1, 1]} : vector<2x6xf32> to vector<2x1xf32>
    %171 = vector.extract_strided_slice %137 {offsets = [4, 0], sizes = [1, 6], strides = [1, 1]} : vector<6x6xf32> to vector<1x6xf32>
    %172 = vector.broadcast %170 : vector<2x1xf32> to vector<2x6xf32>
    %173 = vector.broadcast %171 : vector<1x6xf32> to vector<2x6xf32>
    %174 = arith.mulf %172, %173 : vector<2x6xf32>
    %175 = arith.addf %169, %174 : vector<2x6xf32>
    %176 = vector.extract_strided_slice %146 {offsets = [0, 5], sizes = [2, 1], strides = [1, 1]} : vector<2x6xf32> to vector<2x1xf32>
    %177 = vector.extract_strided_slice %137 {offsets = [5, 0], sizes = [1, 6], strides = [1, 1]} : vector<6x6xf32> to vector<1x6xf32>
    %178 = vector.broadcast %176 : vector<2x1xf32> to vector<2x6xf32>
    %179 = vector.broadcast %177 : vector<1x6xf32> to vector<2x6xf32>
    %180 = arith.mulf %178, %179 : vector<2x6xf32>
    %181 = arith.addf %175, %180 : vector<2x6xf32>
    %182 = vector.extract_strided_slice %131 {offsets = [0, 1, 0], sizes = [2, 1, 6], strides = [1, 1, 1]} : vector<2x8x6xf32> to vector<2x1x6xf32>
    %183 = vector.shape_cast %182 : vector<2x1x6xf32> to vector<2x6xf32>
    %184 = vector.broadcast %143 : vector<2x1xf32> to vector<2x6xf32>
    %185 = arith.addf %183, %184 : vector<2x6xf32>
    %186 = vector.broadcast %134 : vector<1x6xf32> to vector<2x6xf32>
    %187 = arith.addf %185, %186 : vector<2x6xf32>
    %188 = math.log %181 : vector<2x6xf32>
    %189 = arith.addf %187, %188 : vector<2x6xf32>
    %190 = vector.extract_strided_slice %132 {offsets = [0, 1, 0], sizes = [2, 1, 1], strides = [1, 1, 1]} : vector<2x8x1xf32> to vector<2x1x1xf32>
    %191 = vector.shape_cast %190 : vector<2x1x1xf32> to vector<2x1xf32>
    %192 = vector.broadcast %191 : vector<2x1xf32> to vector<2x6xf32>
    %193 = arith.mulf %189, %192 : vector<2x6xf32>
    %cst_62 = arith.constant 1.000000e+00 : f32
    %194 = vector.broadcast %cst_62 : f32 to vector<2x1xf32>
    %195 = arith.subf %194, %191 : vector<2x1xf32>
    %196 = vector.broadcast %195 : vector<2x1xf32> to vector<2x6xf32>
    %197 = arith.mulf %141, %196 : vector<2x6xf32>
    %198 = arith.addf %193, %197 : vector<2x6xf32>
    %cst_63 = arith.constant dense<0xFF800000> : vector<2xf32>
    %199 = vector.multi_reduction <maximumf>, %198, %cst_63 [1] : vector<2x6xf32> to vector<2xf32>
    %200 = vector.shape_cast %199 : vector<2xf32> to vector<2x1xf32>
    %201 = vector.broadcast %200 : vector<2x1xf32> to vector<2x6xf32>
    %202 = arith.subf %198, %201 : vector<2x6xf32>
    %203 = math.exp %202 : vector<2x6xf32>
    %204 = vector.extract_strided_slice %203 {offsets = [0, 0], sizes = [2, 1], strides = [1, 1]} : vector<2x6xf32> to vector<2x1xf32>
    %205 = vector.extract_strided_slice %137 {offsets = [0, 0], sizes = [1, 6], strides = [1, 1]} : vector<6x6xf32> to vector<1x6xf32>
    %206 = vector.broadcast %204 : vector<2x1xf32> to vector<2x6xf32>
    %207 = vector.broadcast %205 : vector<1x6xf32> to vector<2x6xf32>
    %208 = arith.mulf %206, %207 : vector<2x6xf32>
    %209 = vector.extract_strided_slice %203 {offsets = [0, 1], sizes = [2, 1], strides = [1, 1]} : vector<2x6xf32> to vector<2x1xf32>
    %210 = vector.extract_strided_slice %137 {offsets = [1, 0], sizes = [1, 6], strides = [1, 1]} : vector<6x6xf32> to vector<1x6xf32>
    %211 = vector.broadcast %209 : vector<2x1xf32> to vector<2x6xf32>
    %212 = vector.broadcast %210 : vector<1x6xf32> to vector<2x6xf32>
    %213 = arith.mulf %211, %212 : vector<2x6xf32>
    %214 = arith.addf %208, %213 : vector<2x6xf32>
    %215 = vector.extract_strided_slice %203 {offsets = [0, 2], sizes = [2, 1], strides = [1, 1]} : vector<2x6xf32> to vector<2x1xf32>
    %216 = vector.extract_strided_slice %137 {offsets = [2, 0], sizes = [1, 6], strides = [1, 1]} : vector<6x6xf32> to vector<1x6xf32>
    %217 = vector.broadcast %215 : vector<2x1xf32> to vector<2x6xf32>
    %218 = vector.broadcast %216 : vector<1x6xf32> to vector<2x6xf32>
    %219 = arith.mulf %217, %218 : vector<2x6xf32>
    %220 = arith.addf %214, %219 : vector<2x6xf32>
    %221 = vector.extract_strided_slice %203 {offsets = [0, 3], sizes = [2, 1], strides = [1, 1]} : vector<2x6xf32> to vector<2x1xf32>
    %222 = vector.extract_strided_slice %137 {offsets = [3, 0], sizes = [1, 6], strides = [1, 1]} : vector<6x6xf32> to vector<1x6xf32>
    %223 = vector.broadcast %221 : vector<2x1xf32> to vector<2x6xf32>
    %224 = vector.broadcast %222 : vector<1x6xf32> to vector<2x6xf32>
    %225 = arith.mulf %223, %224 : vector<2x6xf32>
    %226 = arith.addf %220, %225 : vector<2x6xf32>
    %227 = vector.extract_strided_slice %203 {offsets = [0, 4], sizes = [2, 1], strides = [1, 1]} : vector<2x6xf32> to vector<2x1xf32>
    %228 = vector.extract_strided_slice %137 {offsets = [4, 0], sizes = [1, 6], strides = [1, 1]} : vector<6x6xf32> to vector<1x6xf32>
    %229 = vector.broadcast %227 : vector<2x1xf32> to vector<2x6xf32>
    %230 = vector.broadcast %228 : vector<1x6xf32> to vector<2x6xf32>
    %231 = arith.mulf %229, %230 : vector<2x6xf32>
    %232 = arith.addf %226, %231 : vector<2x6xf32>
    %233 = vector.extract_strided_slice %203 {offsets = [0, 5], sizes = [2, 1], strides = [1, 1]} : vector<2x6xf32> to vector<2x1xf32>
    %234 = vector.extract_strided_slice %137 {offsets = [5, 0], sizes = [1, 6], strides = [1, 1]} : vector<6x6xf32> to vector<1x6xf32>
    %235 = vector.broadcast %233 : vector<2x1xf32> to vector<2x6xf32>
    %236 = vector.broadcast %234 : vector<1x6xf32> to vector<2x6xf32>
    %237 = arith.mulf %235, %236 : vector<2x6xf32>
    %238 = arith.addf %232, %237 : vector<2x6xf32>
    %239 = vector.extract_strided_slice %131 {offsets = [0, 2, 0], sizes = [2, 1, 6], strides = [1, 1, 1]} : vector<2x8x6xf32> to vector<2x1x6xf32>
    %240 = vector.shape_cast %239 : vector<2x1x6xf32> to vector<2x6xf32>
    %241 = vector.broadcast %200 : vector<2x1xf32> to vector<2x6xf32>
    %242 = arith.addf %240, %241 : vector<2x6xf32>
    %243 = vector.broadcast %134 : vector<1x6xf32> to vector<2x6xf32>
    %244 = arith.addf %242, %243 : vector<2x6xf32>
    %245 = math.log %238 : vector<2x6xf32>
    %246 = arith.addf %244, %245 : vector<2x6xf32>
    %247 = vector.extract_strided_slice %132 {offsets = [0, 2, 0], sizes = [2, 1, 1], strides = [1, 1, 1]} : vector<2x8x1xf32> to vector<2x1x1xf32>
    %248 = vector.shape_cast %247 : vector<2x1x1xf32> to vector<2x1xf32>
    %249 = vector.broadcast %248 : vector<2x1xf32> to vector<2x6xf32>
    %250 = arith.mulf %246, %249 : vector<2x6xf32>
    %cst_64 = arith.constant 1.000000e+00 : f32
    %251 = vector.broadcast %cst_64 : f32 to vector<2x1xf32>
    %252 = arith.subf %251, %248 : vector<2x1xf32>
    %253 = vector.broadcast %252 : vector<2x1xf32> to vector<2x6xf32>
    %254 = arith.mulf %198, %253 : vector<2x6xf32>
    %255 = arith.addf %250, %254 : vector<2x6xf32>
    %cst_65 = arith.constant dense<0xFF800000> : vector<2xf32>
    %256 = vector.multi_reduction <maximumf>, %255, %cst_65 [1] : vector<2x6xf32> to vector<2xf32>
    %257 = vector.shape_cast %256 : vector<2xf32> to vector<2x1xf32>
    %258 = vector.broadcast %257 : vector<2x1xf32> to vector<2x6xf32>
    %259 = arith.subf %255, %258 : vector<2x6xf32>
    %260 = math.exp %259 : vector<2x6xf32>
    %261 = vector.extract_strided_slice %260 {offsets = [0, 0], sizes = [2, 1], strides = [1, 1]} : vector<2x6xf32> to vector<2x1xf32>
    %262 = vector.extract_strided_slice %137 {offsets = [0, 0], sizes = [1, 6], strides = [1, 1]} : vector<6x6xf32> to vector<1x6xf32>
    %263 = vector.broadcast %261 : vector<2x1xf32> to vector<2x6xf32>
    %264 = vector.broadcast %262 : vector<1x6xf32> to vector<2x6xf32>
    %265 = arith.mulf %263, %264 : vector<2x6xf32>
    %266 = vector.extract_strided_slice %260 {offsets = [0, 1], sizes = [2, 1], strides = [1, 1]} : vector<2x6xf32> to vector<2x1xf32>
    %267 = vector.extract_strided_slice %137 {offsets = [1, 0], sizes = [1, 6], strides = [1, 1]} : vector<6x6xf32> to vector<1x6xf32>
    %268 = vector.broadcast %266 : vector<2x1xf32> to vector<2x6xf32>
    %269 = vector.broadcast %267 : vector<1x6xf32> to vector<2x6xf32>
    %270 = arith.mulf %268, %269 : vector<2x6xf32>
    %271 = arith.addf %265, %270 : vector<2x6xf32>
    %272 = vector.extract_strided_slice %260 {offsets = [0, 2], sizes = [2, 1], strides = [1, 1]} : vector<2x6xf32> to vector<2x1xf32>
    %273 = vector.extract_strided_slice %137 {offsets = [2, 0], sizes = [1, 6], strides = [1, 1]} : vector<6x6xf32> to vector<1x6xf32>
    %274 = vector.broadcast %272 : vector<2x1xf32> to vector<2x6xf32>
    %275 = vector.broadcast %273 : vector<1x6xf32> to vector<2x6xf32>
    %276 = arith.mulf %274, %275 : vector<2x6xf32>
    %277 = arith.addf %271, %276 : vector<2x6xf32>
    %278 = vector.extract_strided_slice %260 {offsets = [0, 3], sizes = [2, 1], strides = [1, 1]} : vector<2x6xf32> to vector<2x1xf32>
    %279 = vector.extract_strided_slice %137 {offsets = [3, 0], sizes = [1, 6], strides = [1, 1]} : vector<6x6xf32> to vector<1x6xf32>
    %280 = vector.broadcast %278 : vector<2x1xf32> to vector<2x6xf32>
    %281 = vector.broadcast %279 : vector<1x6xf32> to vector<2x6xf32>
    %282 = arith.mulf %280, %281 : vector<2x6xf32>
    %283 = arith.addf %277, %282 : vector<2x6xf32>
    %284 = vector.extract_strided_slice %260 {offsets = [0, 4], sizes = [2, 1], strides = [1, 1]} : vector<2x6xf32> to vector<2x1xf32>
    %285 = vector.extract_strided_slice %137 {offsets = [4, 0], sizes = [1, 6], strides = [1, 1]} : vector<6x6xf32> to vector<1x6xf32>
    %286 = vector.broadcast %284 : vector<2x1xf32> to vector<2x6xf32>
    %287 = vector.broadcast %285 : vector<1x6xf32> to vector<2x6xf32>
    %288 = arith.mulf %286, %287 : vector<2x6xf32>
    %289 = arith.addf %283, %288 : vector<2x6xf32>
    %290 = vector.extract_strided_slice %260 {offsets = [0, 5], sizes = [2, 1], strides = [1, 1]} : vector<2x6xf32> to vector<2x1xf32>
    %291 = vector.extract_strided_slice %137 {offsets = [5, 0], sizes = [1, 6], strides = [1, 1]} : vector<6x6xf32> to vector<1x6xf32>
    %292 = vector.broadcast %290 : vector<2x1xf32> to vector<2x6xf32>
    %293 = vector.broadcast %291 : vector<1x6xf32> to vector<2x6xf32>
    %294 = arith.mulf %292, %293 : vector<2x6xf32>
    %295 = arith.addf %289, %294 : vector<2x6xf32>
    %296 = vector.extract_strided_slice %131 {offsets = [0, 3, 0], sizes = [2, 1, 6], strides = [1, 1, 1]} : vector<2x8x6xf32> to vector<2x1x6xf32>
    %297 = vector.shape_cast %296 : vector<2x1x6xf32> to vector<2x6xf32>
    %298 = vector.broadcast %257 : vector<2x1xf32> to vector<2x6xf32>
    %299 = arith.addf %297, %298 : vector<2x6xf32>
    %300 = vector.broadcast %134 : vector<1x6xf32> to vector<2x6xf32>
    %301 = arith.addf %299, %300 : vector<2x6xf32>
    %302 = math.log %295 : vector<2x6xf32>
    %303 = arith.addf %301, %302 : vector<2x6xf32>
    %304 = vector.extract_strided_slice %132 {offsets = [0, 3, 0], sizes = [2, 1, 1], strides = [1, 1, 1]} : vector<2x8x1xf32> to vector<2x1x1xf32>
    %305 = vector.shape_cast %304 : vector<2x1x1xf32> to vector<2x1xf32>
    %306 = vector.broadcast %305 : vector<2x1xf32> to vector<2x6xf32>
    %307 = arith.mulf %303, %306 : vector<2x6xf32>
    %cst_66 = arith.constant 1.000000e+00 : f32
    %308 = vector.broadcast %cst_66 : f32 to vector<2x1xf32>
    %309 = arith.subf %308, %305 : vector<2x1xf32>
    %310 = vector.broadcast %309 : vector<2x1xf32> to vector<2x6xf32>
    %311 = arith.mulf %255, %310 : vector<2x6xf32>
    %312 = arith.addf %307, %311 : vector<2x6xf32>
    %cst_67 = arith.constant dense<0xFF800000> : vector<2xf32>
    %313 = vector.multi_reduction <maximumf>, %312, %cst_67 [1] : vector<2x6xf32> to vector<2xf32>
    %314 = vector.shape_cast %313 : vector<2xf32> to vector<2x1xf32>
    %315 = vector.broadcast %314 : vector<2x1xf32> to vector<2x6xf32>
    %316 = arith.subf %312, %315 : vector<2x6xf32>
    %317 = math.exp %316 : vector<2x6xf32>
    %318 = vector.extract_strided_slice %317 {offsets = [0, 0], sizes = [2, 1], strides = [1, 1]} : vector<2x6xf32> to vector<2x1xf32>
    %319 = vector.extract_strided_slice %137 {offsets = [0, 0], sizes = [1, 6], strides = [1, 1]} : vector<6x6xf32> to vector<1x6xf32>
    %320 = vector.broadcast %318 : vector<2x1xf32> to vector<2x6xf32>
    %321 = vector.broadcast %319 : vector<1x6xf32> to vector<2x6xf32>
    %322 = arith.mulf %320, %321 : vector<2x6xf32>
    %323 = vector.extract_strided_slice %317 {offsets = [0, 1], sizes = [2, 1], strides = [1, 1]} : vector<2x6xf32> to vector<2x1xf32>
    %324 = vector.extract_strided_slice %137 {offsets = [1, 0], sizes = [1, 6], strides = [1, 1]} : vector<6x6xf32> to vector<1x6xf32>
    %325 = vector.broadcast %323 : vector<2x1xf32> to vector<2x6xf32>
    %326 = vector.broadcast %324 : vector<1x6xf32> to vector<2x6xf32>
    %327 = arith.mulf %325, %326 : vector<2x6xf32>
    %328 = arith.addf %322, %327 : vector<2x6xf32>
    %329 = vector.extract_strided_slice %317 {offsets = [0, 2], sizes = [2, 1], strides = [1, 1]} : vector<2x6xf32> to vector<2x1xf32>
    %330 = vector.extract_strided_slice %137 {offsets = [2, 0], sizes = [1, 6], strides = [1, 1]} : vector<6x6xf32> to vector<1x6xf32>
    %331 = vector.broadcast %329 : vector<2x1xf32> to vector<2x6xf32>
    %332 = vector.broadcast %330 : vector<1x6xf32> to vector<2x6xf32>
    %333 = arith.mulf %331, %332 : vector<2x6xf32>
    %334 = arith.addf %328, %333 : vector<2x6xf32>
    %335 = vector.extract_strided_slice %317 {offsets = [0, 3], sizes = [2, 1], strides = [1, 1]} : vector<2x6xf32> to vector<2x1xf32>
    %336 = vector.extract_strided_slice %137 {offsets = [3, 0], sizes = [1, 6], strides = [1, 1]} : vector<6x6xf32> to vector<1x6xf32>
    %337 = vector.broadcast %335 : vector<2x1xf32> to vector<2x6xf32>
    %338 = vector.broadcast %336 : vector<1x6xf32> to vector<2x6xf32>
    %339 = arith.mulf %337, %338 : vector<2x6xf32>
    %340 = arith.addf %334, %339 : vector<2x6xf32>
    %341 = vector.extract_strided_slice %317 {offsets = [0, 4], sizes = [2, 1], strides = [1, 1]} : vector<2x6xf32> to vector<2x1xf32>
    %342 = vector.extract_strided_slice %137 {offsets = [4, 0], sizes = [1, 6], strides = [1, 1]} : vector<6x6xf32> to vector<1x6xf32>
    %343 = vector.broadcast %341 : vector<2x1xf32> to vector<2x6xf32>
    %344 = vector.broadcast %342 : vector<1x6xf32> to vector<2x6xf32>
    %345 = arith.mulf %343, %344 : vector<2x6xf32>
    %346 = arith.addf %340, %345 : vector<2x6xf32>
    %347 = vector.extract_strided_slice %317 {offsets = [0, 5], sizes = [2, 1], strides = [1, 1]} : vector<2x6xf32> to vector<2x1xf32>
    %348 = vector.extract_strided_slice %137 {offsets = [5, 0], sizes = [1, 6], strides = [1, 1]} : vector<6x6xf32> to vector<1x6xf32>
    %349 = vector.broadcast %347 : vector<2x1xf32> to vector<2x6xf32>
    %350 = vector.broadcast %348 : vector<1x6xf32> to vector<2x6xf32>
    %351 = arith.mulf %349, %350 : vector<2x6xf32>
    %352 = arith.addf %346, %351 : vector<2x6xf32>
    %353 = vector.extract_strided_slice %131 {offsets = [0, 4, 0], sizes = [2, 1, 6], strides = [1, 1, 1]} : vector<2x8x6xf32> to vector<2x1x6xf32>
    %354 = vector.shape_cast %353 : vector<2x1x6xf32> to vector<2x6xf32>
    %355 = vector.broadcast %314 : vector<2x1xf32> to vector<2x6xf32>
    %356 = arith.addf %354, %355 : vector<2x6xf32>
    %357 = vector.broadcast %134 : vector<1x6xf32> to vector<2x6xf32>
    %358 = arith.addf %356, %357 : vector<2x6xf32>
    %359 = math.log %352 : vector<2x6xf32>
    %360 = arith.addf %358, %359 : vector<2x6xf32>
    %361 = vector.extract_strided_slice %132 {offsets = [0, 4, 0], sizes = [2, 1, 1], strides = [1, 1, 1]} : vector<2x8x1xf32> to vector<2x1x1xf32>
    %362 = vector.shape_cast %361 : vector<2x1x1xf32> to vector<2x1xf32>
    %363 = vector.broadcast %362 : vector<2x1xf32> to vector<2x6xf32>
    %364 = arith.mulf %360, %363 : vector<2x6xf32>
    %cst_68 = arith.constant 1.000000e+00 : f32
    %365 = vector.broadcast %cst_68 : f32 to vector<2x1xf32>
    %366 = arith.subf %365, %362 : vector<2x1xf32>
    %367 = vector.broadcast %366 : vector<2x1xf32> to vector<2x6xf32>
    %368 = arith.mulf %312, %367 : vector<2x6xf32>
    %369 = arith.addf %364, %368 : vector<2x6xf32>
    %cst_69 = arith.constant dense<0xFF800000> : vector<2xf32>
    %370 = vector.multi_reduction <maximumf>, %369, %cst_69 [1] : vector<2x6xf32> to vector<2xf32>
    %371 = vector.shape_cast %370 : vector<2xf32> to vector<2x1xf32>
    %372 = vector.broadcast %371 : vector<2x1xf32> to vector<2x6xf32>
    %373 = arith.subf %369, %372 : vector<2x6xf32>
    %374 = math.exp %373 : vector<2x6xf32>
    %375 = vector.extract_strided_slice %374 {offsets = [0, 0], sizes = [2, 1], strides = [1, 1]} : vector<2x6xf32> to vector<2x1xf32>
    %376 = vector.extract_strided_slice %137 {offsets = [0, 0], sizes = [1, 6], strides = [1, 1]} : vector<6x6xf32> to vector<1x6xf32>
    %377 = vector.broadcast %375 : vector<2x1xf32> to vector<2x6xf32>
    %378 = vector.broadcast %376 : vector<1x6xf32> to vector<2x6xf32>
    %379 = arith.mulf %377, %378 : vector<2x6xf32>
    %380 = vector.extract_strided_slice %374 {offsets = [0, 1], sizes = [2, 1], strides = [1, 1]} : vector<2x6xf32> to vector<2x1xf32>
    %381 = vector.extract_strided_slice %137 {offsets = [1, 0], sizes = [1, 6], strides = [1, 1]} : vector<6x6xf32> to vector<1x6xf32>
    %382 = vector.broadcast %380 : vector<2x1xf32> to vector<2x6xf32>
    %383 = vector.broadcast %381 : vector<1x6xf32> to vector<2x6xf32>
    %384 = arith.mulf %382, %383 : vector<2x6xf32>
    %385 = arith.addf %379, %384 : vector<2x6xf32>
    %386 = vector.extract_strided_slice %374 {offsets = [0, 2], sizes = [2, 1], strides = [1, 1]} : vector<2x6xf32> to vector<2x1xf32>
    %387 = vector.extract_strided_slice %137 {offsets = [2, 0], sizes = [1, 6], strides = [1, 1]} : vector<6x6xf32> to vector<1x6xf32>
    %388 = vector.broadcast %386 : vector<2x1xf32> to vector<2x6xf32>
    %389 = vector.broadcast %387 : vector<1x6xf32> to vector<2x6xf32>
    %390 = arith.mulf %388, %389 : vector<2x6xf32>
    %391 = arith.addf %385, %390 : vector<2x6xf32>
    %392 = vector.extract_strided_slice %374 {offsets = [0, 3], sizes = [2, 1], strides = [1, 1]} : vector<2x6xf32> to vector<2x1xf32>
    %393 = vector.extract_strided_slice %137 {offsets = [3, 0], sizes = [1, 6], strides = [1, 1]} : vector<6x6xf32> to vector<1x6xf32>
    %394 = vector.broadcast %392 : vector<2x1xf32> to vector<2x6xf32>
    %395 = vector.broadcast %393 : vector<1x6xf32> to vector<2x6xf32>
    %396 = arith.mulf %394, %395 : vector<2x6xf32>
    %397 = arith.addf %391, %396 : vector<2x6xf32>
    %398 = vector.extract_strided_slice %374 {offsets = [0, 4], sizes = [2, 1], strides = [1, 1]} : vector<2x6xf32> to vector<2x1xf32>
    %399 = vector.extract_strided_slice %137 {offsets = [4, 0], sizes = [1, 6], strides = [1, 1]} : vector<6x6xf32> to vector<1x6xf32>
    %400 = vector.broadcast %398 : vector<2x1xf32> to vector<2x6xf32>
    %401 = vector.broadcast %399 : vector<1x6xf32> to vector<2x6xf32>
    %402 = arith.mulf %400, %401 : vector<2x6xf32>
    %403 = arith.addf %397, %402 : vector<2x6xf32>
    %404 = vector.extract_strided_slice %374 {offsets = [0, 5], sizes = [2, 1], strides = [1, 1]} : vector<2x6xf32> to vector<2x1xf32>
    %405 = vector.extract_strided_slice %137 {offsets = [5, 0], sizes = [1, 6], strides = [1, 1]} : vector<6x6xf32> to vector<1x6xf32>
    %406 = vector.broadcast %404 : vector<2x1xf32> to vector<2x6xf32>
    %407 = vector.broadcast %405 : vector<1x6xf32> to vector<2x6xf32>
    %408 = arith.mulf %406, %407 : vector<2x6xf32>
    %409 = arith.addf %403, %408 : vector<2x6xf32>
    %410 = vector.extract_strided_slice %131 {offsets = [0, 5, 0], sizes = [2, 1, 6], strides = [1, 1, 1]} : vector<2x8x6xf32> to vector<2x1x6xf32>
    %411 = vector.shape_cast %410 : vector<2x1x6xf32> to vector<2x6xf32>
    %412 = vector.broadcast %371 : vector<2x1xf32> to vector<2x6xf32>
    %413 = arith.addf %411, %412 : vector<2x6xf32>
    %414 = vector.broadcast %134 : vector<1x6xf32> to vector<2x6xf32>
    %415 = arith.addf %413, %414 : vector<2x6xf32>
    %416 = math.log %409 : vector<2x6xf32>
    %417 = arith.addf %415, %416 : vector<2x6xf32>
    %418 = vector.extract_strided_slice %132 {offsets = [0, 5, 0], sizes = [2, 1, 1], strides = [1, 1, 1]} : vector<2x8x1xf32> to vector<2x1x1xf32>
    %419 = vector.shape_cast %418 : vector<2x1x1xf32> to vector<2x1xf32>
    %420 = vector.broadcast %419 : vector<2x1xf32> to vector<2x6xf32>
    %421 = arith.mulf %417, %420 : vector<2x6xf32>
    %cst_70 = arith.constant 1.000000e+00 : f32
    %422 = vector.broadcast %cst_70 : f32 to vector<2x1xf32>
    %423 = arith.subf %422, %419 : vector<2x1xf32>
    %424 = vector.broadcast %423 : vector<2x1xf32> to vector<2x6xf32>
    %425 = arith.mulf %369, %424 : vector<2x6xf32>
    %426 = arith.addf %421, %425 : vector<2x6xf32>
    %cst_71 = arith.constant dense<0xFF800000> : vector<2xf32>
    %427 = vector.multi_reduction <maximumf>, %426, %cst_71 [1] : vector<2x6xf32> to vector<2xf32>
    %428 = vector.shape_cast %427 : vector<2xf32> to vector<2x1xf32>
    %429 = vector.broadcast %428 : vector<2x1xf32> to vector<2x6xf32>
    %430 = arith.subf %426, %429 : vector<2x6xf32>
    %431 = math.exp %430 : vector<2x6xf32>
    %432 = vector.extract_strided_slice %431 {offsets = [0, 0], sizes = [2, 1], strides = [1, 1]} : vector<2x6xf32> to vector<2x1xf32>
    %433 = vector.extract_strided_slice %137 {offsets = [0, 0], sizes = [1, 6], strides = [1, 1]} : vector<6x6xf32> to vector<1x6xf32>
    %434 = vector.broadcast %432 : vector<2x1xf32> to vector<2x6xf32>
    %435 = vector.broadcast %433 : vector<1x6xf32> to vector<2x6xf32>
    %436 = arith.mulf %434, %435 : vector<2x6xf32>
    %437 = vector.extract_strided_slice %431 {offsets = [0, 1], sizes = [2, 1], strides = [1, 1]} : vector<2x6xf32> to vector<2x1xf32>
    %438 = vector.extract_strided_slice %137 {offsets = [1, 0], sizes = [1, 6], strides = [1, 1]} : vector<6x6xf32> to vector<1x6xf32>
    %439 = vector.broadcast %437 : vector<2x1xf32> to vector<2x6xf32>
    %440 = vector.broadcast %438 : vector<1x6xf32> to vector<2x6xf32>
    %441 = arith.mulf %439, %440 : vector<2x6xf32>
    %442 = arith.addf %436, %441 : vector<2x6xf32>
    %443 = vector.extract_strided_slice %431 {offsets = [0, 2], sizes = [2, 1], strides = [1, 1]} : vector<2x6xf32> to vector<2x1xf32>
    %444 = vector.extract_strided_slice %137 {offsets = [2, 0], sizes = [1, 6], strides = [1, 1]} : vector<6x6xf32> to vector<1x6xf32>
    %445 = vector.broadcast %443 : vector<2x1xf32> to vector<2x6xf32>
    %446 = vector.broadcast %444 : vector<1x6xf32> to vector<2x6xf32>
    %447 = arith.mulf %445, %446 : vector<2x6xf32>
    %448 = arith.addf %442, %447 : vector<2x6xf32>
    %449 = vector.extract_strided_slice %431 {offsets = [0, 3], sizes = [2, 1], strides = [1, 1]} : vector<2x6xf32> to vector<2x1xf32>
    %450 = vector.extract_strided_slice %137 {offsets = [3, 0], sizes = [1, 6], strides = [1, 1]} : vector<6x6xf32> to vector<1x6xf32>
    %451 = vector.broadcast %449 : vector<2x1xf32> to vector<2x6xf32>
    %452 = vector.broadcast %450 : vector<1x6xf32> to vector<2x6xf32>
    %453 = arith.mulf %451, %452 : vector<2x6xf32>
    %454 = arith.addf %448, %453 : vector<2x6xf32>
    %455 = vector.extract_strided_slice %431 {offsets = [0, 4], sizes = [2, 1], strides = [1, 1]} : vector<2x6xf32> to vector<2x1xf32>
    %456 = vector.extract_strided_slice %137 {offsets = [4, 0], sizes = [1, 6], strides = [1, 1]} : vector<6x6xf32> to vector<1x6xf32>
    %457 = vector.broadcast %455 : vector<2x1xf32> to vector<2x6xf32>
    %458 = vector.broadcast %456 : vector<1x6xf32> to vector<2x6xf32>
    %459 = arith.mulf %457, %458 : vector<2x6xf32>
    %460 = arith.addf %454, %459 : vector<2x6xf32>
    %461 = vector.extract_strided_slice %431 {offsets = [0, 5], sizes = [2, 1], strides = [1, 1]} : vector<2x6xf32> to vector<2x1xf32>
    %462 = vector.extract_strided_slice %137 {offsets = [5, 0], sizes = [1, 6], strides = [1, 1]} : vector<6x6xf32> to vector<1x6xf32>
    %463 = vector.broadcast %461 : vector<2x1xf32> to vector<2x6xf32>
    %464 = vector.broadcast %462 : vector<1x6xf32> to vector<2x6xf32>
    %465 = arith.mulf %463, %464 : vector<2x6xf32>
    %466 = arith.addf %460, %465 : vector<2x6xf32>
    %467 = vector.extract_strided_slice %131 {offsets = [0, 6, 0], sizes = [2, 1, 6], strides = [1, 1, 1]} : vector<2x8x6xf32> to vector<2x1x6xf32>
    %468 = vector.shape_cast %467 : vector<2x1x6xf32> to vector<2x6xf32>
    %469 = vector.broadcast %428 : vector<2x1xf32> to vector<2x6xf32>
    %470 = arith.addf %468, %469 : vector<2x6xf32>
    %471 = vector.broadcast %134 : vector<1x6xf32> to vector<2x6xf32>
    %472 = arith.addf %470, %471 : vector<2x6xf32>
    %473 = math.log %466 : vector<2x6xf32>
    %474 = arith.addf %472, %473 : vector<2x6xf32>
    %475 = vector.extract_strided_slice %132 {offsets = [0, 6, 0], sizes = [2, 1, 1], strides = [1, 1, 1]} : vector<2x8x1xf32> to vector<2x1x1xf32>
    %476 = vector.shape_cast %475 : vector<2x1x1xf32> to vector<2x1xf32>
    %477 = vector.broadcast %476 : vector<2x1xf32> to vector<2x6xf32>
    %478 = arith.mulf %474, %477 : vector<2x6xf32>
    %cst_72 = arith.constant 1.000000e+00 : f32
    %479 = vector.broadcast %cst_72 : f32 to vector<2x1xf32>
    %480 = arith.subf %479, %476 : vector<2x1xf32>
    %481 = vector.broadcast %480 : vector<2x1xf32> to vector<2x6xf32>
    %482 = arith.mulf %426, %481 : vector<2x6xf32>
    %483 = arith.addf %478, %482 : vector<2x6xf32>
    %cst_73 = arith.constant dense<0xFF800000> : vector<2xf32>
    %484 = vector.multi_reduction <maximumf>, %483, %cst_73 [1] : vector<2x6xf32> to vector<2xf32>
    %485 = vector.shape_cast %484 : vector<2xf32> to vector<2x1xf32>
    %486 = vector.broadcast %485 : vector<2x1xf32> to vector<2x6xf32>
    %487 = arith.subf %483, %486 : vector<2x6xf32>
    %488 = math.exp %487 : vector<2x6xf32>
    %489 = vector.extract_strided_slice %488 {offsets = [0, 0], sizes = [2, 1], strides = [1, 1]} : vector<2x6xf32> to vector<2x1xf32>
    %490 = vector.extract_strided_slice %137 {offsets = [0, 0], sizes = [1, 6], strides = [1, 1]} : vector<6x6xf32> to vector<1x6xf32>
    %491 = vector.broadcast %489 : vector<2x1xf32> to vector<2x6xf32>
    %492 = vector.broadcast %490 : vector<1x6xf32> to vector<2x6xf32>
    %493 = arith.mulf %491, %492 : vector<2x6xf32>
    %494 = vector.extract_strided_slice %488 {offsets = [0, 1], sizes = [2, 1], strides = [1, 1]} : vector<2x6xf32> to vector<2x1xf32>
    %495 = vector.extract_strided_slice %137 {offsets = [1, 0], sizes = [1, 6], strides = [1, 1]} : vector<6x6xf32> to vector<1x6xf32>
    %496 = vector.broadcast %494 : vector<2x1xf32> to vector<2x6xf32>
    %497 = vector.broadcast %495 : vector<1x6xf32> to vector<2x6xf32>
    %498 = arith.mulf %496, %497 : vector<2x6xf32>
    %499 = arith.addf %493, %498 : vector<2x6xf32>
    %500 = vector.extract_strided_slice %488 {offsets = [0, 2], sizes = [2, 1], strides = [1, 1]} : vector<2x6xf32> to vector<2x1xf32>
    %501 = vector.extract_strided_slice %137 {offsets = [2, 0], sizes = [1, 6], strides = [1, 1]} : vector<6x6xf32> to vector<1x6xf32>
    %502 = vector.broadcast %500 : vector<2x1xf32> to vector<2x6xf32>
    %503 = vector.broadcast %501 : vector<1x6xf32> to vector<2x6xf32>
    %504 = arith.mulf %502, %503 : vector<2x6xf32>
    %505 = arith.addf %499, %504 : vector<2x6xf32>
    %506 = vector.extract_strided_slice %488 {offsets = [0, 3], sizes = [2, 1], strides = [1, 1]} : vector<2x6xf32> to vector<2x1xf32>
    %507 = vector.extract_strided_slice %137 {offsets = [3, 0], sizes = [1, 6], strides = [1, 1]} : vector<6x6xf32> to vector<1x6xf32>
    %508 = vector.broadcast %506 : vector<2x1xf32> to vector<2x6xf32>
    %509 = vector.broadcast %507 : vector<1x6xf32> to vector<2x6xf32>
    %510 = arith.mulf %508, %509 : vector<2x6xf32>
    %511 = arith.addf %505, %510 : vector<2x6xf32>
    %512 = vector.extract_strided_slice %488 {offsets = [0, 4], sizes = [2, 1], strides = [1, 1]} : vector<2x6xf32> to vector<2x1xf32>
    %513 = vector.extract_strided_slice %137 {offsets = [4, 0], sizes = [1, 6], strides = [1, 1]} : vector<6x6xf32> to vector<1x6xf32>
    %514 = vector.broadcast %512 : vector<2x1xf32> to vector<2x6xf32>
    %515 = vector.broadcast %513 : vector<1x6xf32> to vector<2x6xf32>
    %516 = arith.mulf %514, %515 : vector<2x6xf32>
    %517 = arith.addf %511, %516 : vector<2x6xf32>
    %518 = vector.extract_strided_slice %488 {offsets = [0, 5], sizes = [2, 1], strides = [1, 1]} : vector<2x6xf32> to vector<2x1xf32>
    %519 = vector.extract_strided_slice %137 {offsets = [5, 0], sizes = [1, 6], strides = [1, 1]} : vector<6x6xf32> to vector<1x6xf32>
    %520 = vector.broadcast %518 : vector<2x1xf32> to vector<2x6xf32>
    %521 = vector.broadcast %519 : vector<1x6xf32> to vector<2x6xf32>
    %522 = arith.mulf %520, %521 : vector<2x6xf32>
    %523 = arith.addf %517, %522 : vector<2x6xf32>
    %524 = vector.extract_strided_slice %131 {offsets = [0, 7, 0], sizes = [2, 1, 6], strides = [1, 1, 1]} : vector<2x8x6xf32> to vector<2x1x6xf32>
    %525 = vector.shape_cast %524 : vector<2x1x6xf32> to vector<2x6xf32>
    %526 = vector.broadcast %485 : vector<2x1xf32> to vector<2x6xf32>
    %527 = arith.addf %525, %526 : vector<2x6xf32>
    %528 = vector.broadcast %134 : vector<1x6xf32> to vector<2x6xf32>
    %529 = arith.addf %527, %528 : vector<2x6xf32>
    %530 = math.log %523 : vector<2x6xf32>
    %531 = arith.addf %529, %530 : vector<2x6xf32>
    %532 = vector.extract_strided_slice %132 {offsets = [0, 7, 0], sizes = [2, 1, 1], strides = [1, 1, 1]} : vector<2x8x1xf32> to vector<2x1x1xf32>
    %533 = vector.shape_cast %532 : vector<2x1x1xf32> to vector<2x1xf32>
    %534 = vector.broadcast %533 : vector<2x1xf32> to vector<2x6xf32>
    %535 = arith.mulf %531, %534 : vector<2x6xf32>
    %cst_74 = arith.constant 1.000000e+00 : f32
    %536 = vector.broadcast %cst_74 : f32 to vector<2x1xf32>
    %537 = arith.subf %536, %533 : vector<2x1xf32>
    %538 = vector.broadcast %537 : vector<2x1xf32> to vector<2x6xf32>
    %539 = arith.mulf %483, %538 : vector<2x6xf32>
    %540 = arith.addf %535, %539 : vector<2x6xf32>
    %541 = vector.broadcast %25 : vector<1x6xf32> to vector<2x6xf32>
    %542 = arith.addf %540, %541 : vector<2x6xf32>
    %cst_75 = arith.constant dense<0xFF800000> : vector<2xf32>
    %543 = vector.multi_reduction <maximumf>, %542, %cst_75 [1] : vector<2x6xf32> to vector<2xf32>
    %544 = vector.shape_cast %543 : vector<2xf32> to vector<2x1xf32>
    %545 = vector.broadcast %544 : vector<2x1xf32> to vector<2x6xf32>
    %546 = arith.subf %542, %545 : vector<2x6xf32>
    %547 = math.exp %546 : vector<2x6xf32>
    %cst_76 = arith.constant dense<0.000000e+00> : vector<2xf32>
    %548 = vector.multi_reduction <add>, %547, %cst_76 [1] : vector<2x6xf32> to vector<2xf32>
    %549 = vector.shape_cast %548 : vector<2xf32> to vector<2x1xf32>
    %550 = math.log %549 : vector<2x1xf32>
    %551 = arith.addf %544, %550 : vector<2x1xf32>
    %552 = arith.mulf %130, %3 : vector<16x6xf32>
    %cst_77 = arith.constant dense<0.000000e+00> : vector<16xf32>
    %553 = vector.multi_reduction <add>, %552, %cst_77 [1] : vector<16x6xf32> to vector<16xf32>
    %554 = vector.shape_cast %553 : vector<16xf32> to vector<16x1xf32>
    %555 = vector.broadcast %24 : vector<1x6xf32> to vector<16x6xf32>
    %556 = arith.mulf %555, %3 : vector<16x6xf32>
    %557 = vector.broadcast %8 : vector<16x1xf32> to vector<16x6xf32>
    %558 = arith.mulf %556, %557 : vector<16x6xf32>
    %559 = vector.shape_cast %558 : vector<16x6xf32> to vector<1x16x6xf32>
    %cst_78 = arith.constant dense<0.000000e+00> : vector<1xf32>
    %560 = vector.multi_reduction <add>, %559, %cst_78 [1, 2] : vector<1x16x6xf32> to vector<1xf32>
    %561 = vector.shape_cast %560 : vector<1xf32> to vector<1x1x1xf32>
    %562 = vector.extract %561[0, 0, 0] : f32 from vector<1x1x1xf32>
    %563 = vector.broadcast %562 : f32 to vector<1x1xf32>
    %564 = arith.mulf %554, %5 : vector<16x1xf32>
    %565 = arith.mulf %564, %7 : vector<16x1xf32>
    %566 = vector.shape_cast %565 : vector<16x1xf32> to vector<1x16x1xf32>
    %cst_79 = arith.constant dense<0.000000e+00> : vector<1xf32>
    %567 = vector.multi_reduction <add>, %566, %cst_79 [1, 2] : vector<1x16x1xf32> to vector<1xf32>
    %568 = vector.shape_cast %567 : vector<1xf32> to vector<1x1x1xf32>
    %569 = vector.extract %568[0, 0, 0] : f32 from vector<1x1x1xf32>
    %570 = vector.broadcast %569 : f32 to vector<1x1xf32>
    %cst_80 = arith.constant dense<0.000000e+00> : vector<16x6xf32>
    %571 = tpu.matmul %3, %27, %cst_80 {dimension_numbers = #tpu.dot_dimension_numbers<[1], [0], [0], [1], [0, 0, 1, 1], [], []>} : vector<16x6xf32>, vector<6x6xf32>, vector<16x6xf32> -> vector<16x6xf32>
    %572 = arith.mulf %571, %4 : vector<16x6xf32>
    %cst_81 = arith.constant dense<0.000000e+00> : vector<16xf32>
    %573 = vector.multi_reduction <add>, %572, %cst_81 [1] : vector<16x6xf32> to vector<16xf32>
    %574 = vector.shape_cast %573 : vector<16xf32> to vector<16x1xf32>
    %575 = arith.mulf %574, %6 : vector<16x1xf32>
    %576 = arith.mulf %575, %7 : vector<16x1xf32>
    %577 = vector.shape_cast %576 : vector<16x1xf32> to vector<1x16x1xf32>
    %cst_82 = arith.constant dense<0.000000e+00> : vector<1xf32>
    %578 = vector.multi_reduction <add>, %577, %cst_82 [1, 2] : vector<1x16x1xf32> to vector<1xf32>
    %579 = vector.shape_cast %578 : vector<1xf32> to vector<1x1x1xf32>
    %580 = vector.extract %579[0, 0, 0] : f32 from vector<1x1x1xf32>
    %581 = vector.broadcast %580 : f32 to vector<1x1xf32>
    %582 = vector.broadcast %25 : vector<1x6xf32> to vector<16x6xf32>
    %583 = arith.mulf %582, %3 : vector<16x6xf32>
    %584 = vector.broadcast %9 : vector<16x1xf32> to vector<16x6xf32>
    %585 = arith.mulf %583, %584 : vector<16x6xf32>
    %586 = vector.shape_cast %585 : vector<16x6xf32> to vector<1x16x6xf32>
    %cst_83 = arith.constant dense<0.000000e+00> : vector<1xf32>
    %587 = vector.multi_reduction <add>, %586, %cst_83 [1, 2] : vector<1x16x6xf32> to vector<1xf32>
    %588 = vector.shape_cast %587 : vector<1xf32> to vector<1x1x1xf32>
    %589 = vector.extract %588[0, 0, 0] : f32 from vector<1x1x1xf32>
    %590 = vector.broadcast %589 : f32 to vector<1x1xf32>
    %591 = arith.mulf %554, %5 : vector<16x1xf32>
    %592 = arith.mulf %591, %10 : vector<16x1xf32>
    %593 = vector.shape_cast %592 : vector<16x1xf32> to vector<1x16x1xf32>
    %cst_84 = arith.constant dense<0.000000e+00> : vector<1xf32>
    %594 = vector.multi_reduction <add>, %593, %cst_84 [1, 2] : vector<1x16x1xf32> to vector<1xf32>
    %595 = vector.shape_cast %594 : vector<1xf32> to vector<1x1x1xf32>
    %596 = vector.extract %595[0, 0, 0] : f32 from vector<1x1x1xf32>
    %597 = vector.broadcast %596 : f32 to vector<1x1xf32>
    %598 = arith.addf %563, %570 : vector<1x1xf32>
    %599 = arith.addf %598, %581 : vector<1x1xf32>
    %600 = arith.addf %599, %590 : vector<1x1xf32>
    %601 = arith.addf %600, %597 : vector<1x1xf32>
    %602 = vector.shape_cast %551 : vector<2x1xf32> to vector<1x2x1xf32>
    %cst_85 = arith.constant dense<0.000000e+00> : vector<1xf32>
    %603 = vector.multi_reduction <add>, %602, %cst_85 [1, 2] : vector<1x2x1xf32> to vector<1xf32>
    %604 = vector.shape_cast %603 : vector<1xf32> to vector<1x1x1xf32>
    %605 = vector.extract %604[0, 0, 0] : f32 from vector<1x1x1xf32>
    %606 = vector.broadcast %605 : f32 to vector<1x1xf32>
    %607 = arith.subf %601, %606 : vector<1x1xf32>
    %c0_86 = arith.constant 0 : index
    %c0_87 = arith.constant 0 : index
    %608 = vector.load %arg3[%c0_86, %c0_87] : memref<16x128xf32, #tpu.memory_space<vmem>>, vector<16x32xf32>
    tpu.vector_store %arg3[%c0_86, %c0_87], %127 {strides = array<i32>} : memref<16x128xf32, #tpu.memory_space<vmem>>, vector<16x32xf32>,
    %c0_88 = arith.constant 0 : index
    %c32_89 = arith.constant 32 : index
    %609 = vector.load %arg3[%c0_88, %c32_89] : memref<16x128xf32, #tpu.memory_space<vmem>>, vector<16x6xf32>
    tpu.vector_store %arg3[%c0_88, %c32_89], %130 {strides = array<i32>} : memref<16x128xf32, #tpu.memory_space<vmem>>, vector<16x6xf32>,
    %c0_90 = arith.constant 0 : index
    %c38_91 = arith.constant 38 : index
    %610 = vector.load %arg3[%c0_90, %c38_91] : memref<16x128xf32, #tpu.memory_space<vmem>>, vector<16x1xf32>
    tpu.vector_store %arg3[%c0_90, %c38_91], %5 {strides = array<i32>} : memref<16x128xf32, #tpu.memory_space<vmem>>, vector<16x1xf32>,
    %611 = vector.shape_cast %607 : vector<1x1xf32> to vector<1x1xf32>
    %612 = vector.broadcast %611 : vector<1x1xf32> to vector<16x1xf32>
    %c0_92 = arith.constant 0 : index
    %c39 = arith.constant 39 : index
    %613 = vector.load %arg3[%c0_92, %c39] : memref<16x128xf32, #tpu.memory_space<vmem>>, vector<16x1xf32>
    tpu.vector_store %arg3[%c0_92, %c39], %612 {strides = array<i32>} : memref<16x128xf32, #tpu.memory_space<vmem>>, vector<16x1xf32>,
    %cst_93 = arith.constant 0.000000e+00 : f32
    %614 = vector.broadcast %cst_93 : f32 to vector<16x88xf32>
    %c0_94 = arith.constant 0 : index
    %c40 = arith.constant 40 : index
    %615 = vector.load %arg3[%c0_94, %c40] : memref<16x128xf32, #tpu.memory_space<vmem>>, vector<16x88xf32>
    tpu.vector_store %arg3[%c0_94, %c40], %614 {strides = array<i32>} : memref<16x128xf32, #tpu.memory_space<vmem>>, vector<16x88xf32>,
    return
  }
}

</mosaic_0001>

<bundles_post_ra>
// kernel: mul.8
= control target key start
LH: loop header
LB: loop body
LE: loop exit
PB: predicated region body
PF: predicated region fallthrough
CT: control target
= control target key end

     0   :  { %vm7_vm0 = vcmask 130048   ;;  %vm13_vm1 = vcmask 261248   ;;  %s39_s0 = inlined_call_operand.vmem [shape: f32[2,16], index: 0, kind: input, shape index: {}]   ;;  %s40_s1 = inlined_call_operand.vmem [shape: f32[32], index: 1, kind: output, shape index: {}]  }
   0x1   :  { %v4_v0 = vld [vmem:[%s39_s0] sm:$0x3]  ;;  %s22_s0 = smov 16  }
   0x2   :  { %5 = vst [vmem:[#allocation1] sm:$0x3] %v4_v0 }
   0x9   :  { %v10_v1 = vld [vmem:[#allocation1 + $0x1] sm:$0x1]   ;;  %v6_v2 = vld [vmem:[#allocation1] sm:$0x1]  }
   0xa   :  { %11 = vrot.lane.b32.xlu0 %v10_v1, %s22_s0  ;;  %8 = vst.msk [vmem:[#allocation0] sm:$0x1] %vm7_vm0, %v6_v2  }
  0x7c   :  { %v12_v3 = vpop.permute.xlu0 %11  }
  0x7d   :  { %14 = vst.msk [vmem:[#allocation0] sm:$0x1] %vm13_vm1, %v12_v3  }
  0x84   :  { %v18_v4 = vld [vmem:[#allocation0] sm:$0x1] }
  0x85   :  { %20 = vst [vmem:[%s40_s1] sm:$0x1] %v18_v4 }

// kernel: bert_crf_forward.1
= control target key start
LH: loop header
LB: loop body
LE: loop exit
PB: predicated region body
PF: predicated region fallthrough
CT: control target
= control target key end

     0   :  { %vm83_vm0 = vcmask 261120   ;;  %s2791_s24 = smov 96   ;;  %s2792_s27 = smov 64   ;;  %vm1057_vm6 = vcmask 1041409   ;;  %vm1061_vm7 = vcmask 41984   ;;  %vm1039_vm8 = vcmask 111680   ;;  %s3560_s1 = inlined_call_operand.vmem [shape: bf16[224,128], index: 1, kind: input, shape index: {}]   ;;  %s3561_s0 = inlined_call_operand.vmem [shape: f32[48,64], index: 0, kind: input, shape index: {}]   ;;  %s3562_s2 = inlined_call_operand.vmem [shape: f32[48,128], index: 2, kind: input, shape index: {}]   ;;  %s3563_s3 = inlined_call_operand.vmem [shape: f32[16,128], index: 3, kind: output, shape index: {}]  }
   0x1   :  { %v2671_v0 = vld [vmem:[%s3560_s1] sm:$0xff]   ;;  %v2672_v1 = vld [vmem:[%s3560_s1 + $0x8] sm:$0xff]   ;;  %v2853_v5 = vld [vmem:[%s3561_s0 + $0x10] sm:$0xff]  ;;  %s2800_s8 = smov 120   ;;  %vm1185_vm9 = vcmask 1042434   ;;  %vm1188_vm10 = vcmask 43009  }
   0x2   :  { %2401 = vmatprep.subr.bf16.mxu1 %v2671_v0  ;;  %v2841_v2 = vld [vmem:[%s3561_s0] sm:$0xff]  ;;  %v2846_v3 = vld [vmem:[%s3561_s0 + $0x8] sm:$0xff]  ;;  %v2858_v6 = vld [vmem:[%s3561_s0 + $0x18] sm:$0xff]  ;;  %vm1334_vm11 = vcmask 1043459   ;;  %vm1337_vm12 = vcmask 44034   ;;  %vm1456_vm13 = vcmask 1044484  }
   0x3   :  { %2402 = vmatpush3.bf16.msra.mxu1 %v2671_v0  ;;  %v65_v4 = vpack.c.bf16 %v2846_v3, %v2841_v2  ;;  %v66_v7 = vpack.c.bf16 %v2858_v6, %v2853_v5  ;;  %260 = vrot.lane.b32.xlu1 %v2841_v2, %s2791_s24  ;;  %v2298_v8 = vld [vmem:[%s3562_s2] ss:$0 sm:$0xff]  ;;  %vm2501_vm1 = vmpackc.low %vm83_vm0, %vm83_vm0  ;;  %vm1459_vm14 = vcmask 45059   ;;  %vm1578_vm15 = vcmask 1045509   ;;  %s2804_s14 = smov 127   ;;  %s2805_s17 = smov 123  }
   0x4   :  { %2403 = vmatprep.subr.bf16.mxu1 %v2672_v1  ;;  %s2807_s18 = smov 84   ;;  %s2808_s19 = smov 83  }
   0x5   :  { %2405 = vmatprep.mubr.msk.bf16.mxu1 %vm83_vm0, %v65_v4  ;;  %s2810_s22 = smov 122  }
   0x7   :  { %2404 = vmatpush3.bf16.msra.mxu1 %v2672_v1  ;;  %262 = vrot.lane.b32.xlu1 %v2846_v3, %s2791_s24 }
   0xa   :  { %2406 = vmatmul.mubr.msk.bf16.vlgmr.msra.gmra.mrb[0].mxu1 %vm83_vm0, %v66_v7 }
   0xb   :  { %266 = vrot.lane.b32.xlu1 %v2858_v6, %s2791_s24 }
  0x75   :  { %v261_v27 = vpop.permute.xlu1 %260 }
  0x79   :  { %v263_v29 = vpop.permute.xlu1 %262 }
  0x7d   :  { %v267_v42 = vpop.permute.xlu1 %266 }
  0xdd   :  { %v2407_v9 = vpop.f32.mrb[0].mxu1 }
  0xde   :  { %v124_v10 = vpop.f32.mrb[1].mxu1  ;;  %v133_v17 = vadd.f32 %v2407_v9, %v2298_v8 }
  0xdf   :  { %v125_v11 = vadd.f32 %v2298_v8, %v124_v10  ;;  %v2408_v12 = vpop.f32.mrb[2].mxu1 }
  0xe0   :  { %v127_v13 = vpop.f32.mrb[3].mxu1  ;;  %v136_v15 = vadd.f32 %v2408_v12, %v2298_v8 }
  0xe1   :  { %v128_v14 = vadd.f32 %v2298_v8, %v127_v13  ;;  %2417 = vmatprep.mubr.msk.f32.mxu1 %vm83_vm0, %v125_v11 }
  0xe2   :  { %v2878_v18 = vpack.i.bf16 %v136_v15, %v133_v17 }
  0xe3   :  { %v2874_v16 = vpack.i.bf16 %v128_v14, %v125_v11 }
  0xe5   :  { %2570 = vrot.lane.b32.xlu0 %v2874_v16, %s2791_s24 }
  0xe9   :  { %2575 = vrot.lane.b32.xlu0 %v2878_v18, %s2791_s24 }
  0xed   :  { %264 = vrot.lane.b32.xlu0 %v2853_v5, %s2791_s24 }
 0x157   :  { %v2571_v19 = vpop.permute.xlu0 %2570 }
 0x158   :  { %v2573_v20 = vunpack.i.h.bf16 %v2571_v19  ;;  %v2572_v21 = vunpack.i.l.bf16 %v2571_v19 }
 0x15a   :  { %v2500_v22 = vpack.c.bf16 %v2573_v20, %v2572_v21 }
 0x15b   :  { %v2576_v23 = vpop.permute.xlu0 %2575 }
 0x15c   :  { %v2578_v24 = vunpack.i.h.bf16 %v2576_v23  ;;  %v2577_v25 = vunpack.i.l.bf16 %v2576_v23  ;;  %2502 = vmatprep.subr.msk.bf16.mxu1 %vm2501_vm1, %v2500_v22 }
 0x15d   :  { %2505 = vmatpush3.bf16.xpose.msk.msra.mxu1 %vm2501_vm1, %v2500_v22 }
 0x15e   :  { %v2506_v26 = vpack.c.bf16 %v2578_v24, %v2577_v25 }
 0x15f   :  { %v265_v38 = vpop.permute.xlu0 %264 }
 0x160   :  { %2508 = vmatprep.subr.msk.bf16.mxu1 %vm2501_vm1, %v2506_v26 }
 0x165   :  { %2511 = vmatpush3.bf16.xpose.msk.msra.mxu1 %vm2501_vm1, %v2506_v26  ;;  %vm1700_vm1 = vcmask 1046534  }
 0x16c   :  { %2418 = vmatmul.mubr.msk.f32.vlgmr.msra.gmra.mrb[4].mxu1 %vm83_vm0, %v128_v14 }
 0x16d   :  { %2420 = vmatprep.mubr.msk.f32.mxu1 %vm83_vm0, %v133_v17 }
 0x170   :  { %2421 = vmatmul.mubr.msk.f32.gmra.mrb[6].mxu1 %vm83_vm0, %v136_v15 }
 0x23f   :  { %v2419_v28 = vpop.f32.mrb[4].mxu1 }
 0x240   :  { %v253_v30 = vmul.f32 0.17677669, %v2419_v28  ;;  %v233_v31 = vpop.f32.mrb[5].mxu1  ;;  %v2674_v28 = vld [vmem:[%s3560_s1 + $0x18] sm:$0xff]  }
 0x241   :  { %v252_v32 = vmul.f32 0.17677669, %v233_v31 }
 0x242   :  { %v273_v33 = vadd.f32 %v263_v29, %v253_v30 }
 0x243   :  { %v2422_v34 = vpop.f32.mrb[6].mxu1  ;;  %v272_v35 = vadd.f32 %v261_v27, %v252_v32  ;;  %v2673_v27 = vld [vmem:[%s3560_s1 + $0x10] sm:$0xff]  }
 0x244   :  { %v243_v36 = vpop.f32.mrb[7].mxu1  ;;  %v279_v37 = vsel %vm83_vm0, %v273_v33, -inf  ;;  %v255_v39 = vmul.f32 0.17677669, %v2422_v34 }
 0x245   :  { %v254_v40 = vmul.f32 0.17677669, %v243_v36  ;;  %280 = vmax.xlane.f32.xlu1 %v279_v37  ;;  %v276_v41 = vsel %vm83_vm0, %v272_v35, -inf }
 0x246   :  { %277 = vmax.xlane.f32.xlu0 %v276_v41  ;;  %v275_v44 = vadd.f32 %v267_v42, %v255_v39 }
 0x247   :  { %v274_v43 = vadd.f32 %v265_v38, %v254_v40 }
 0x248   :  { %v285_v46 = vsel %vm83_vm0, %v275_v44, -inf }
 0x249   :  { %v282_v45 = vsel %vm83_vm0, %v274_v43, -inf }
 0x24a   :  { %283 = vmax.xlane.f32.xlu0 %v282_v45 }
 0x24e   :  { %286 = vmax.xlane.f32.xlu0 %v285_v46 }
 0x2d2   :  { %v281_v47 = vpop.xlane.xlu1 %280 }
 0x2d3   :  { %v289_v48 = vsub.f32 %v273_v33, %v281_v47  ;;  %v278_v49 = vpop.xlane.xlu0 %277 }
 0x2d4   :  { %v288_v50 = vsub.f32 %v272_v35, %v278_v49  ;;  %v2315_v35 = vld [vmem:[%s3562_s2 + $0x1] ss:$0 sm:$0xff] }
 0x2d5   :  { %v294_v51 = vmul.f32 1.442695, %v289_v48 }
 0x2d6   :  { %v292_v52 = vmul.f32 1.442695, %v288_v50 }
 0x2d7   :  { %2685 = vpow2.f32 %v294_v51  ;;  %v284_v53 = vpop.xlane.xlu0 %283 }
 0x2d8   :  { %2687 = vpow2.f32 %v292_v52  ;;  %v290_v54 = vsub.f32 %v274_v43, %v284_v53 }
 0x2da   :  { %v296_v55 = vmul.f32 1.442695, %v290_v54 }
 0x2db   :  { %v287_v56 = vpop.xlane.xlu0 %286 }
 0x2dc   :  { %2689 = vpow2.f32 %v296_v55  ;;  %v291_v57 = vsub.f32 %v275_v44, %v287_v56 }
 0x2de   :  { %v298_v58 = vmul.f32 1.442695, %v291_v57 }
 0x2e0   :  { %2691 = vpow2.f32 %v298_v58 }
 0x2e1   :  { %v2686_v59 = vpop.eup %2685 }
 0x2e2   :  { %v2688_v60 = vpop.eup %2687  ;;  %v303_v61 = vsel %vm83_vm0, %v2686_v59, 0.0 }
 0x2e3   :  { %304 = vadd.xlane.f32.xlu0 %v303_v61  ;;  %v300_v62 = vsel %vm83_vm0, %v2688_v60, 0.0 }
 0x2e4   :  { %301 = vadd.xlane.f32.xlu1 %v300_v62 }
 0x2e6   :  { %v2690_v63 = vpop.eup %2689 }
 0x2e7   :  { %v306_v0 = vsel %vm83_vm0, %v2690_v63, 0.0 }
 0x2e8   :  { %307 = vadd.xlane.f32.xlu1 %v306_v0 }
 0x2ea   :  { %v2692_v1 = vpop.eup %2691 }
 0x2eb   :  { %v309_v4 = vsel %vm83_vm0, %v2692_v1, 0.0 }
 0x2ec   :  { %310 = vadd.xlane.f32.xlu0 %v309_v4 }
 0x2f9   :  { %2580 = vrot.lane.b32.xlu1 %v2874_v16, %s2792_s27 }
 0x302   :  { %2585 = vrot.lane.b32.xlu0 %v2878_v18, %s2792_s27 }
 0x370   :  { %v305_v8 = vpop.xlane.xlu0 %304 }
 0x371   :  { %v302_v7 = vpop.xlane.xlu1 %301 }
 0x372   :  { %2693 = vrcp.f32 %v302_v7 }
 0x373   :  { %2695 = vrcp.f32 %v305_v8  ;;  %v2675_v8 = vld [vmem:[%s3560_s1 + $0x20] sm:$0xff]  }
 0x374   :  { %2445 = vmatprep.subr.bf16.mxu1 %v2675_v8 }
 0x375   :  { %v308_v9 = vpop.xlane.xlu1 %307  ;;  %2446 = vmatpush3.bf16.msra.mxu1 %v2675_v8 }
 0x376   :  { %2697 = vrcp.f32 %v308_v9  ;;  %v2676_v9 = vld [vmem:[%s3560_s1 + $0x28] sm:$0xff]  }
 0x377   :  { %2447 = vmatprep.subr.bf16.mxu1 %v2676_v9 }
 0x379   :  { %v2581_v10 = vpop.permute.xlu1 %2580  ;;  %v311_v11 = vpop.xlane.xlu0 %310  ;;  %2448 = vmatpush3.bf16.msra.mxu1 %v2676_v9 }
 0x37a   :  { %v2583_v12 = vunpack.i.h.bf16 %v2581_v10  ;;  %v2582_v13 = vunpack.i.l.bf16 %v2581_v10  ;;  %2699 = vrcp.f32 %v311_v11 }
 0x37c   :  { %v2694_v14 = vpop.eup %2693  ;;  %v2512_v15 = vpack.c.bf16 %v2583_v12, %v2582_v13 }
 0x37d   :  { %v2586_v17 = vpop.permute.xlu0 %2585  ;;  %v316_v19 = vmul.f32 %v2694_v14, %v2688_v60  ;;  %v2696_v18 = vpop.eup %2695 }
 0x37e   :  { %v2588_v20 = vunpack.i.h.bf16 %v2586_v17  ;;  %v2587_v21 = vunpack.i.l.bf16 %v2586_v17  ;;  %2513 = vmatprep.subr.bf16.mxu0 %v2512_v15  ;;  %v317_v23 = vmul.f32 %v2696_v18, %v2686_v59 }
 0x37f   :  { %2515 = vmatpush3.bf16.msra.mxu0 %v2512_v15  ;;  %2431 = vmatprep.mubr.msk.f32.mxu0 %vm83_vm0, %v316_v19 }
 0x380   :  { %v2516_v16 = vpack.c.bf16 %v2588_v20, %v2587_v21  ;;  %v2698_v22 = vpop.eup %2697 }
 0x381   :  { %v318_v25 = vmul.f32 %v2698_v22, %v2690_v63 }
 0x382   :  { %2517 = vmatprep.subr.bf16.mxu0 %v2516_v16 }
 0x383   :  { %2519 = vmatpush3.bf16.msra.mxu0 %v2516_v16 }
 0x384   :  { %v2700_v24 = vpop.eup %2699  ;;  %2437 = vmatprep.subr.bf16.mxu0 %v2673_v27 }
 0x385   :  { %v319_v26 = vmul.f32 %v2700_v24, %v2692_v1 }
 0x386   :  { %2432 = vmatmul.mubr.msk.f32.vlgmr.msra.gmra.mrb[0].mxu0 %vm83_vm0, %v317_v23  ;;  %v2320_v23 = vld [vmem:[%s3562_s2 + $0x2] ss:$0 sm:$0xff] }
 0x387   :  { %2434 = vmatprep.mubr.msk.f32.mxu0 %vm83_vm0, %v318_v25  ;;  %2438 = vmatpush3.bf16.msra.mxu0 %v2673_v27 }
 0x388   :  { %2439 = vmatprep.subr.bf16.mxu0 %v2674_v28 }
 0x38a   :  { %2435 = vmatmul.mubr.msk.f32.gmra.mrb[2].mxu0 %vm83_vm0, %v319_v26 }
 0x38b   :  { %2440 = vmatpush3.bf16.msra.mxu0 %v2674_v28 }
 0x459   :  { %v2433_v29 = vpop.f32.mrb[0].mxu0 }
 0x45a   :  { %v410_v30 = vpop.f32.mrb[1].mxu0 }
 0x45b   :  { %v429_v31 = vpack.c.bf16 %v2433_v29, %v410_v30  ;;  %v2321_v29 = vld [vmem:[%s3562_s2 + $0x3] ss:$0 sm:$0xff] }
 0x45d   :  { %v2436_v32 = vpop.f32.mrb[2].mxu0  ;;  %2441 = vmatprep.mubr.msk.bf16.mxu0 %vm83_vm0, %v429_v31 }
 0x45e   :  { %v420_v33 = vpop.f32.mrb[3].mxu0 }
 0x45f   :  { %v430_v34 = vpack.c.bf16 %v2436_v32, %v420_v33 }
 0x461   :  { %2442 = vmatmul.mubr.msk.bf16.vlgmr.msra.gmra.mrb[4].mxu0 %vm83_vm0, %v430_v34 }
 0x534   :  { %v2443_v36 = vpop.f32.mrb[4].mxu0 }
 0x535   :  { %v487_v37 = vpop.f32.mrb[5].mxu0  ;;  %v496_v38 = vadd.f32 %v2443_v36, %v2315_v35 }
 0x536   :  { %v488_v39 = vadd.f32 %v2315_v35, %v487_v37  ;;  %v2444_v40 = vpop.f32.mrb[6].mxu0 }
 0x537   :  { %v490_v41 = vpop.f32.mrb[7].mxu0  ;;  %v499_v42 = vadd.f32 %v2444_v40, %v2315_v35  ;;  %v504_v47 = vadd.f32 %v496_v38, %v2853_v5 }
 0x538   :  { %v491_v43 = vadd.f32 %v2315_v35, %v490_v41  ;;  %v502_v44 = vadd.f32 %v488_v39, %v2841_v2  ;;  %v2952_v41 = vld [vmem:[%s3561_s0 + $0x20] sm:$0xff] }
 0x539   :  { %v505_v49 = vadd.f32 %v499_v42, %v2858_v6  ;;  %v512_v50 = vsel %vm83_vm0, %v504_v47, 0.0  ;;  %vm940_vm3 = vcmp.gt.f32.partialorder %v2952_v41, 0.0 }
 0x53a   :  { %v506_v45 = vsel %vm83_vm0, %v502_v44, 0.0  ;;  %v503_v46 = vadd.f32 %v491_v43, %v2846_v3  ;;  %v2677_v43 = vld [vmem:[%s3560_s1 + $0x30] sm:$0xff]  }
 0x53b   :  { %507 = vadd.xlane.f32.xlu1 %v506_v45  ;;  %v515_v51 = vsel %vm83_vm0, %v505_v49, 0.0  ;;  %2453 = vmatprep.subr.bf16.mxu0 %v2677_v43  ;;  %v2679_v45 = vld [vmem:[%s3560_s1 + $0x40] sm:$0xff]  }
 0x53c   :  { %v509_v48 = vsel %vm83_vm0, %v503_v46, 0.0  ;;  %2454 = vmatpush3.bf16.msra.mxu0 %v2677_v43 }
 0x53d   :  { %510 = vadd.xlane.f32.xlu0 %v509_v48  ;;  %v2682_v48 = vld [vmem:[%s3560_s1 + $0x58] sm:$0xff]  }
 0x53f   :  { %513 = vadd.xlane.f32.xlu1 %v512_v50  ;;  %v2684_v50 = vld [vmem:[%s3560_s1 + $0x68] sm:$0xff]  }
 0x541   :  { %516 = vadd.xlane.f32.xlu0 %v515_v51  ;;  %v2322_v51 = vld [vmem:[%s3562_s2 + $0x4] ss:$0 sm:$0xff] }
 0x5c8   :  { %v508_v52 = vpop.xlane.xlu1 %507 }
 0x5c9   :  { %v519_v2 = vmul.f32 0.03125, %v508_v52 }
 0x5ca   :  { %v511_v53 = vpop.xlane.xlu0 %510 }
 0x5cb   :  { %v523_v54 = vsub.f32 %v502_v44, %v519_v2  ;;  %v520_v55 = vmul.f32 0.03125, %v511_v53  ;;  %v2678_v44 = vld [vmem:[%s3560_s1 + $0x38] sm:$0xff]  }
 0x5cc   :  { %v514_v3 = vpop.xlane.xlu1 %513  ;;  %2455 = vmatprep.subr.bf16.mxu0 %v2678_v44 }
 0x5cd   :  { %v524_v56 = vsub.f32 %v503_v46, %v520_v55  ;;  %v521_v5 = vmul.f32 0.03125, %v514_v3  ;;  %v527_v57 = vmul.f32 %v523_v54, %v523_v54  ;;  %2456 = vmatpush3.bf16.msra.mxu0 %v2678_v44  ;;  %v2680_v46 = vld [vmem:[%s3560_s1 + $0x48] sm:$0xff]  }
 0x5ce   :  { %v517_v58 = vpop.xlane.xlu0 %516  ;;  %2457 = vmatprep.subr.bf16.mxu0 %v2679_v45 }
 0x5cf   :  { %v525_v59 = vsub.f32 %v504_v47, %v521_v5  ;;  %v522_v60 = vmul.f32 0.03125, %v517_v58  ;;  %v531_v6 = vsel %vm83_vm0, %v527_v57, 0.0  ;;  %v528_v61 = vmul.f32 %v524_v56, %v524_v56  ;;  %v2681_v47 = vld [vmem:[%s3560_s1 + $0x50] sm:$0xff]  }
 0x5d0   :  { %532 = vadd.xlane.f32.xlu1 %v531_v6 }
 0x5d1   :  { %v526_v62 = vsub.f32 %v505_v49, %v522_v60  ;;  %v534_v63 = vsel %vm83_vm0, %v528_v61, 0.0  ;;  %v529_v0 = vmul.f32 %v525_v59, %v525_v59  ;;  %2458 = vmatpush3.bf16.msra.mxu0 %v2679_v45  ;;  %v2683_v49 = vld [vmem:[%s3560_s1 + $0x60] sm:$0xff]  }
 0x5d2   :  { %535 = vadd.xlane.f32.xlu0 %v534_v63  ;;  %2459 = vmatprep.subr.bf16.mxu0 %v2680_v46 }
 0x5d3   :  { %v537_v1 = vsel %vm83_vm0, %v529_v0, 0.0  ;;  %v530_v4 = vmul.f32 %v526_v62, %v526_v62 }
 0x5d4   :  { %538 = vadd.xlane.f32.xlu1 %v537_v1 }
 0x5d5   :  { %v540_v7 = vsel %vm83_vm0, %v530_v4, 0.0  ;;  %2460 = vmatpush3.bf16.msra.mxu0 %v2680_v46 }
 0x5d6   :  { %541 = vadd.xlane.f32.xlu0 %v540_v7  ;;  %2461 = vmatprep.subr.bf16.mxu0 %v2681_v47 }
 0x5d9   :  { %2462 = vmatpush3.bf16.msra.mxu0 %v2681_v47 }
 0x5da   :  { %2463 = vmatprep.subr.bf16.mxu0 %v2682_v48 }
 0x5dd   :  { %2464 = vmatpush3.bf16.msra.mxu0 %v2682_v48 }
 0x5de   :  { %2465 = vmatprep.subr.bf16.mxu0 %v2683_v49 }
 0x5e1   :  { %2466 = vmatpush3.bf16.msra.mxu0 %v2683_v49 }
 0x5e2   :  { %2467 = vmatprep.subr.bf16.mxu0 %v2684_v50 }
 0x5e5   :  { %2468 = vmatpush3.bf16.msra.mxu0 %v2684_v50 }
 0x65d   :  { %v533_v10 = vpop.xlane.xlu1 %532 }
 0x65e   :  { %v543_v11 = vmul.f32 0.03125, %v533_v10 }
 0x65f   :  { %v536_v12 = vpop.xlane.xlu0 %535 }
 0x660   :  { %v547_v13 = vadd.f32 1e-12, %v543_v11  ;;  %v544_v14 = vmul.f32 0.03125, %v536_v12 }
 0x661   :  { %v539_v15 = vpop.xlane.xlu1 %538 }
 0x662   :  { %2701 = vrsqrt.f32 %v547_v13  ;;  %v548_v17 = vadd.f32 1e-12, %v544_v14  ;;  %v545_v19 = vmul.f32 0.03125, %v539_v15 }
 0x663   :  { %v542_v20 = vpop.xlane.xlu0 %541 }
 0x664   :  { %2703 = vrsqrt.f32 %v548_v17  ;;  %v549_v21 = vadd.f32 1e-12, %v545_v19  ;;  %v546_v16 = vmul.f32 0.03125, %v542_v20 }
 0x666   :  { %2705 = vrsqrt.f32 %v549_v21  ;;  %v550_v18 = vadd.f32 1e-12, %v546_v16 }
 0x668   :  { %2707 = vrsqrt.f32 %v550_v18 }
 0x66c   :  { %v2702_v22 = vpop.eup %2701 }
 0x66d   :  { %v555_v24 = vmul.f32 %v2702_v22, %v523_v54 }
 0x66e   :  { %v2704_v25 = vpop.eup %2703 }
 0x66f   :  { %v556_v26 = vmul.f32 %v2704_v25, %v524_v56  ;;  %v563_v27 = vmul.f32 %v2320_v23, %v555_v24 }
 0x670   :  { %v2706_v28 = vpop.eup %2705 }
 0x671   :  { %v557_v30 = vmul.f32 %v2706_v28, %v525_v59  ;;  %v564_v31 = vmul.f32 %v2320_v23, %v556_v26  ;;  %v2938_v35 = vadd.f32 %v2321_v29, %v563_v27 }
 0x672   :  { %v2708_v32 = vpop.eup %2707 }
 0x673   :  { %v558_v33 = vmul.f32 %v2708_v32, %v526_v62  ;;  %v565_v34 = vmul.f32 %v2320_v23, %v557_v30  ;;  %v2940_v36 = vadd.f32 %v2321_v29, %v564_v31 }
 0x675   :  { %v566_v37 = vmul.f32 %v2320_v23, %v558_v33  ;;  %v575_v38 = vpack.c.bf16 %v2940_v36, %v2938_v35  ;;  %v2944_v39 = vadd.f32 %v2321_v29, %v565_v34  ;;  %v2327_v34 = vld [vmem:[%s3562_s2 + $0x5] ss:$0 sm:$0xff] }
 0x677   :  { %v2946_v40 = vadd.f32 %v2321_v29, %v566_v37  ;;  %2449 = vmatprep.mubr.msk.bf16.mxu1 %vm83_vm0, %v575_v38 }
 0x679   :  { %v576_v42 = vpack.c.bf16 %v2946_v40, %v2944_v39 }
 0x67b   :  { %2450 = vmatmul.mubr.msk.bf16.vlgmr.msra.gmra.mrb[8].mxu1 %vm83_vm0, %v576_v42 }
 0x67c   :  { %2481 = vmatprep.mubr.msk.f32.mxu1 %vm83_vm0, %v2952_v41 }
 0x74e   :  { %v2451_v52 = vpop.f32.mrb[8].mxu1 }
 0x74f   :  { %v642_v2 = vadd.f32 %v2451_v52, %v2322_v51  ;;  %v633_v53 = vpop.f32.mrb[9].mxu1 }
 0x750   :  { %v634_v54 = vadd.f32 %v2322_v51, %v633_v53  ;;  %v2452_v55 = vpop.f32.mrb[10].mxu1 }
 0x751   :  { %v650_v3 = vmul.f32 %v642_v2, %v642_v2  ;;  %v645_v56 = vadd.f32 %v2452_v55, %v2322_v51  ;;  %v636_v5 = vpop.f32.mrb[11].mxu1 }
 0x752   :  { %v648_v57 = vmul.f32 %v634_v54, %v634_v54  ;;  %v637_v58 = vadd.f32 %v2322_v51, %v636_v5 }
 0x753   :  { %v654_v59 = vmul.f32 %v650_v3, %v642_v2  ;;  %v651_v60 = vmul.f32 %v645_v56, %v645_v56 }
 0x754   :  { %v652_v6 = vmul.f32 %v648_v57, %v634_v54  ;;  %v649_v61 = vmul.f32 %v637_v58, %v637_v58 }
 0x755   :  { %v658_v62 = vmul.f32 0.044715, %v654_v59  ;;  %v655_v63 = vmul.f32 %v651_v60, %v645_v56 }
 0x756   :  { %v656_v0 = vmul.f32 0.044715, %v652_v6  ;;  %v653_v1 = vmul.f32 %v649_v61, %v637_v58 }
 0x757   :  { %v662_v4 = vadd.f32 %v658_v62, %v642_v2  ;;  %v659_v7 = vmul.f32 0.044715, %v655_v63 }
 0x758   :  { %v660_v8 = vadd.f32 %v656_v0, %v634_v54  ;;  %v657_v9 = vmul.f32 0.044715, %v653_v1 }
 0x759   :  { %v666_v10 = vmul.f32 0.7978846, %v662_v4  ;;  %v663_v11 = vadd.f32 %v659_v7, %v645_v56 }
 0x75a   :  { %v664_v12 = vmul.f32 0.7978846, %v660_v8  ;;  %v661_v13 = vadd.f32 %v657_v9, %v637_v58  ;;  %v3004_v8 = vld [vmem:[%s3561_s0 + $0x28] sm:$0xff]  ;;  %v2793_v9 = vmov 44  }
 0x75b   :  { %2709 = vtanh.f32 %v666_v10  ;;  %v667_v14 = vmul.f32 0.7978846, %v663_v11  ;;  %vm941_vm2 = vcmp.gt.f32.partialorder %v3004_v8, 0.0  ;;  %2590 = vset.pattern.permute.xlu0 %v2793_v9  ;;  %2589 = vset.pattern.permute.xlu1 %v2793_v9  ;;  %v2794_v10 = vmov 0  }
 0x75c   :  { %2711 = vtanh.f32 %v664_v12  ;;  %v665_v15 = vmul.f32 0.7978846, %v661_v13  ;;  %v943_v11 = vsel %vm941_vm2, 1, %v2794_v10  ;;  %v942_v12 = vsel %vm940_vm3, 1, %v2794_v10 }
 0x75d   :  { %2713 = vtanh.f32 %v667_v14  ;;  %vm1703_vm2 = vcmask 47109   ;;  %vm2067_vm3 = vcmask 1045504  }
 0x75e   :  { %2715 = vtanh.f32 %v665_v15 }
 0x765   :  { %v2710_v17 = vpop.eup %2709 }
 0x766   :  { %v2712_v19 = vpop.eup %2711  ;;  %v674_v20 = vadd.f32 1.0, %v2710_v17 }
 0x767   :  { %v2714_v21 = vpop.eup %2713  ;;  %v672_v16 = vadd.f32 1.0, %v2712_v19 }
 0x768   :  { %v2716_v18 = vpop.eup %2715  ;;  %v678_v22 = vmul.f32 0.5, %v674_v20  ;;  %v675_v23 = vadd.f32 1.0, %v2714_v21 }
 0x769   :  { %v673_v24 = vadd.f32 1.0, %v2716_v18  ;;  %v676_v25 = vmul.f32 0.5, %v672_v16 }
 0x76a   :  { %v679_v26 = vmul.f32 0.5, %v675_v23  ;;  %v682_v28 = vmul.f32 %v678_v22, %v642_v2 }
 0x76b   :  { %v677_v27 = vmul.f32 0.5, %v673_v24  ;;  %v680_v30 = vmul.f32 %v676_v25, %v634_v54 }
 0x76c   :  { %v683_v29 = vmul.f32 %v679_v26, %v645_v56  ;;  %v2336_v26 = vld [vmem:[%s3562_s2 + $0x6] ss:$0 sm:$0xff] }
 0x76d   :  { %v681_v31 = vmul.f32 %v677_v27, %v637_v58 }
 0x76e   :  { %v685_v32 = vpack.c.bf16 %v683_v29, %v682_v28 }
 0x76f   :  { %v684_v33 = vpack.c.bf16 %v681_v31, %v680_v30 }
 0x771   :  { %2469 = vmatprep.mubr.bf16.mxu0 %v684_v33 }
 0x772   :  { %2470 = vmatmul.mubr.bf16.vlgmr.msra.gmra.mrb[8].mxu0 %v685_v32  ;;  %v2337_v32 = vld [vmem:[%s3562_s2 + $0x7] ss:$0 sm:$0xff] }
 0x845   :  { %v2471_v37 = vpop.f32.mrb[8].mxu0 }
 0x846   :  { %v772_v38 = vpop.f32.mrb[9].mxu0  ;;  %v781_v42 = vadd.f32 %v2471_v37, %v2327_v34 }
 0x847   :  { %v773_v43 = vadd.f32 %v2327_v34, %v772_v38  ;;  %v2472_v44 = vpop.f32.mrb[10].mxu0 }
 0x848   :  { %v775_v45 = vpop.f32.mrb[11].mxu0  ;;  %v784_v46 = vadd.f32 %v2472_v44, %v2327_v34  ;;  %v789_v51 = vadd.f32 %v781_v42, %v2944_v39 }
 0x849   :  { %v776_v47 = vadd.f32 %v2327_v34, %v775_v45  ;;  %v787_v48 = vadd.f32 %v773_v43, %v2938_v35 }
 0x84a   :  { %v790_v2 = vadd.f32 %v784_v46, %v2946_v40  ;;  %v797_v53 = vsel %vm83_vm0, %v789_v51, 0.0 }
 0x84b   :  { %v791_v49 = vsel %vm83_vm0, %v787_v48, 0.0  ;;  %v788_v50 = vadd.f32 %v776_v47, %v2940_v36  ;;  %v60_v47 = vld [vmem:[%s3562_s2 + $0x10] sm:$0xff] }
 0x84c   :  { %792 = vadd.xlane.f32.xlu1 %v791_v49  ;;  %v800_v54 = vsel %vm83_vm0, %v790_v2, 0.0 }
 0x84d   :  { %v794_v52 = vsel %vm83_vm0, %v788_v50, 0.0 }
 0x84e   :  { %795 = vadd.xlane.f32.xlu0 %v794_v52 }
 0x850   :  { %798 = vadd.xlane.f32.xlu1 %v797_v53  ;;  %v63_v53 = vld [vmem:[%s3562_s2 + $0x28] sm:$0xff] }
 0x852   :  { %801 = vadd.xlane.f32.xlu0 %v800_v54 }
 0x8d9   :  { %v793_v55 = vpop.xlane.xlu1 %792 }
 0x8da   :  { %v803_v35 = vmul.f32 0.03125, %v793_v55 }
 0x8db   :  { %v796_v3 = vpop.xlane.xlu0 %795 }
 0x8dc   :  { %v807_v56 = vsub.f32 %v787_v48, %v803_v35  ;;  %v804_v5 = vmul.f32 0.03125, %v796_v3  ;;  %v61_v48 = vld [vmem:[%s3562_s2 + $0x18] sm:$0xff] }
 0x8dd   :  { %v799_v36 = vpop.xlane.xlu1 %798  ;;  %v2528_v52 = vpack.c.bf16 %v61_v48, %v60_v47 }
 0x8de   :  { %v808_v57 = vsub.f32 %v788_v50, %v804_v5  ;;  %v805_v39 = vmul.f32 0.03125, %v799_v36  ;;  %v811_v58 = vmul.f32 %v807_v56, %v807_v56 }
 0x8df   :  { %v802_v59 = vpop.xlane.xlu0 %801 }
 0x8e0   :  { %v809_v60 = vsub.f32 %v789_v51, %v805_v39  ;;  %v806_v6 = vmul.f32 0.03125, %v802_v59  ;;  %v815_v40 = vsel %vm83_vm0, %v811_v58, 0.0  ;;  %v812_v61 = vmul.f32 %v808_v57, %v808_v57 }
 0x8e1   :  { %816 = vadd.xlane.f32.xlu1 %v815_v40 }
 0x8e2   :  { %v810_v62 = vsub.f32 %v790_v2, %v806_v6  ;;  %v818_v63 = vsel %vm83_vm0, %v812_v61, 0.0  ;;  %v813_v0 = vmul.f32 %v809_v60, %v809_v60  ;;  %v62_v2 = vld [vmem:[%s3562_s2 + $0x20] sm:$0xff]  ;;  %v2343_v6 = vld [vmem:[%s3562_s2 + $0x9] ss:$0 sm:$0xff] }
 0x8e3   :  { %819 = vadd.xlane.f32.xlu0 %v818_v63  ;;  %v2532_v54 = vpack.c.bf16 %v63_v53, %v62_v2 }
 0x8e4   :  { %v821_v1 = vsel %vm83_vm0, %v813_v0, 0.0  ;;  %v814_v4 = vmul.f32 %v810_v62, %v810_v62  ;;  %v2795_v0 = vmov 1  }
 0x8e5   :  { %822 = vadd.xlane.f32.xlu1 %v821_v1 }
 0x8e6   :  { %v824_v7 = vsel %vm83_vm0, %v814_v4, 0.0 }
 0x8e7   :  { %825 = vadd.xlane.f32.xlu0 %v824_v7 }
 0x8f6   :  { %945 = vperm.xlu1 %2589, %v942_v12  }
 0x8fa   :  { %2592 = vset.pattern.permute.xlu1 %v2795_v0 }
 0x8fd   :  { %948 = vperm.xlu0 %2590, %v943_v11   ;;  %v64_v11 = vld [vmem:[%s3562_s2 + $0x10] sm:$0x3f] }
 0x8fe   :  { %v1040_v12 = vsel %vm1039_vm8, %v64_v11, -inf  ;;  %vm1956_vm8 = vcmask 40960  }
 0x901   :  { %2591 = vset.pattern.permute.xlu0 %v2794_v10 }
 0x96e   :  { %v817_v13 = vpop.xlane.xlu1 %816 }
 0x96f   :  { %v827_v14 = vmul.f32 0.03125, %v817_v13  ;;  %v1041_v13 = vrot.slane %v1040_v12, 4 }
 0x970   :  { %v820_v15 = vpop.xlane.xlu0 %819 }
 0x971   :  { %v831_v17 = vadd.f32 1e-12, %v827_v14  ;;  %v828_v19 = vmul.f32 0.03125, %v820_v15  ;;  %v1042_v15 = vmax.f32 %v1040_v12, %v1041_v13 }
 0x972   :  { %v823_v20 = vpop.xlane.xlu1 %822 }
 0x973   :  { %2717 = vrsqrt.f32 %v831_v17  ;;  %v832_v21 = vadd.f32 1e-12, %v828_v19  ;;  %v829_v16 = vmul.f32 0.03125, %v823_v20  ;;  %v2796_v17 = vmov 4  }
 0x974   :  { %v826_v18 = vpop.xlane.xlu0 %825  ;;  %v2797_v19 = vmov 2   ;;  %v1162_v20 = vsub.f32 1.0, %v2952_v41 }
 0x975   :  { %2719 = vrsqrt.f32 %v832_v21  ;;  %v833_v22 = vadd.f32 1e-12, %v829_v16  ;;  %v830_v23 = vmul.f32 0.03125, %v826_v18  ;;  %v1043_v21 = vrot.slane %v1042_v15, 2 }
 0x976   :  { %v946_v35 = vpop.permute.xlu1 %945  ;;  %v2798_v16 = vmov 3   ;;  %v1163_v18 = vsub.f32 1.0, %v3004_v8 }
 0x977   :  { %2721 = vrsqrt.f32 %v833_v22  ;;  %v834_v24 = vadd.f32 1e-12, %v830_v23  ;;  %vm950_vm5 = vcmp.eq.s32.totalorder %v946_v35, 1  ;;  %v1044_v22 = vmax.f32 %v1042_v15, %v1043_v21 }
 0x978   :  { %v2799_v23 = vmov 5  }
 0x979   :  { %2723 = vrsqrt.f32 %v834_v24  ;;  %v1045_v24 = vrot.slane %v1044_v22, 1 }
 0x97c   :  { %v949_v55 = vpop.permute.xlu0 %948 }
 0x97d   :  { %v2718_v25 = vpop.eup %2717  ;;  %vm951_vm4 = vcmp.eq.s32.totalorder %v949_v55, 1 }
 0x97e   :  { %v839_v27 = vmul.f32 %v2718_v25, %v807_v56  ;;  %v1046_v25 = vmax.f32 %v1044_v22, %v1045_v24 }
 0x97f   :  { %v2720_v28 = vpop.eup %2719 }
 0x980   :  { %v840_v29 = vmul.f32 %v2720_v28, %v808_v57  ;;  %v847_v30 = vmul.f32 %v2336_v26, %v839_v27  ;;  %v2340_v57 = vld [vmem:[%s3562_s2 + $0x8] ss:$0 sm:$0xff]  ;;  %v1073_v28 = vlaneseq }
 0x981   :  { %v2722_v31 = vpop.eup %2721 }
 0x982   :  { %v848_v33 = vmul.f32 %v2336_v26, %v840_v29  ;;  %v841_v34 = vmul.f32 %v2722_v31, %v809_v60  ;;  %v855_v38 = vadd.f32 %v2337_v32, %v847_v30  ;;  %v1074_v29 = vshrl.u32 %v1073_v28, 7 }
 0x983   :  { %v2724_v37 = vpop.eup %2723 }
 0x984   :  { %v856_v42 = vadd.f32 %v2337_v32, %v848_v33  ;;  %v842_v43 = vmul.f32 %v2724_v37, %v810_v62  ;;  %v849_v44 = vmul.f32 %v2336_v26, %v841_v34  ;;  %v1084_v30 = vsub.s32 1, %v1074_v29 }
 0x985   :  { %v1075_v31 = vsub.s32 0, %v1074_v29  ;;  %v1124_v48 = vsub.s32 5, %v1074_v29 }
 0x986   :  { %v2520_v45 = vpack.c.bf16 %v856_v42, %v855_v38  ;;  %v850_v46 = vmul.f32 %v2336_v26, %v842_v43  ;;  %v857_v49 = vadd.f32 %v2337_v32, %v849_v44  ;;  %v1047_v26 = vsub.f32 %v64_v11, %v1046_v25 }
 0x987   :  { %v1104_v38 = vsub.s32 3, %v1074_v29  ;;  %v1114_v44 = vsub.s32 4, %v1074_v29 }
 0x988   :  { %2521 = vmatprep.subr.bf16.mxu1 %v2520_v45  ;;  %v858_v50 = vadd.f32 %v2337_v32, %v850_v46  ;;  %v1048_v27 = vmul.f32 1.442695, %v1047_v26  ;;  %v1094_v32 = vsub.s32 2, %v1074_v29 }
 0x989   :  { %2523 = vmatpush3.bf16.msra.mxu1 %v2520_v45 }
 0x98a   :  { %v2524_v51 = vpack.c.bf16 %v858_v50, %v857_v49 }
 0x98c   :  { %2525 = vmatprep.subr.bf16.mxu1 %v2524_v51 }
 0x98d   :  { %2527 = vmatpush3.bf16.msra.mxu1 %v2524_v51 }
 0x98e   :  { %2529 = vmatprep.subr.bf16.mxu1 %v2528_v52 }
 0x990   :  { %2482 = vmatmul.mubr.msk.f32.vlgmr.msra.gmra.mrb[12].mxu1 %vm83_vm0, %v3004_v8 }
 0x991   :  { %2531 = vmatpush3.bf16.msra.mxu1 %v2528_v52 }
 0x992   :  { %2533 = vmatprep.subr.bf16.mxu1 %v2532_v54 }
 0x995   :  { %2535 = vmatpush3.bf16.msra.mxu1 %v2532_v54 }
 0xa63   :  { %v2483_v3 = vpop.f32.mrb[12].mxu1 }
 0xa64   :  { %v953_v56 = vsel %vm951_vm4, %v2483_v3, -1.0  ;;  %v931_v5 = vpop.f32.mrb[13].mxu1  ;;  %vm1996_vm4 = vcmask 48128  }
 0xa65   :  { %2269 = vst.msk [vmem:[%s3563_s3 + $0x8] sm:$0xff] %vm83_vm0, %v953_v56  ;;  %v952_v36 = vsel %vm950_vm5, %v931_v5, -1.0  ;;  %vm1822_vm5 = vcmask 1047559  }
 0xa66   :  { %2268 = vst.msk [vmem:[%s3563_s3] sm:$0xff] %vm83_vm0, %v952_v36  ;;  %2492 = vmatprep.mubr.msk.f32.mxu1 %vm83_vm0, %v952_v36 }
 0xa67   :  { %2493 = vmatmul.mubr.msk.f32.vlgmr.msra.gmra.mrb[14].mxu1 %vm83_vm0, %v953_v56  ;;  %vm1581_vm0 = vcmask 46084  }
 0xb3a   :  { %v2494_v39 = vpop.f32.mrb[14].mxu1 }
 0xb3b   :  { %v3046_v58 = vadd.f32 %v2494_v39, %v2340_v57  ;;  %v1030_v59 = vpop.f32.mrb[15].mxu1 }
 0xb3c   :  { %v3048_v60 = vadd.f32 %v2340_v57, %v1030_v59 }
 0xb3d   :  { %v1056_v40 = vrot.slane %v3046_v58, 7 }
 0xb3f   :  { %v1058_v61 = vsel %vm1057_vm6, %v1056_v40, %v3048_v60 }
 0xb40   :  { %v3056_v62 = vadd.f32 %v2343_v6, %v1058_v61 }
 0xb42   :  { %v1062_v63 = vsel %vm1061_vm7, %v3056_v62, -inf  ;;  %vm1952_vm7 = vcmask 48135  }
 0xb43   :  { %1063 = vmax.xlane.f32.xlu1 %v1062_v63 }
 0xbd0   :  { %v3060_v1 = vpop.xlane.xlu1 %1063 }
 0xbd1   :  { %v1065_v4 = vsub.f32 %v3056_v62, %v3060_v1  ;;  %v1133_v12 = vadd.f32 %v3060_v1, %v3046_v58 }
 0xbd3   :  { %v1066_v7 = vmul.f32 1.442695, %v1065_v4 }
 0xbd5   :  { %2725 = vpow2.f32 %v1066_v7  ;;  %v1129_v7 = vrot.slane %v3060_v1, 7 }
 0xbd6   :  { %2727 = vpow2.f32 %v1048_v27 }
 0xbd7   :  { %v1132_v15 = vadd.f32 %v1129_v7, %v3048_v60 }
 0xbdf   :  { %v2726_v14 = vpop.eup %2725 }
 0xbe0   :  { %1079 = vperm.xlu1 %2592, %v2726_v14   ;;  %1070 = vperm.xlu0 %2591, %v2726_v14  }
 0xbe4   :  { %2595 = vset.pattern.permute.xlu1 %v2796_v17  ;;  %2593 = vset.pattern.permute.xlu0 %v2797_v19 }
 0xbe5   :  { %1109 = vperm.xlu1 %2595, %v2726_v14   ;;  %1089 = vperm.xlu0 %2593, %v2726_v14  }
 0xbe9   :  { %2597 = vset.pattern.permute.xlu1 %v2793_v9  ;;  %2594 = vset.pattern.permute.xlu0 %v2798_v16 }
 0xbea   :  { %1166 = vperm.xlu1 %2597, %v1162_v20   ;;  %1099 = vperm.xlu0 %2594, %v2726_v14  }
 0xbee   :  { %1170 = vperm.xlu1 %2597, %v1163_v18   ;;  %2596 = vset.pattern.permute.xlu0 %v2799_v23 }
 0xbef   :  { %1119 = vperm.xlu0 %2596, %v2726_v14  }
 0xbf2   :  { %1153 = vperm.xlu1 %2597, %v2952_v41   ;;  %v2728_v41 = vpop.eup %2727 }
 0xbf3   :  { %2598 = vset.pattern.permute.xlu0 %v2793_v9  ;;  %v3080_v9 = vrot.slane %v2728_v41, %v1084_v30  ;;  %v3084_v37 = vrot.slane %v2728_v41, %v1094_v32  ;;  %v3089_v47 = vrot.slane %v2728_v41, %v1104_v38  ;;  %v3091_v50 = vrot.slane %v2728_v41, %v1114_v44 }
 0xbf4   :  { %1157 = vperm.xlu0 %2598, %v3004_v8   ;;  %v3082_v8 = vrot.slane %v2728_v41, %v1075_v31  ;;  %v3094_v54 = vrot.slane %v2728_v41, %v1124_v48 }
 0xbf6   :  { %1135 = vrot.lane.b32.xlu1 %v1046_v25, %s2800_s8 }
 0xbf7   :  { %2599 = vset.pattern.permute.xlu1 %v2794_v10 }
 0xbf8   :  { %2602 = vset.pattern.permute.xlu0 %v2798_v16 }
 0xc5f   :  { %v1071_v33 = vpop.permute.xlu0 %1070  ;;  %v1080_v34 = vpop.permute.xlu1 %1079 }
 0xc60   :  { %v1086_v42 = vmul.f32 %v3080_v9, %v1080_v34  ;;  %v1077_v43 = vmul.f32 %v3082_v8, %v1071_v33 }
 0xc62   :  { %v1087_v49 = vadd.f32 %v1086_v42, %v1077_v43 }
 0xc64   :  { %v1090_v45 = vpop.permute.xlu0 %1089  ;;  %v1110_v51 = vpop.permute.xlu1 %1109 }
 0xc65   :  { %v1096_v46 = vmul.f32 %v3084_v37, %v1090_v45  ;;  %v1116_v55 = vmul.f32 %v3091_v50, %v1110_v51 }
 0xc67   :  { %v1097_v2 = vadd.f32 %v1096_v46, %v1087_v49 }
 0xc69   :  { %v1100_v52 = vpop.permute.xlu0 %1099  ;;  %v1167_v6 = vpop.permute.xlu1 %1166 }
 0xc6a   :  { %v1106_v53 = vmul.f32 %v3089_v47, %v1100_v52  ;;  %v3104_v63 = vrot.slane %v1167_v6, 1 }
 0xc6c   :  { %v1107_v35 = vadd.f32 %v1106_v53, %v1097_v2 }
 0xc6d   :  { %v3100_v40 = vpop.permute.xlu1 %1170 }
 0xc6e   :  { %v1117_v3 = vadd.f32 %v1116_v55, %v1107_v35  ;;  %v1120_v56 = vpop.permute.xlu0 %1119  ;;  %v1173_v13 = vsel %vm1057_vm6, %v3100_v40, %v3104_v63  ;;  %vm1825_vm6 = vcmask 48134  }
 0xc6f   :  { %v1126_v5 = vmul.f32 %v3094_v54, %v1120_v56  ;;  %v1175_v21 = vmul.f32 %v1173_v13, %v3056_v62 }
 0xc71   :  { %v1127_v36 = vadd.f32 %v1126_v5, %v1117_v3  ;;  %v3102_v61 = vpop.permute.xlu1 %1153  ;;  %v1177_v27 = vrot.slane %v1175_v21, 7 }
 0xc73   :  { %2729 = vlog2.f32 %v1127_v36  ;;  %v3106_v4 = vpop.permute.xlu0 %1157 }
 0xc75   :  { %v3109_v11 = vpop.permute.xlu1 %1135 }
 0xc76   :  { %v1139_v14 = vadd.f32 %v3109_v11, %v1133_v12  ;;  %v1138_v22 = vadd.f32 %v3109_v11, %v1132_v15 }
 0xc7d   :  { %v2730_v57 = vpop.eup %2729 }
 0xc7e   :  { %v1141_v39 = vmul.f32 0.6931472, %v2730_v57 }
 0xc80   :  { %1146 = vrot.lane.b32.xlu0 %v1141_v39, %s2800_s8  ;;  %v1143_v59 = vrot.slane %v1141_v39, 7 }
 0xc82   :  { %1144 = vrot.lane.b32.xlu1 %v1143_v59, %s2800_s8 }
 0xcf2   :  { %v1147_v20 = vpop.permute.xlu0 %1146 }
 0xcf3   :  { %v1151_v18 = vadd.f32 %v1147_v20, %v1139_v14 }
 0xcf4   :  { %v1145_v24 = vpop.permute.xlu1 %1144 }
 0xcf5   :  { %v1161_v25 = vmul.f32 %v3106_v4, %v1151_v18  ;;  %v1150_v26 = vadd.f32 %v1145_v24, %v1138_v22 }
 0xcf7   :  { %v3121_v1 = vadd.f32 %v1175_v21, %v1161_v25  ;;  %v1160_v28 = vmul.f32 %v3102_v61, %v1150_v26 }
 0xcf9   :  { %v3124_v29 = vadd.f32 %v1177_v27, %v1160_v28  ;;  %v1184_v30 = vrot.slane %v3121_v1, 7 }
 0xcfb   :  { %v1186_v62 = vsel %vm1185_vm9, %v1184_v30, %v3124_v29  ;;  %vm2046_vm9 = vcmask 7168  }
 0xcfc   :  { %v1189_v31 = vsel %vm1188_vm10, %v1186_v62, -inf  ;;  %vm2250_vm10 = vcmask 1040384  }
 0xcfd   :  { %1190 = vmax.xlane.f32.xlu0 %v1189_v31 }
 0xd8a   :  { %v3128_v41 = vpop.xlane.xlu0 %1190 }
 0xd8b   :  { %v1196_v32 = vsub.f32 %v3124_v29, %v3128_v41  ;;  %v1193_v38 = vrot.slane %v3128_v41, 1  ;;  %v1298_v31 = vrot.slane %v3128_v41, 7 }
 0xd8d   :  { %v1198_v33 = vmul.f32 1.442695, %v1196_v32  ;;  %v1197_v42 = vsub.f32 %v3121_v1, %v1193_v38  ;;  %v1300_v32 = vadd.f32 %v1298_v31, %v3048_v60 }
 0xd8f   :  { %2731 = vpow2.f32 %v1198_v33  ;;  %v1200_v43 = vmul.f32 1.442695, %v1197_v42 }
 0xd91   :  { %2733 = vpow2.f32 %v1200_v43  ;;  %v3187_v43 = vrot.slane %v3100_v40, 1 }
 0xd99   :  { %v2732_v34 = vpop.eup %2731 }
 0xd9a   :  { %1251 = vperm.xlu0 %2602, %v2732_v34   ;;  %1204 = vperm.xlu1 %2599, %v2732_v34  }
 0xd9e   :  { %2600 = vset.pattern.permute.xlu1 %v2795_v0  ;;  %2611 = vset.pattern.permute.xlu0 %v2794_v10 }
 0xd9f   :  { %1219 = vperm.xlu1 %2600, %v2732_v34  }
 0xda3   :  { %2601 = vset.pattern.permute.xlu1 %v2797_v19 }
 0xda4   :  { %1235 = vperm.xlu1 %2601, %v2732_v34  }
 0xda8   :  { %1213 = vrot.lane.b32.xlu1 %v3082_v8, %s2800_s8  ;;  %v2734_v8 = vpop.eup %2733 }
 0xda9   :  { %2603 = vset.pattern.permute.xlu1 %v2796_v17 }
 0xdac   :  { %1227 = vrot.lane.b32.xlu1 %v3080_v9, %s2800_s8 }
 0xdb0   :  { %1243 = vrot.lane.b32.xlu1 %v3084_v37, %s2800_s8 }
 0xdb4   :  { %1259 = vrot.lane.b32.xlu1 %v3089_v47, %s2800_s8 }
 0xdb8   :  { %1267 = vperm.xlu1 %2603, %v2732_v34  }
 0xdbc   :  { %2604 = vset.pattern.permute.xlu1 %v2799_v23 }
 0xdbd   :  { %1283 = vperm.xlu1 %2604, %v2732_v34   ;;  %v1301_v34 = vadd.f32 %v3128_v41, %v3046_v58  ;;  %v1321_v41 = vmul.f32 %v3124_v29, %v3104_v63 }
 0xdc1   :  { %2605 = vset.pattern.permute.xlu1 %v2794_v10 }
 0xdc2   :  { %1209 = vperm.xlu1 %2605, %v2734_v8  }
 0xdc6   :  { %2606 = vset.pattern.permute.xlu1 %v2795_v0 }
 0xdc7   :  { %1223 = vperm.xlu1 %2606, %v2734_v8  }
 0xdcb   :  { %2607 = vset.pattern.permute.xlu1 %v2797_v19 }
 0xdcc   :  { %1239 = vperm.xlu1 %2607, %v2734_v8  }
 0xdd0   :  { %2608 = vset.pattern.permute.xlu1 %v2798_v16 }
 0xdd1   :  { %1255 = vperm.xlu1 %2608, %v2734_v8  }
 0xdd5   :  { %2609 = vset.pattern.permute.xlu1 %v2796_v17 }
 0xdd6   :  { %1271 = vperm.xlu1 %2609, %v2734_v8  }
 0xdda   :  { %2610 = vset.pattern.permute.xlu1 %v2799_v23 }
 0xddb   :  { %1287 = vperm.xlu1 %2610, %v2734_v8  }
 0xddf   :  { %1275 = vrot.lane.b32.xlu1 %v3091_v50, %s2800_s8 }
 0xde0   :  { %2613 = vset.pattern.permute.xlu1 %v2797_v19 }
 0xde3   :  { %1291 = vrot.lane.b32.xlu1 %v3094_v54, %s2800_s8 }
 0xe19   :  { %v1205_v9 = vpop.permute.xlu1 %1204  ;;  %v1252_v39 = vpop.permute.xlu0 %1251 }
 0xe1e   :  { %v1220_v37 = vpop.permute.xlu1 %1219 }
 0xe23   :  { %v1236_v44 = vpop.permute.xlu1 %1235 }
 0xe27   :  { %v3158_v45 = vpop.permute.xlu1 %1213 }
 0xe28   :  { %v1216_v36 = vmul.f32 %v3158_v45, %v1205_v9  ;;  %v1302_v9 = vadd.f32 %v1300_v32, %v3109_v11 }
 0xe2b   :  { %v3160_v46 = vpop.permute.xlu1 %1227 }
 0xe2c   :  { %v1230_v35 = vmul.f32 %v3160_v46, %v1220_v37 }
 0xe2e   :  { %v1232_v7 = vadd.f32 %v1230_v35, %v1216_v36 }
 0xe2f   :  { %v3162_v47 = vpop.permute.xlu1 %1243 }
 0xe30   :  { %v1246_v57 = vmul.f32 %v3162_v47, %v1236_v44  ;;  %v1322_v44 = vmul.f32 %v3187_v43, %v3121_v1 }
 0xe32   :  { %v1248_v15 = vadd.f32 %v1246_v57, %v1232_v7 }
 0xe33   :  { %v3164_v48 = vpop.permute.xlu1 %1259 }
 0xe34   :  { %v1262_v12 = vmul.f32 %v3164_v48, %v1252_v39 }
 0xe36   :  { %v1264_v22 = vadd.f32 %v1262_v12, %v1248_v15 }
 0xe37   :  { %v1268_v49 = vpop.permute.xlu1 %1267 }
 0xe3c   :  { %v1284_v51 = vpop.permute.xlu1 %1283 }
 0xe41   :  { %v1210_v52 = vpop.permute.xlu1 %1209 }
 0xe42   :  { %v1217_v56 = vmul.f32 %v3158_v45, %v1210_v52 }
 0xe46   :  { %v1224_v50 = vpop.permute.xlu1 %1223 }
 0xe47   :  { %v1231_v54 = vmul.f32 %v3160_v46, %v1224_v50 }
 0xe49   :  { %v1233_v59 = vadd.f32 %v1231_v54, %v1217_v56 }
 0xe4b   :  { %v1240_v2 = vpop.permute.xlu1 %1239 }
 0xe4c   :  { %v1247_v5 = vmul.f32 %v3162_v47, %v1240_v2  ;;  %v1326_v2 = vrot.slane %v1322_v44, 7 }
 0xe4e   :  { %v1249_v14 = vadd.f32 %v1247_v5, %v1233_v59 }
 0xe50   :  { %v1256_v53 = vpop.permute.xlu1 %1255 }
 0xe51   :  { %v1263_v6 = vmul.f32 %v3164_v48, %v1256_v53 }
 0xe53   :  { %v1265_v18 = vadd.f32 %v1263_v6, %v1249_v14 }
 0xe55   :  { %v1272_v55 = vpop.permute.xlu1 %1271 }
 0xe5a   :  { %v1288_v3 = vpop.permute.xlu1 %1287 }
 0xe5e   :  { %v3174_v13 = vpop.permute.xlu1 %1275 }
 0xe5f   :  { %v1278_v20 = vmul.f32 %v3174_v13, %v1268_v49  ;;  %v1279_v21 = vmul.f32 %v3174_v13, %v1272_v55  ;;  %v1303_v49 = vadd.f32 %v1301_v34, %v3109_v11  ;;  %v1325_v55 = vrot.slane %v1321_v41, 7 }
 0xe61   :  { %v1280_v25 = vadd.f32 %v1278_v20, %v1264_v22  ;;  %v1281_v26 = vadd.f32 %v1279_v21, %v1265_v18 }
 0xe62   :  { %v3178_v24 = vpop.permute.xlu1 %1291 }
 0xe63   :  { %v1294_v27 = vmul.f32 %v3178_v24, %v1284_v51  ;;  %v1295_v28 = vmul.f32 %v3178_v24, %v1288_v3 }
 0xe65   :  { %v1296_v30 = vadd.f32 %v1294_v27, %v1280_v25  ;;  %v1297_v62 = vadd.f32 %v1295_v28, %v1281_v26 }
 0xe67   :  { %2735 = vlog2.f32 %v1296_v30 }
 0xe68   :  { %2737 = vlog2.f32 %v1297_v62 }
 0xe71   :  { %v2736_v33 = vpop.eup %2735 }
 0xe72   :  { %v2738_v38 = vpop.eup %2737  ;;  %v1305_v42 = vmul.f32 0.6931472, %v2736_v33 }
 0xe73   :  { %v1307_v8 = vmul.f32 0.6931472, %v2738_v38 }
 0xe74   :  { %v1310_v37 = vrot.slane %v1305_v42, 7 }
 0xe75   :  { %v1311_v51 = vrot.slane %v1307_v8, 7 }
 0xe76   :  { %v1314_v52 = vadd.f32 %v1310_v37, %v1302_v9 }
 0xe77   :  { %v1315_v50 = vadd.f32 %v1311_v51, %v1303_v49 }
 0xe78   :  { %v1316_v53 = vmul.f32 %v1314_v52, %v3102_v61 }
 0xe79   :  { %v1317_v40 = vmul.f32 %v1315_v50, %v3106_v4 }
 0xe7a   :  { %v3199_v35 = vadd.f32 %v1325_v55, %v1316_v53 }
 0xe7b   :  { %v3197_v54 = vadd.f32 %v1326_v2, %v1317_v40 }
 0xe7d   :  { %v1333_v1 = vrot.slane %v3197_v54, 7 }
 0xe7f   :  { %v1335_v3 = vsel %vm1334_vm11, %v1333_v1, %v3199_v35  ;;  %vm2255_vm11 = vcmask 1024  }
 0xe80   :  { %v1338_v56 = vsel %vm1337_vm12, %v1335_v3, -inf  ;;  %vm2276_vm12 = vcmask 310528  }
 0xe81   :  { %1339 = vmax.xlane.f32.xlu1 %v1338_v56 }
 0xf0e   :  { %v3203_v5 = vpop.xlane.xlu1 %1339 }
 0xf0f   :  { %v1342_v29 = vrot.slane %v3203_v5, 1  ;;  %v1345_v36 = vsub.f32 %v3199_v35, %v3203_v5  ;;  %v1423_v56 = vrot.slane %v3203_v5, 7 }
 0xf11   :  { %v1346_v57 = vsub.f32 %v3197_v54, %v1342_v29  ;;  %v1347_v39 = vmul.f32 1.442695, %v1345_v36  ;;  %v1426_v29 = vadd.f32 %v3203_v5, %v3046_v58 }
 0xf13   :  { %2739 = vpow2.f32 %v1347_v39  ;;  %v1349_v59 = vmul.f32 1.442695, %v1346_v57  ;;  %v1425_v39 = vadd.f32 %v1423_v56, %v3048_v60 }
 0xf15   :  { %2741 = vpow2.f32 %v1349_v59 }
 0xf1d   :  { %v2740_v6 = vpop.eup %2739 }
 0xf1e   :  { %1376 = vperm.xlu1 %2613, %v2740_v6   ;;  %1353 = vperm.xlu0 %2611, %v2740_v6  }
 0xf1f   :  { %v2742_v7 = vpop.eup %2741 }
 0xf22   :  { %2620 = vset.pattern.permute.xlu1 %v2796_v17  ;;  %2612 = vset.pattern.permute.xlu0 %v2795_v0 }
 0xf23   :  { %1364 = vperm.xlu0 %2612, %v2740_v6   ;;  %1404 = vperm.xlu1 %2620, %v2742_v7  }
 0xf27   :  { %2614 = vset.pattern.permute.xlu0 %v2798_v16  ;;  %2621 = vset.pattern.permute.xlu1 %v2799_v23 }
 0xf28   :  { %1388 = vperm.xlu0 %2614, %v2740_v6   ;;  %1416 = vperm.xlu1 %2621, %v2742_v7  }
 0xf2c   :  { %2615 = vset.pattern.permute.xlu0 %v2794_v10  ;;  %1412 = vperm.xlu1 %2621, %v2740_v6  }
 0xf2d   :  { %1358 = vperm.xlu0 %2615, %v2742_v7  }
 0xf30   :  { %2622 = vset.pattern.permute.xlu1 %v2794_v10 }
 0xf31   :  { %2616 = vset.pattern.permute.xlu0 %v2795_v0 }
 0xf32   :  { %1368 = vperm.xlu0 %2616, %v2742_v7  }
 0xf36   :  { %2617 = vset.pattern.permute.xlu0 %v2797_v19 }
 0xf37   :  { %1380 = vperm.xlu0 %2617, %v2742_v7  }
 0xf3b   :  { %2618 = vset.pattern.permute.xlu0 %v2798_v16 }
 0xf3c   :  { %1392 = vperm.xlu0 %2618, %v2742_v7  }
 0xf40   :  { %2619 = vset.pattern.permute.xlu0 %v2796_v17 }
 0xf41   :  { %1400 = vperm.xlu0 %2619, %v2740_v6   ;;  %v1428_v6 = vadd.f32 %v1426_v29, %v3109_v11 }
 0xf9d   :  { %v1354_v12 = vpop.permute.xlu0 %1353  ;;  %v1377_v21 = vpop.permute.xlu1 %1376 }
 0xf9e   :  { %v1361_v28 = vmul.f32 %v1354_v12, %v3158_v45  ;;  %v1383_v34 = vmul.f32 %v1377_v21, %v3162_v47  ;;  %v1444_v12 = vmul.f32 %v3197_v54, %v3187_v43  ;;  %v1427_v21 = vadd.f32 %v1425_v39, %v3109_v11 }
 0xfa2   :  { %v1365_v14 = vpop.permute.xlu0 %1364  ;;  %v1405_v22 = vpop.permute.xlu1 %1404 }
 0xfa3   :  { %v1371_v25 = vmul.f32 %v1365_v14, %v3160_v46  ;;  %v1408_v44 = vmul.f32 %v1405_v22, %v3174_v13  ;;  %v1448_v22 = vrot.slane %v1444_v12, 7 }
 0xfa5   :  { %v1373_v31 = vadd.f32 %v1371_v25, %v1361_v28 }
 0xfa7   :  { %v1389_v15 = vpop.permute.xlu0 %1388  ;;  %v1417_v32 = vpop.permute.xlu1 %1416  ;;  %v1385_v9 = vadd.f32 %v1383_v34, %v1373_v31 }
 0xfa8   :  { %v1395_v37 = vmul.f32 %v1389_v15, %v3164_v48  ;;  %v1420_v51 = vmul.f32 %v1417_v32, %v3178_v24 }
 0xfaa   :  { %v1397_v2 = vadd.f32 %v1395_v37, %v1385_v9 }
 0xfab   :  { %v1413_v52 = vpop.permute.xlu1 %1412 }
 0xfac   :  { %v1359_v20 = vpop.permute.xlu0 %1358  ;;  %v1419_v55 = vmul.f32 %v1413_v52, %v3178_v24 }
 0xfad   :  { %v1362_v30 = vmul.f32 %v1359_v20, %v3158_v45 }
 0xfb1   :  { %v1369_v18 = vpop.permute.xlu0 %1368 }
 0xfb2   :  { %v1372_v26 = vmul.f32 %v1369_v18, %v3160_v46  ;;  %v1443_v18 = vmul.f32 %v3199_v35, %v3104_v63 }
 0xfb4   :  { %v1374_v33 = vadd.f32 %v1372_v26, %v1362_v30  ;;  %v1447_v28 = vrot.slane %v1443_v18, 7 }
 0xfb6   :  { %v1381_v27 = vpop.permute.xlu0 %1380 }
 0xfb7   :  { %v1384_v62 = vmul.f32 %v1381_v27, %v3162_v47 }
 0xfb9   :  { %v1386_v42 = vadd.f32 %v1384_v62, %v1374_v33 }
 0xfbb   :  { %v1393_v38 = vpop.permute.xlu0 %1392 }
 0xfbc   :  { %v1396_v8 = vmul.f32 %v1393_v38, %v3164_v48 }
 0xfbe   :  { %v1398_v49 = vadd.f32 %v1396_v8, %v1386_v42 }
 0xfc0   :  { %v1410_v50 = vadd.f32 %v1408_v44, %v1398_v49  ;;  %v1401_v41 = vpop.permute.xlu0 %1400 }
 0xfc1   :  { %v1407_v53 = vmul.f32 %v1401_v41, %v3174_v13 }
 0xfc2   :  { %v1422_v40 = vadd.f32 %v1420_v51, %v1410_v50 }
 0xfc3   :  { %v1409_v1 = vadd.f32 %v1407_v53, %v1397_v2 }
 0xfc4   :  { %2743 = vlog2.f32 %v1422_v40 }
 0xfc5   :  { %v1421_v3 = vadd.f32 %v1419_v55, %v1409_v1 }
 0xfc7   :  { %2745 = vlog2.f32 %v1421_v3 }
 0xfce   :  { %v2744_v36 = vpop.eup %2743 }
 0xfcf   :  { %v1432_v57 = vmul.f32 0.6931472, %v2744_v36 }
 0xfd1   :  { %v2746_v59 = vpop.eup %2745  ;;  %v1436_v7 = vrot.slane %v1432_v57, 7 }
 0xfd2   :  { %v1430_v14 = vmul.f32 0.6931472, %v2746_v59 }
 0xfd3   :  { %v1440_v15 = vadd.f32 %v1436_v7, %v1428_v6 }
 0xfd4   :  { %v1435_v20 = vrot.slane %v1430_v14, 7 }
 0xfd5   :  { %v1442_v5 = vmul.f32 %v1440_v15, %v3106_v4 }
 0xfd6   :  { %v1439_v25 = vadd.f32 %v1435_v20, %v1427_v21 }
 0xfd7   :  { %v3242_v26 = vadd.f32 %v1448_v22, %v1442_v5 }
 0xfd8   :  { %v1441_v27 = vmul.f32 %v1439_v25, %v3102_v61 }
 0xfd9   :  { %v1455_v30 = vrot.slane %v3242_v26, 7 }
 0xfda   :  { %v3246_v54 = vadd.f32 %v1447_v28, %v1441_v27 }
 0xfdc   :  { %v1457_v62 = vsel %vm1456_vm13, %v1455_v30, %v3246_v54  ;;  %vm2285_vm13 = vcmask 318768  }
 0xfdd   :  { %v1460_v31 = vsel %vm1459_vm14, %v1457_v62, -inf  ;;  %vm2288_vm14 = vcmask 326968  }
 0xfde   :  { %1461 = vmax.xlane.f32.xlu0 %v1460_v31 }
0x106b   :  { %v3249_v35 = vpop.xlane.xlu0 %1461 }
0x106c   :  { %v1464_v32 = vrot.slane %v3249_v35, 1  ;;  %v1467_v33 = vsub.f32 %v3246_v54, %v3249_v35  ;;  %v1545_v31 = vrot.slane %v3249_v35, 7 }
0x106e   :  { %v1468_v34 = vsub.f32 %v3242_v26, %v1464_v32  ;;  %v1469_v38 = vmul.f32 1.442695, %v1467_v33  ;;  %v1548_v32 = vadd.f32 %v3249_v35, %v3046_v58  ;;  %v1565_v35 = vmul.f32 %v3246_v54, %v3104_v63 }
0x1070   :  { %2747 = vpow2.f32 %v1469_v38  ;;  %v1471_v42 = vmul.f32 1.442695, %v1468_v34  ;;  %v1566_v38 = vmul.f32 %v3242_v26, %v3187_v43 }
0x1072   :  { %2749 = vpow2.f32 %v1471_v42  ;;  %v1547_v42 = vadd.f32 %v1545_v31, %v3048_v60 }
0x107a   :  { %v2748_v8 = vpop.eup %2747 }
0x107b   :  { %1475 = vperm.xlu1 %2622, %v2748_v8  }
0x107c   :  { %v2750_v9 = vpop.eup %2749 }
0x107d   :  { %1526 = vperm.xlu0 %2619, %v2750_v9  }
0x107f   :  { %2623 = vset.pattern.permute.xlu1 %v2795_v0 }
0x1080   :  { %1486 = vperm.xlu1 %2623, %v2748_v8  }
0x1081   :  { %2632 = vset.pattern.permute.xlu0 %v2794_v10 }
0x1084   :  { %2624 = vset.pattern.permute.xlu1 %v2797_v19 }
0x1085   :  { %1498 = vperm.xlu1 %2624, %v2748_v8  }
0x1089   :  { %2625 = vset.pattern.permute.xlu1 %v2798_v16 }
0x108a   :  { %1510 = vperm.xlu1 %2625, %v2748_v8  }
0x108e   :  { %2626 = vset.pattern.permute.xlu1 %v2794_v10 }
0x108f   :  { %1480 = vperm.xlu1 %2626, %v2750_v9  }
0x1093   :  { %2627 = vset.pattern.permute.xlu1 %v2795_v0 }
0x1094   :  { %1490 = vperm.xlu1 %2627, %v2750_v9  }
0x1098   :  { %2628 = vset.pattern.permute.xlu1 %v2797_v19 }
0x1099   :  { %1502 = vperm.xlu1 %2628, %v2750_v9  }
0x109d   :  { %2629 = vset.pattern.permute.xlu1 %v2798_v16 }
0x109e   :  { %1514 = vperm.xlu1 %2629, %v2750_v9  }
0x10a2   :  { %2630 = vset.pattern.permute.xlu1 %v2796_v17 }
0x10a3   :  { %1522 = vperm.xlu1 %2630, %v2748_v8  }
0x10a7   :  { %2631 = vset.pattern.permute.xlu1 %v2799_v23 }
0x10a8   :  { %1538 = vperm.xlu1 %2631, %v2750_v9  }
0x10ac   :  { %1534 = vperm.xlu1 %2631, %v2748_v8   ;;  %v1550_v8 = vadd.f32 %v1548_v32, %v3109_v11 }
0x10b0   :  { %2635 = vset.pattern.permute.xlu1 %v2798_v16 }
0x10fa   :  { %v1476_v37 = vpop.permute.xlu1 %1475 }
0x10fb   :  { %v1483_v39 = vmul.f32 %v1476_v37, %v3158_v45 }
0x10fc   :  { %v1527_v57 = vpop.permute.xlu0 %1526 }
0x10fd   :  { %v1530_v7 = vmul.f32 %v1527_v57, %v3174_v13 }
0x10ff   :  { %v1487_v44 = vpop.permute.xlu1 %1486 }
0x1100   :  { %v1493_v56 = vmul.f32 %v1487_v44, %v3160_v46 }
0x1102   :  { %v1495_v12 = vadd.f32 %v1493_v56, %v1483_v39 }
0x1104   :  { %v1499_v49 = vpop.permute.xlu1 %1498 }
0x1105   :  { %v1505_v59 = vmul.f32 %v1499_v49, %v3162_v47 }
0x1107   :  { %v1507_v20 = vadd.f32 %v1505_v59, %v1495_v12 }
0x1109   :  { %v1511_v51 = vpop.permute.xlu1 %1510 }
0x110a   :  { %v1517_v14 = vmul.f32 %v1511_v51, %v3164_v48  ;;  %v1570_v51 = vrot.slane %v1566_v38, 7 }
0x110c   :  { %v1519_v22 = vadd.f32 %v1517_v14, %v1507_v20 }
0x110e   :  { %v1481_v52 = vpop.permute.xlu1 %1480 }
0x110f   :  { %v1484_v40 = vmul.f32 %v1481_v52, %v3158_v45  ;;  %v1549_v52 = vadd.f32 %v1547_v42, %v3109_v11 }
0x1113   :  { %v1491_v50 = vpop.permute.xlu1 %1490 }
0x1114   :  { %v1494_v2 = vmul.f32 %v1491_v50, %v3160_v46 }
0x1116   :  { %v1496_v1 = vadd.f32 %v1494_v2, %v1484_v40  ;;  %v1569_v40 = vrot.slane %v1565_v35, 7 }
0x1118   :  { %v1503_v41 = vpop.permute.xlu1 %1502 }
0x1119   :  { %v1506_v55 = vmul.f32 %v1503_v41, %v3162_v47 }
0x111b   :  { %v1508_v29 = vadd.f32 %v1506_v55, %v1496_v1 }
0x111d   :  { %v1515_v53 = vpop.permute.xlu1 %1514 }
0x111e   :  { %v1518_v3 = vmul.f32 %v1515_v53, %v3164_v48 }
0x1120   :  { %v1520_v6 = vadd.f32 %v1518_v3, %v1508_v29 }
0x1122   :  { %v1523_v36 = vpop.permute.xlu1 %1522  ;;  %v1532_v18 = vadd.f32 %v1530_v7, %v1520_v6 }
0x1123   :  { %v1529_v21 = vmul.f32 %v1523_v36, %v3174_v13 }
0x1125   :  { %v1531_v28 = vadd.f32 %v1529_v21, %v1519_v22 }
0x1127   :  { %v1539_v15 = vpop.permute.xlu1 %1538 }
0x1128   :  { %v1542_v5 = vmul.f32 %v1539_v15, %v3178_v24 }
0x112a   :  { %v1544_v25 = vadd.f32 %v1542_v5, %v1532_v18 }
0x112b   :  { %v1535_v27 = vpop.permute.xlu1 %1534 }
0x112c   :  { %2751 = vlog2.f32 %v1544_v25  ;;  %v1541_v30 = vmul.f32 %v1535_v27, %v3178_v24 }
0x112e   :  { %v1543_v62 = vadd.f32 %v1541_v30, %v1531_v28 }
0x1130   :  { %2753 = vlog2.f32 %v1543_v62 }
0x1136   :  { %v2752_v33 = vpop.eup %2751 }
0x1137   :  { %v1554_v34 = vmul.f32 0.6931472, %v2752_v33 }
0x1139   :  { %v1558_v9 = vrot.slane %v1554_v34, 7 }
0x113a   :  { %v2754_v37 = vpop.eup %2753 }
0x113b   :  { %v1562_v44 = vadd.f32 %v1558_v9, %v1550_v8  ;;  %v1552_v49 = vmul.f32 0.6931472, %v2754_v37 }
0x113d   :  { %v1564_v50 = vmul.f32 %v1562_v44, %v3106_v4  ;;  %v1557_v41 = vrot.slane %v1552_v49, 7 }
0x113f   :  { %v1561_v2 = vadd.f32 %v1557_v41, %v1549_v52  ;;  %v3289_v53 = vadd.f32 %v1570_v51, %v1564_v50 }
0x1141   :  { %v1563_v26 = vmul.f32 %v1561_v2, %v3102_v61  ;;  %v1577_v1 = vrot.slane %v3289_v53, 7 }
0x1143   :  { %v3292_v55 = vadd.f32 %v1569_v40, %v1563_v26 }
0x1145   :  { %v1579_v3 = vsel %vm1578_vm15, %v1577_v1, %v3292_v55  ;;  %vm2291_vm15 = vcmask 1047872  }
0x1146   :  { %v1582_v56 = vsel %vm1581_vm0, %v1579_v3, -inf }
0x1147   :  { %1583 = vmax.xlane.f32.xlu1 %v1582_v56 }
0x11d4   :  { %v3296_v29 = vpop.xlane.xlu1 %1583 }
0x11d5   :  { %v1586_v54 = vrot.slane %v3296_v29, 1  ;;  %v1589_v36 = vsub.f32 %v3292_v55, %v3296_v29  ;;  %v1667_v56 = vrot.slane %v3296_v29, 7 }
0x11d7   :  { %v1590_v57 = vsub.f32 %v3289_v53, %v1586_v54  ;;  %v1591_v39 = vmul.f32 1.442695, %v1589_v36  ;;  %v1670_v54 = vadd.f32 %v3296_v29, %v3046_v58 }
0x11d9   :  { %2755 = vpow2.f32 %v1591_v39  ;;  %v1593_v59 = vmul.f32 1.442695, %v1590_v57  ;;  %v1669_v39 = vadd.f32 %v1667_v56, %v3048_v60 }
0x11db   :  { %2757 = vpow2.f32 %v1593_v59 }
0x11e3   :  { %v2756_v6 = vpop.eup %2755 }
0x11e4   :  { %1632 = vperm.xlu1 %2635, %v2756_v6   ;;  %1597 = vperm.xlu0 %2632, %v2756_v6  }
0x11e5   :  { %v2758_v7 = vpop.eup %2757 }
0x11e8   :  { %2638 = vset.pattern.permute.xlu1 %v2797_v19  ;;  %2633 = vset.pattern.permute.xlu0 %v2795_v0 }
0x11e9   :  { %1608 = vperm.xlu0 %2633, %v2756_v6   ;;  %1624 = vperm.xlu1 %2638, %v2758_v7  }
0x11ed   :  { %2634 = vset.pattern.permute.xlu0 %v2797_v19  ;;  %2639 = vset.pattern.permute.xlu1 %v2796_v17 }
0x11ee   :  { %1620 = vperm.xlu0 %2634, %v2756_v6   ;;  %1644 = vperm.xlu1 %2639, %v2756_v6  }
0x11f2   :  { %2636 = vset.pattern.permute.xlu0 %v2794_v10  ;;  %2642 = vset.pattern.permute.xlu1 %v2799_v23 }
0x11f3   :  { %1660 = vperm.xlu1 %2642, %v2758_v7   ;;  %1602 = vperm.xlu0 %2636, %v2758_v7  }
0x11f7   :  { %2637 = vset.pattern.permute.xlu0 %v2795_v0  ;;  %2647 = vset.pattern.permute.xlu1 %v2798_v16 }
0x11f8   :  { %1612 = vperm.xlu0 %2637, %v2758_v7  }
0x11fc   :  { %2640 = vset.pattern.permute.xlu0 %v2798_v16 }
0x11fd   :  { %1636 = vperm.xlu0 %2640, %v2758_v7  }
0x1201   :  { %2641 = vset.pattern.permute.xlu0 %v2796_v17 }
0x1202   :  { %1648 = vperm.xlu0 %2641, %v2758_v7  }
0x1206   :  { %2643 = vset.pattern.permute.xlu0 %v2799_v23 }
0x1207   :  { %1656 = vperm.xlu0 %2643, %v2756_v6   ;;  %v1672_v6 = vadd.f32 %v1670_v54, %v3109_v11 }
0x120b   :  { %2644 = vset.pattern.permute.xlu0 %v2794_v10 }
0x1263   :  { %v1598_v12 = vpop.permute.xlu0 %1597  ;;  %v1633_v20 = vpop.permute.xlu1 %1632 }
0x1264   :  { %v1605_v30 = vmul.f32 %v1598_v12, %v3158_v45  ;;  %v1639_v9 = vmul.f32 %v1633_v20, %v3164_v48  ;;  %v1688_v12 = vmul.f32 %v3289_v53, %v3187_v43  ;;  %v1671_v20 = vadd.f32 %v1669_v39, %v3109_v11 }
0x1268   :  { %v1609_v14 = vpop.permute.xlu0 %1608  ;;  %v1625_v18 = vpop.permute.xlu1 %1624 }
0x1269   :  { %v1615_v27 = vmul.f32 %v1609_v14, %v3160_v46  ;;  %v1628_v32 = vmul.f32 %v1625_v18, %v3162_v47  ;;  %v1687_v18 = vmul.f32 %v3292_v55, %v3104_v63 }
0x126b   :  { %v1617_v34 = vadd.f32 %v1615_v27, %v1605_v30 }
0x126d   :  { %v1621_v15 = vpop.permute.xlu0 %1620  ;;  %v1645_v31 = vpop.permute.xlu1 %1644 }
0x126e   :  { %v1627_v62 = vmul.f32 %v1621_v15, %v3162_v47  ;;  %v1651_v35 = vmul.f32 %v1645_v31, %v3174_v13 }
0x1270   :  { %v1629_v8 = vadd.f32 %v1627_v62, %v1617_v34 }
0x1272   :  { %v1603_v21 = vpop.permute.xlu0 %1602  ;;  %v1661_v37 = vpop.permute.xlu1 %1660  ;;  %v1641_v52 = vadd.f32 %v1639_v9, %v1629_v8 }
0x1273   :  { %v1606_v22 = vmul.f32 %v1603_v21, %v3158_v45  ;;  %v1664_v50 = vmul.f32 %v1661_v37, %v3178_v24  ;;  %v2787_v37 = vld [vmem:[%s3562_s2 + $0x10] sm:$0x3f] }
0x1274   :  { %v1653_v40 = vadd.f32 %v1651_v35, %v1641_v52 }
0x1277   :  { %v1613_v5 = vpop.permute.xlu0 %1612 }
0x1278   :  { %v1616_v25 = vmul.f32 %v1613_v5, %v3160_v46  ;;  %v1692_v5 = vrot.slane %v1688_v12, 7 }
0x127a   :  { %v1618_v28 = vadd.f32 %v1616_v25, %v1606_v22 }
0x127c   :  { %v1637_v33 = vpop.permute.xlu0 %1636  ;;  %v1630_v38 = vadd.f32 %v1628_v32, %v1618_v28  ;;  %v1691_v28 = vrot.slane %v1687_v18, 7 }
0x127d   :  { %v1640_v42 = vmul.f32 %v1637_v33, %v3164_v48 }
0x127f   :  { %v1642_v49 = vadd.f32 %v1640_v42, %v1630_v38 }
0x1281   :  { %v1649_v44 = vpop.permute.xlu0 %1648 }
0x1282   :  { %v1652_v51 = vmul.f32 %v1649_v44, %v3174_v13  ;;  %v3365_v44 = vld [vmem:[%s3561_s0 + $0x20] sm:$0xff] }
0x1284   :  { %v1654_v41 = vadd.f32 %v1652_v51, %v1642_v49  ;;  %v3375_v49 = vld [vmem:[%s3561_s0 + $0x28] sm:$0xff]  ;;  %s2801_s0 = smov 90  }
0x1286   :  { %v1666_v2 = vadd.f32 %v1664_v50, %v1654_v41  ;;  %v1657_v26 = vpop.permute.xlu0 %1656 }
0x1287   :  { %v1663_v1 = vmul.f32 %v1657_v26, %v3178_v24 }
0x1288   :  { %2759 = vlog2.f32 %v1666_v2 }
0x1289   :  { %v1665_v3 = vadd.f32 %v1663_v1, %v1653_v40 }
0x128b   :  { %2761 = vlog2.f32 %v1665_v3 }
0x1292   :  { %v2760_v36 = vpop.eup %2759 }
0x1293   :  { %v1676_v57 = vmul.f32 0.6931472, %v2760_v36 }
0x1295   :  { %v2762_v59 = vpop.eup %2761  ;;  %v1680_v7 = vrot.slane %v1676_v57, 7 }
0x1296   :  { %v1674_v14 = vmul.f32 0.6931472, %v2762_v59 }
0x1297   :  { %v1684_v15 = vadd.f32 %v1680_v7, %v1672_v6 }
0x1298   :  { %v1679_v21 = vrot.slane %v1674_v14, 7 }
0x1299   :  { %v1686_v29 = vmul.f32 %v1684_v15, %v3106_v4 }
0x129a   :  { %v1683_v22 = vadd.f32 %v1679_v21, %v1671_v20 }
0x129b   :  { %v3337_v25 = vadd.f32 %v1692_v5, %v1686_v29 }
0x129c   :  { %v1685_v27 = vmul.f32 %v1683_v22, %v3102_v61 }
0x129d   :  { %v1699_v30 = vrot.slane %v3337_v25, 7 }
0x129e   :  { %v3341_v53 = vadd.f32 %v1691_v28, %v1685_v27 }
0x12a0   :  { %v1701_v62 = vsel %vm1700_vm1, %v1699_v30, %v3341_v53 }
0x12a1   :  { %v1704_v31 = vsel %vm1703_vm2, %v1701_v62, -inf }
0x12a2   :  { %1705 = vmax.xlane.f32.xlu1 %v1704_v31 }
0x132f   :  { %v3344_v55 = vpop.xlane.xlu1 %1705 }
0x1330   :  { %v1708_v32 = vrot.slane %v3344_v55, 1  ;;  %v1711_v33 = vsub.f32 %v3341_v53, %v3344_v55 }
0x1332   :  { %v1712_v34 = vsub.f32 %v3337_v25, %v1708_v32  ;;  %v1713_v38 = vmul.f32 1.442695, %v1711_v33 }
0x1334   :  { %2763 = vpow2.f32 %v1713_v38  ;;  %v1715_v42 = vmul.f32 1.442695, %v1712_v34 }
0x1336   :  { %2765 = vpow2.f32 %v1715_v42  ;;  %v1789_v42 = vrot.slane %v3344_v55, 7 }
0x133e   :  { %v2764_v8 = vpop.eup %2763 }
0x133f   :  { %1754 = vperm.xlu1 %2647, %v2764_v8   ;;  %1719 = vperm.xlu0 %2644, %v2764_v8  }
0x1340   :  { %v2766_v9 = vpop.eup %2765 }
0x1343   :  { %2650 = vset.pattern.permute.xlu1 %v2797_v19  ;;  %2645 = vset.pattern.permute.xlu0 %v2795_v0 }
0x1344   :  { %1730 = vperm.xlu0 %2645, %v2764_v8   ;;  %1746 = vperm.xlu1 %2650, %v2766_v9  }
0x1348   :  { %2646 = vset.pattern.permute.xlu0 %v2797_v19  ;;  %2651 = vset.pattern.permute.xlu1 %v2796_v17 }
0x1349   :  { %1742 = vperm.xlu0 %2646, %v2764_v8   ;;  %1766 = vperm.xlu1 %2651, %v2764_v8  }
0x134d   :  { %2648 = vset.pattern.permute.xlu0 %v2794_v10  ;;  %2654 = vset.pattern.permute.xlu1 %v2799_v23 }
0x134e   :  { %1782 = vperm.xlu1 %2654, %v2766_v9   ;;  %1724 = vperm.xlu0 %2648, %v2766_v9  }
0x1352   :  { %2649 = vset.pattern.permute.xlu0 %v2795_v0  ;;  %2061 = vrot.lane.b32.xlu1 %v2787_v37, %s2800_s8 }
0x1353   :  { %1734 = vperm.xlu0 %2649, %v2766_v9   ;;  %2657 = vset.pattern.permute.xlu1 %v2795_v0 }
0x1356   :  { %1988 = vrot.lane.b32.xlu1 %v3365_v44, %s2791_s24 }
0x1357   :  { %2652 = vset.pattern.permute.xlu0 %v2798_v16 }
0x1358   :  { %1758 = vperm.xlu0 %2652, %v2766_v9  }
0x135c   :  { %2653 = vset.pattern.permute.xlu0 %v2796_v17 }
0x135d   :  { %1770 = vperm.xlu0 %2653, %v2766_v9  }
0x1361   :  { %2655 = vset.pattern.permute.xlu0 %v2799_v23 }
0x1362   :  { %1778 = vperm.xlu0 %2655, %v2764_v8   ;;  %v1792_v8 = vadd.f32 %v3344_v55, %v3046_v58 }
0x1366   :  { %1990 = vrot.lane.b32.xlu0 %v3375_v49, %s2791_s24  ;;  %s2803_s24 = smov 126  }
0x1367   :  { %2656 = vset.pattern.permute.xlu0 %v2794_v10 }
0x13be   :  { %v1755_v51 = vpop.permute.xlu1 %1754  ;;  %v1720_v52 = vpop.permute.xlu0 %1719 }
0x13bf   :  { %v1727_v39 = vmul.f32 %v1720_v52, %v3158_v45  ;;  %v1761_v21 = vmul.f32 %v1755_v51, %v3164_v48  ;;  %v1791_v51 = vadd.f32 %v1789_v42, %v3048_v60 }
0x13c3   :  { %v1731_v50 = vpop.permute.xlu0 %1730  ;;  %v1747_v41 = vpop.permute.xlu1 %1746 }
0x13c4   :  { %v1737_v36 = vmul.f32 %v1731_v50, %v3160_v46  ;;  %v1750_v6 = vmul.f32 %v1747_v41, %v3162_v47  ;;  %v1794_v50 = vadd.f32 %v1792_v8, %v3109_v11 }
0x13c6   :  { %v1739_v12 = vadd.f32 %v1737_v36, %v1727_v39 }
0x13c8   :  { %v1743_v35 = vpop.permute.xlu0 %1742  ;;  %v1767_v2 = vpop.permute.xlu1 %1766 }
0x13c9   :  { %v1749_v59 = vmul.f32 %v1743_v35, %v3162_v47  ;;  %v1773_v30 = vmul.f32 %v1767_v2, %v3174_v13  ;;  %v1810_v35 = vmul.f32 %v3337_v25, %v3187_v43 }
0x13cb   :  { %v1751_v20 = vadd.f32 %v1749_v59, %v1739_v12 }
0x13cd   :  { %v1783_v26 = vpop.permute.xlu1 %1782  ;;  %v1725_v40 = vpop.permute.xlu0 %1724  ;;  %v1763_v22 = vadd.f32 %v1761_v21, %v1751_v20 }
0x13ce   :  { %v1728_v56 = vmul.f32 %v1725_v40, %v3158_v45  ;;  %v1786_v27 = vmul.f32 %v1783_v26, %v3178_v24  ;;  %v1793_v40 = vadd.f32 %v1791_v51, %v3109_v11 }
0x13cf   :  { %v1775_v32 = vadd.f32 %v1773_v30, %v1763_v22 }
0x13d1   :  { %v2062_v1 = vpop.permute.xlu1 %2061 }
0x13d2   :  { %v1735_v3 = vpop.permute.xlu0 %1734  ;;  %2495 = vmatprep.subr.msk.mxu1 %vm2067_vm3, %v2062_v1 }
0x13d3   :  { %v1738_v54 = vmul.f32 %v1735_v3, %v3160_v46  ;;  %2496 = vmatpush3.msk.msra.mxu1 %vm2067_vm3, %v2062_v1  ;;  %v1809_v3 = vmul.f32 %v3341_v53, %v3104_v63 }
0x13d5   :  { %v1740_v10 = vadd.f32 %v1738_v54, %v1728_v56  ;;  %v3383_v57 = vpop.permute.xlu1 %1988  ;;  %v1814_v56 = vrot.slane %v1810_v35, 7  ;;  %v1813_v39 = vrot.slane %v1809_v3, 7 }
0x13d6   :  { %2497 = vmatprep.mubr.msk.f32.mxu1 %vm1996_vm4, %v3383_v57 }
0x13d7   :  { %v1759_v7 = vpop.permute.xlu0 %1758  ;;  %v1752_v14 = vadd.f32 %v1750_v6, %v1740_v10 }
0x13d8   :  { %v1762_v15 = vmul.f32 %v1759_v7, %v3164_v48 }
0x13da   :  { %v1764_v29 = vadd.f32 %v1762_v15, %v1752_v14 }
0x13dc   :  { %v1771_v18 = vpop.permute.xlu0 %1770 }
0x13dd   :  { %v1774_v5 = vmul.f32 %v1771_v18, %v3174_v13 }
0x13df   :  { %v1776_v28 = vadd.f32 %v1774_v5, %v1764_v29 }
0x13e1   :  { %v1788_v62 = vadd.f32 %v1786_v27, %v1776_v28  ;;  %v1779_v31 = vpop.permute.xlu0 %1778  ;;  %v2802_v27 = vmov 47  }
0x13e2   :  { %v1785_v33 = vmul.f32 %v1779_v31, %v3178_v24 }
0x13e3   :  { %2767 = vlog2.f32 %v1788_v62 }
0x13e4   :  { %v1787_v34 = vadd.f32 %v1785_v33, %v1775_v32 }
0x13e5   :  { %v3396_v38 = vpop.permute.xlu0 %1990 }
0x13e6   :  { %2769 = vlog2.f32 %v1787_v34  ;;  %2498 = vmatmul.mubr.msk.f32.vlgmr.msra.gmra.mrb[16].mxu1 %vm1996_vm4, %v3396_v38  ;;  %v1995_v22 = vmul.f32 %v3396_v38, %v3046_v58 }
0x13ed   :  { %v2768_v9 = vpop.eup %2767 }
0x13ee   :  { %v1798_v37 = vmul.f32 0.6931472, %v2768_v9 }
0x13f0   :  { %v2770_v52 = vpop.eup %2769  ;;  %v1802_v41 = vrot.slane %v1798_v37, 7 }
0x13f1   :  { %v1796_v2 = vmul.f32 0.6931472, %v2770_v52 }
0x13f2   :  { %v1806_v26 = vadd.f32 %v1802_v41, %v1794_v50 }
0x13f3   :  { %v1801_v1 = vrot.slane %v1796_v2, 7 }
0x13f4   :  { %v1808_v55 = vmul.f32 %v1806_v26, %v3106_v4 }
0x13f5   :  { %v1805_v54 = vadd.f32 %v1801_v1, %v1793_v40 }
0x13f6   :  { %v3411_v36 = vadd.f32 %v1814_v56, %v1808_v55 }
0x13f7   :  { %v1807_v10 = vmul.f32 %v1805_v54, %v3102_v61 }
0x13f8   :  { %v1821_v59 = vrot.slane %v3411_v36, 7 }
0x13f9   :  { %v3415_v25 = vadd.f32 %v1813_v39, %v1807_v10 }
0x13fb   :  { %v1823_v6 = vsel %vm1822_vm5, %v1821_v59, %v3415_v25 }
0x13fc   :  { %v1826_v7 = vsel %vm1825_vm6, %v1823_v6, -inf }
0x13fd   :  { %1827 = vmax.xlane.f32.xlu1 %v1826_v7 }
0x148a   :  { %v3418_v53 = vpop.xlane.xlu1 %1827 }
0x148b   :  { %v1830_v12 = vrot.slane %v3418_v53, 1  ;;  %v1833_v14 = vsub.f32 %v3415_v25, %v3418_v53 }
0x148d   :  { %v1834_v15 = vsub.f32 %v3411_v36, %v1830_v12  ;;  %v1835_v20 = vmul.f32 1.442695, %v1833_v14 }
0x148f   :  { %2771 = vpow2.f32 %v1835_v20  ;;  %v1837_v21 = vmul.f32 1.442695, %v1834_v15 }
0x1491   :  { %2773 = vpow2.f32 %v1837_v21 }
0x1499   :  { %v2772_v18 = vpop.eup %2771 }
0x149a   :  { %1852 = vperm.xlu1 %2657, %v2772_v18   ;;  %1841 = vperm.xlu0 %2656, %v2772_v18  }
0x149b   :  { %v2774_v29 = vpop.eup %2773 }
0x149e   :  { %2663 = vset.pattern.permute.xlu1 %v2799_v23  ;;  %1846 = vperm.xlu0 %2656, %v2774_v29  }
0x149f   :  { %1904 = vperm.xlu1 %2663, %v2774_v29  }
0x14a2   :  { %2658 = vset.pattern.permute.xlu0 %v2795_v0 }
0x14a3   :  { %2664 = vset.pattern.permute.xlu1 %v2798_v16  ;;  %1856 = vperm.xlu0 %2658, %v2774_v29  }
0x14a4   :  { %1876 = vperm.xlu1 %2664, %v2772_v18  }
0x14a7   :  { %2659 = vset.pattern.permute.xlu0 %v2797_v19 }
0x14a8   :  { %2666 = vset.pattern.permute.xlu1 %v2799_v23  ;;  %1868 = vperm.xlu0 %2659, %v2774_v29  }
0x14a9   :  { %1900 = vperm.xlu1 %2666, %v2772_v18  }
0x14ac   :  { %2660 = vset.pattern.permute.xlu0 %v2798_v16  ;;  %v1994_v16 = vmul.f32 %v3383_v57, %v3048_v60 }
0x14ad   :  { %1880 = vperm.xlu0 %2660, %v2774_v29   ;;  %2145 = vrot.lane.b32.xlu1 %v3365_v44, %s2801_s0 }
0x14ae   :  { %v1997_v23 = vsel %vm1996_vm4, %v1994_v16, 0.0  ;;  %2668 = vset.pattern.permute.xlu1 %v2802_v27 }
0x14b1   :  { %2661 = vset.pattern.permute.xlu0 %v2796_v17 }
0x14b2   :  { %1892 = vperm.xlu0 %2661, %v2774_v29  }
0x14b6   :  { %2662 = vset.pattern.permute.xlu0 %v2797_v19  ;;  %v2000_v19 = vsel %vm1996_vm4, %v1995_v22, 0.0  ;;  %v1931_v22 = vmul.f32 %v3415_v25, %v3104_v63 }
0x14b7   :  { %1864 = vperm.xlu0 %2662, %v2772_v18  }
0x14b9   :  { %v3433_v0 = vpop.f32.mrb[16].mxu1 }
0x14ba   :  { %v2136_v5 = vpop.f32.mrb[17].mxu1 }
0x14bb   :  { %2665 = vset.pattern.permute.xlu0 %v2796_v17 }
0x14bc   :  { %1888 = vperm.xlu0 %2665, %v2772_v18  }
0x14c0   :  { %2147 = vrot.lane.b32.xlu0 %v3375_v49, %s2801_s0 }
0x14c1   :  { %2667 = vset.pattern.permute.xlu0 %v2802_v27 }
0x14df   :  { %1998 = vadd.xlane.f32.xlu0 %v1997_v23 }
0x14e3   :  { %2001 = vadd.xlane.f32.xlu0 %v2000_v19 }
0x1519   :  { %v1853_v28 = vpop.permute.xlu1 %1852  ;;  %v1842_v17 = vpop.permute.xlu0 %1841 }
0x151a   :  { %v1859_v26 = vmul.f32 %v1853_v28, %v3160_v46  ;;  %v1849_v40 = vmul.f32 %v1842_v17, %v3158_v45 }
0x151c   :  { %v1861_v54 = vadd.f32 %v1859_v26, %v1849_v40 }
0x151d   :  { %v1847_v30 = vpop.permute.xlu0 %1846 }
0x151e   :  { %v1905_v62 = vpop.permute.xlu1 %1904  ;;  %v1850_v51 = vmul.f32 %v1847_v30, %v3158_v45  ;;  %v1935_v30 = vrot.slane %v1931_v22, 7 }
0x151f   :  { %v1908_v59 = vmul.f32 %v1905_v62, %v3178_v24 }
0x1522   :  { %v1857_v31 = vpop.permute.xlu0 %1856 }
0x1523   :  { %v1877_v32 = vpop.permute.xlu1 %1876  ;;  %v1860_v9 = vmul.f32 %v1857_v31, %v3160_v46 }
0x1524   :  { %v1883_v6 = vmul.f32 %v1877_v32, %v3164_v48 }
0x1525   :  { %v1862_v41 = vadd.f32 %v1860_v9, %v1850_v51 }
0x1527   :  { %v1869_v33 = vpop.permute.xlu0 %1868 }
0x1528   :  { %v1901_v34 = vpop.permute.xlu1 %1900  ;;  %v1872_v52 = vmul.f32 %v1869_v33, %v3162_v47  ;;  %v1932_v33 = vmul.f32 %v3411_v36, %v3187_v43 }
0x1529   :  { %v1907_v45 = vmul.f32 %v1901_v34, %v3178_v24 }
0x152a   :  { %v1874_v1 = vadd.f32 %v1872_v52, %v1862_v41  ;;  %v1936_v34 = vrot.slane %v1932_v33, 7 }
0x152c   :  { %v2146_v42 = vpop.permute.xlu1 %2145  ;;  %v1881_v8 = vpop.permute.xlu0 %1880 }
0x152d   :  { %v2151_v37 = vmul.f32 %v2146_v42, %v2136_v5  ;;  %v1884_v35 = vmul.f32 %v1881_v8, %v3164_v48  ;;  %v1914_v5 = vadd.f32 %v3418_v53, %v3046_v58 }
0x152f   :  { %v2153_v50 = vsel %vm1996_vm4, %v2151_v37, 0.0  ;;  %v1886_v55 = vadd.f32 %v1884_v35, %v1874_v1  ;;  %v1916_v28 = vadd.f32 %v1914_v5, %v3109_v11  ;;  %v2790_v5 = vld [vmem:[%s3562_s2 + $0x9] ss:$0 sm:$0xff] }
0x1530   :  { %2154 = vadd.xlane.f32.xlu1 %v2153_v50  ;;  %v2003_v22 = vmul.f32 %v2790_v5, %v3383_v57 }
0x1531   :  { %v1893_v2 = vpop.permute.xlu0 %1892 }
0x1532   :  { %v1896_v3 = vmul.f32 %v1893_v2, %v3174_v13 }
0x1534   :  { %v1898_v10 = vadd.f32 %v1896_v3, %v1886_v55 }
0x1536   :  { %v1865_v56 = vpop.permute.xlu0 %1864  ;;  %v1910_v12 = vadd.f32 %v1908_v59, %v1898_v10 }
0x1537   :  { %v1871_v39 = vmul.f32 %v1865_v56, %v3162_v47  ;;  %v1911_v47 = vrot.slane %v3418_v53, 7  ;;  %v3472_v53 = vld [vmem:[%s3562_s2 + $0xa] ss:$0 sm:$0xff]  ;;  %s2809_s2 = smov 32  }
0x1538   :  { %2775 = vlog2.f32 %v1910_v12 }
0x1539   :  { %v1873_v7 = vadd.f32 %v1871_v39, %v1861_v54  ;;  %v1913_v18 = vadd.f32 %v1911_v47, %v3048_v60 }
0x153b   :  { %v1885_v14 = vadd.f32 %v1883_v6, %v1873_v7  ;;  %v1889_v15 = vpop.permute.xlu0 %1888  ;;  %v1915_v16 = vadd.f32 %v1913_v18, %v3109_v11 }
0x153c   :  { %v1895_v46 = vmul.f32 %v1889_v15, %v3174_v13 }
0x153e   :  { %v1897_v20 = vadd.f32 %v1895_v46, %v1885_v14 }
0x153f   :  { %v2148_v32 = vpop.permute.xlu0 %2147 }
0x1540   :  { %v1909_v21 = vadd.f32 %v1907_v45, %v1897_v20  ;;  %v2152_v11 = vmul.f32 %v3433_v0, %v2148_v32 }
0x1541   :  { %2030 = vrot.lane.b32.xlu1 %v3365_v44, %s2803_s24 }
0x1542   :  { %2777 = vlog2.f32 %v1909_v21  ;;  %v2776_v48 = vpop.eup %2775  ;;  %v2156_v8 = vsel %vm1996_vm4, %v2152_v11, 0.0 }
0x1543   :  { %v1920_v29 = vmul.f32 0.6931472, %v2776_v48 }
0x1545   :  { %2161 = vrot.lane.b32.xlu1 %v3365_v44, %s2804_s14  ;;  %v1924_v19 = vrot.slane %v1920_v29, 7 }
0x1547   :  { %v1928_v62 = vadd.f32 %v1924_v19, %v1916_v28 }
0x1549   :  { %v1930_v25 = vmul.f32 %v1928_v62, %v3106_v4  ;;  %v2806_v4 = vmov 48  }
0x154b   :  { %v1940_v42 = vadd.f32 %v1936_v34, %v1930_v25  ;;  %v2191_v34 = vmul.f32 %v3472_v53, %v3396_v38 }
0x154c   :  { %v2778_v13 = vpop.eup %2777 }
0x154d   :  { %v1918_v24 = vmul.f32 0.6931472, %v2778_v13  ;;  %v1946_v9 = vadd.f32 %v3472_v53, %v1940_v42  ;;  %v2190_v42 = vmul.f32 %v3472_v53, %v3383_v57 }
0x154f   :  { %v1923_v23 = vrot.slane %v1918_v24, 7  ;;  %v1949_v37 = vrot.slane %v1946_v9, 7 }
0x1551   :  { %v1927_v27 = vadd.f32 %v1923_v23, %v1915_v16  ;;  %v1957_v43 = vsel %vm1956_vm8, %v1949_v37, -inf  ;;  %v2004_v16 = vmul.f32 %v2790_v5, %v3396_v38 }
0x1553   :  { %v1929_v17 = vmul.f32 %v1927_v27, %v3102_v61 }
0x1555   :  { %v1939_v31 = vadd.f32 %v1935_v30, %v1929_v17 }
0x1557   :  { %v1945_v63 = vadd.f32 %v3472_v53, %v1939_v31 }
0x1559   :  { %v1953_v61 = vsel %vm1952_vm7, %v1945_v63, -inf }
0x155a   :  { %1954 = vmax.xlane.f32.xlu0 %v1953_v61 }
0x155e   :  { %2157 = vadd.xlane.f32.xlu0 %v2156_v8 }
0x1569   :  { %1958 = vmax.xlane.f32.xlu1 %v1957_v43 }
0x156c   :  { %v1999_v36 = vpop.xlane.xlu0 %1998 }
0x156d   :  { %v2028_v51 = vmul.f32 %v3365_v44, %v1999_v36 }
0x1570   :  { %v2002_v41 = vpop.xlane.xlu0 %2001 }
0x1571   :  { %v2029_v26 = vmul.f32 %v3375_v49, %v2002_v41 }
0x1574   :  { %2032 = vrot.lane.b32.xlu0 %v3375_v49, %s2803_s24 }
0x1578   :  { %2217 = vrot.lane.b32.xlu0 %v3375_v49, %s2805_s17 }
0x157a   :  { %2163 = vrot.lane.b32.xlu1 %v3375_v49, %s2804_s14 }
0x157c   :  { %2006 = vperm.xlu0 %2667, %v3365_v44  }
0x157e   :  { %2215 = vrot.lane.b32.xlu1 %v3365_v44, %s2805_s17 }
0x1580   :  { %2670 = vset.pattern.permute.xlu0 %v2806_v4 }
0x1582   :  { %2010 = vperm.xlu1 %2668, %v3375_v49  }
0x1586   :  { %2669 = vset.pattern.permute.xlu1 %v2806_v4 }
0x1587   :  { %2193 = vperm.xlu1 %2669, %v3365_v44  }
0x158b   :  { %2197 = vperm.xlu1 %2669, %v3375_v49  }
0x15bd   :  { %v2155_v0 = vpop.xlane.xlu1 %2154 }
0x15be   :  { %v2159_v55 = vmul.f32 %v3365_v44, %v2155_v0 }
0x15c1   :  { %v2031_v52 = vpop.permute.xlu1 %2030 }
0x15c2   :  { %v2036_v50 = vmul.f32 %v2031_v52, %v2028_v51 }
0x15c4   :  { %2040 = vrot.lane.b32.xlu1 %v2036_v50, %s2807_s18 }
0x15c5   :  { %v2162_v3 = vpop.permute.xlu1 %2161 }
0x15c6   :  { %v2167_v56 = vmul.f32 %v2162_v3, %v2159_v55 }
0x15e7   :  { %v3495_v35 = vpop.xlane.xlu0 %1954 }
0x15e8   :  { %v1965_v45 = vsub.f32 %v1945_v63, %v3495_v35 }
0x15ea   :  { %v1967_v20 = vmul.f32 1.442695, %v1965_v45 }
0x15eb   :  { %v2158_v2 = vpop.xlane.xlu0 %2157 }
0x15ec   :  { %v2160_v39 = vmul.f32 %v3375_v49, %v2158_v2 }
0x15ef   :  { %v2033_v40 = vpop.permute.xlu0 %2032 }
0x15f0   :  { %v2037_v1 = vmul.f32 %v2033_v40, %v2029_v26 }
0x15f2   :  { %2042 = vrot.lane.b32.xlu1 %v2037_v1, %s2807_s18 }
0x15f3   :  { %v2218_v13 = vpop.permute.xlu0 %2217 }
0x15f4   :  { %v2222_v29 = vmul.f32 %v2218_v13, %v2029_v26 }
0x15f6   :  { %v3500_v54 = vpop.xlane.xlu1 %1958  ;;  %2171 = vrot.lane.b32.xlu1 %v2167_v56, %s2808_s19 }
0x15f7   :  { %v1962_v10 = vrot.slane %v3500_v54, 1 }
0x15f9   :  { %v1966_v59 = vsub.f32 %v1946_v9, %v1962_v10 }
0x15fa   :  { %v2164_v6 = vpop.permute.xlu1 %2163 }
0x15fb   :  { %v1969_v7 = vmul.f32 1.442695, %v1966_v59  ;;  %v2168_v12 = vmul.f32 %v2164_v6, %v2160_v39  ;;  %v2007_v23 = vpop.permute.xlu0 %2006 }
0x15fc   :  { %v2013_v27 = vmul.f32 %v2007_v23, %v2003_v22 }
0x15fd   :  { %2779 = vpow2.f32 %v1969_v7  ;;  %2173 = vrot.lane.b32.xlu1 %v2168_v12, %s2808_s19 }
0x15fe   :  { %2781 = vpow2.f32 %v1967_v20  ;;  %v2216_v21 = vpop.permute.xlu1 %2215  ;;  %v2015_v17 = vsel %vm1996_vm4, %v2013_v27, 0.0 }
0x15ff   :  { %v2221_v48 = vmul.f32 %v2216_v21, %v2028_v51 }
0x1602   :  { %v2011_v24 = vpop.permute.xlu1 %2010 }
0x1603   :  { %v2014_v19 = vmul.f32 %v2011_v24, %v2004_v16 }
0x1605   :  { %v2016_v28 = vsel %vm1996_vm4, %v2014_v19, 0.0 }
0x1606   :  { %v2017_v30 = vadd.f32 %v2016_v28, %v2015_v17  ;;  %v2194_v62 = vpop.permute.xlu1 %2193 }
0x1607   :  { %v2780_v14 = vpop.eup %2779  ;;  %v2200_v37 = vmul.f32 %v2194_v62, %v2190_v42 }
0x1608   :  { %v1973_v15 = vrot.slane %v2780_v14, 7  ;;  %v2782_v47 = vpop.eup %2781 }
0x1609   :  { %v1976_v18 = vsel %vm1952_vm7, %v2782_v47, 0.0  ;;  %v2202_v51 = vsel %vm1996_vm4, %v2200_v37, 0.0 }
0x160a   :  { %v1979_v46 = vsel %vm1956_vm8, %v1973_v15, 0.0  ;;  %v2198_v31 = vpop.permute.xlu1 %2197 }
0x160b   :  { %1980 = vadd.xlane.f32.xlu0 %v1979_v46  ;;  %v2201_v8 = vmul.f32 %v2198_v31, %v2191_v34 }
0x160d   :  { %v2203_v0 = vsel %vm1996_vm4, %v2201_v8, 0.0 }
0x160e   :  { %v2204_v52 = vadd.f32 %v2203_v0, %v2202_v51 }
0x1621   :  { %2225 = vrot.lane.b32.xlu0 %v2221_v48, %s2807_s18  ;;  %1977 = vadd.xlane.f32.xlu1 %v1976_v18 }
0x1632   :  { %2227 = vrot.lane.b32.xlu1 %v2222_v29, %s2807_s18 }
0x1636   :  { %v2041_v32 = vpop.permute.xlu1 %2040 }
0x1637   :  { %v2047_v63 = vsel %vm2046_vm9, %v2041_v32, 0.0 }
0x1640   :  { %2018 = vadd.xlane.f32.xlu0 %v2017_v30 }
0x1664   :  { %v2043_v33 = vpop.permute.xlu1 %2042 }
0x1665   :  { %v2048_v25 = vsel %vm2046_vm9, %v2043_v33, 0.0 }
0x1666   :  { %v2049_v11 = vadd.f32 %v2048_v25, %v2047_v63 }
0x1668   :  { %2050 = vadd.xlane.f32.xlu1 %v2049_v11  ;;  %v2172_v61 = vpop.permute.xlu1 %2171 }
0x1669   :  { %v2177_v43 = vsel %vm2046_vm9, %v2172_v61, 0.0 }
0x166f   :  { %v2174_v9 = vpop.permute.xlu1 %2173 }
0x1670   :  { %v2178_v4 = vsel %vm2046_vm9, %v2174_v9, 0.0 }
0x1671   :  { %v2179_v36 = vadd.f32 %v2178_v4, %v2177_v43 }
0x1673   :  { %2180 = vadd.xlane.f32.xlu0 %v2179_v36 }
0x1677   :  { %2205 = vadd.xlane.f32.xlu0 %v2204_v52 }
0x1698   :  { %v1981_v50 = vpop.xlane.xlu0 %1980 }
0x1699   :  { %2783 = vlog2.f32 %v1981_v50 }
0x169c   :  { %v2226_v57 = vpop.permute.xlu0 %2225 }
0x169d   :  { %v2231_v2 = vsel %vm2046_vm9, %v2226_v57, 0.0 }
0x16a3   :  { %v2784_v41 = vpop.eup %2783 }
0x16a4   :  { %v1985_v1 = vmul.f32 0.6931472, %v2784_v41 }
0x16a6   :  { %v1987_v55 = vadd.f32 %v1985_v1, %v3500_v54 }
0x16a8   :  { %v2252_v39 = vrot.slane %v1987_v55, 7  ;;  %v2811_v55 = vmov 0.0  }
0x16ae   :  { %v1978_v38 = vpop.xlane.xlu1 %1977 }
0x16af   :  { %2785 = vlog2.f32 %v1978_v38 }
0x16b2   :  { %v2228_v53 = vpop.permute.xlu1 %2227 }
0x16b3   :  { %v2232_v26 = vsel %vm2046_vm9, %v2228_v53, 0.0 }
0x16b4   :  { %v2233_v40 = vadd.f32 %v2232_v26, %v2231_v2 }
0x16b6   :  { %2234 = vadd.xlane.f32.xlu1 %v2233_v40 }
0x16b9   :  { %v2786_v3 = vpop.eup %2785 }
0x16ba   :  { %v1983_v56 = vmul.f32 0.6931472, %v2786_v3 }
0x16bc   :  { %v1986_v10 = vadd.f32 %v1983_v56, %v3495_v35 }
0x16be   :  { %v2251_v59 = vrot.slane %v1986_v10, 7 }
0x16c0   :  { %v2253_v6 = vsel %vm2250_vm10, %v2251_v59, %v2252_v39 }
0x16c1   :  { %v2256_v7 = vsel %vm2255_vm11, %v2253_v6, 0.0 }
0x16c2   :  { %2257 = vadd.xlane.f32.xlu0 %v2256_v7 }
0x16c7   :  { %2270 = vrot.lane.b32.xlu1 %v3048_v60, %s2809_s2 }
0x16cb   :  { %2279 = vrot.lane.b32.xlu1 %v3365_v44, %s2810_s22 }
0x16cd   :  { %v2019_v12 = vpop.xlane.xlu0 %2018 }
0x16ce   :  { %v2020_v14 = vrot.slane %v2019_v12, 4 }
0x16cf   :  { %2281 = vrot.lane.b32.xlu1 %v3375_v49, %s2810_s22 }
0x16d0   :  { %v2021_v54 = vadd.f32 %v2020_v14, %v2019_v12 }
0x16d2   :  { %v2022_v15 = vrot.slane %v2021_v54, 2 }
0x16d4   :  { %v2023_v35 = vadd.f32 %v2022_v15, %v2021_v54 }
0x16d6   :  { %v2024_v46 = vrot.slane %v2023_v35, 1 }
0x16d8   :  { %2272 = vrot.lane.b32.xlu0 %v3046_v58, %s2809_s2  ;;  %v2025_v45 = vadd.f32 %v2024_v46, %v2023_v35 }
0x16da   :  { %2536 = vpush %v2025_v45 }
0x16f5   :  { %v2051_v20 = vpop.xlane.xlu1 %2050 }
0x16f6   :  { %v2052_v21 = vrot.slane %v2051_v20, 4 }
0x16f8   :  { %v2053_v47 = vadd.f32 %v2052_v21, %v2051_v20 }
0x16fa   :  { %v2054_v48 = vrot.slane %v2053_v47, 2 }
0x16fc   :  { %v2055_v60 = vadd.f32 %v2054_v48, %v2053_v47 }
0x16fe   :  { %v2056_v18 = vrot.slane %v2055_v60, 1 }
0x1700   :  { %v2181_v13 = vpop.xlane.xlu0 %2180  ;;  %v2057_v44 = vadd.f32 %v2056_v18, %v2055_v60 }
0x1701   :  { %v2182_v29 = vrot.slane %v2181_v13, 4 }
0x1702   :  { %2538 = vpush %v2057_v44 }
0x1703   :  { %v2183_v24 = vadd.f32 %v2182_v29, %v2181_v13 }
0x1704   :  { %v2206_v49 = vpop.xlane.xlu0 %2205 }
0x1705   :  { %v2184_v5 = vrot.slane %v2183_v24, 2  ;;  %v2207_v16 = vrot.slane %v2206_v49, 4 }
0x1707   :  { %v2208_v23 = vadd.f32 %v2207_v16, %v2206_v49  ;;  %v2185_v22 = vadd.f32 %v2184_v5, %v2183_v24 }
0x1709   :  { %v2209_v19 = vrot.slane %v2208_v23, 2  ;;  %v2186_v58 = vrot.slane %v2185_v22, 1 }
0x170b   :  { %v2187_v27 = vadd.f32 %v2186_v58, %v2185_v22  ;;  %v2210_v28 = vadd.f32 %v2209_v19, %v2208_v23  ;;  %s2537_s5 = spop %2536 }
0x170c   :  { %v2027_v50 = vstv %s2537_s5 }
0x170d   :  { %2540 = vpush %v2187_v27  ;;  %v2211_v17 = vrot.slane %v2210_v28, 1 }
0x170f   :  { %v2212_v30 = vadd.f32 %v2211_v17, %v2210_v28 }
0x1711   :  { %2542 = vpush %v2212_v30 }
0x1733   :  { %s2539_s6 = spop %2538 }
0x1734   :  { %v2059_v52 = vstv %s2539_s6 }
0x1735   :  { %v2244_v57 = vadd.f32 %v2059_v52, %v2027_v50 }
0x173e   :  { %s2541_s7 = spop %2540 }
0x173f   :  { %v2189_v38 = vstv %s2541_s7 }
0x1740   :  { %v2245_v41 = vadd.f32 %v2244_v57, %v2189_v38 }
0x1742   :  { %s2543_s8 = spop %2542 }
0x1743   :  { %v2235_v62 = vpop.xlane.xlu1 %2234  ;;  %v2214_v53 = vstv %s2543_s8 }
0x1744   :  { %v2236_v31 = vrot.slane %v2235_v62, 4  ;;  %v2246_v26 = vadd.f32 %v2245_v41, %v2214_v53 }
0x1746   :  { %v2237_v32 = vadd.f32 %v2236_v31, %v2235_v62 }
0x1747   :  { %v2271_v33 = vpop.permute.xlu1 %2270 }
0x1748   :  { %v2238_v63 = vrot.slane %v2237_v32, 2  ;;  %2277 = vst.msk [vmem:[%s3563_s3] sm:$0xff] %vm2276_vm12, %v2271_v33 }
0x174a   :  { %v2239_v25 = vadd.f32 %v2238_v63, %v2237_v32 }
0x174b   :  { %v2280_v11 = vpop.permute.xlu1 %2279 }
0x174c   :  { %v2240_v61 = vrot.slane %v2239_v25, 1  ;;  %2286 = vst.msk [vmem:[%s3563_s3] sm:$0xff] %vm2285_vm13, %v2280_v11 }
0x174e   :  { %v2241_v34 = vadd.f32 %v2240_v61, %v2239_v25 }
0x174f   :  { %v2258_v42 = vpop.xlane.xlu0 %2257  ;;  %v2282_v37 = vpop.permute.xlu1 %2281 }
0x1750   :  { %v2259_v8 = vrot.slane %v2258_v42, 4  ;;  %2544 = vpush %v2241_v34 }
0x1752   :  { %v2260_v9 = vadd.f32 %v2259_v8, %v2258_v42 }
0x1753   :  { %v2273_v43 = vpop.permute.xlu0 %2272 }
0x1754   :  { %v2261_v4 = vrot.slane %v2260_v9, 2  ;;  %2278 = vst.msk [vmem:[%s3563_s3 + $0x8] sm:$0xff] %vm2276_vm12, %v2273_v43 }
0x1755   :  { %2287 = vst.msk [vmem:[%s3563_s3 + $0x8] sm:$0xff] %vm2285_vm13, %v2282_v37 }
0x1756   :  { %v2262_v36 = vadd.f32 %v2261_v4, %v2260_v9 }
0x1758   :  { %v2263_v0 = vrot.slane %v2262_v36, 1 }
0x175a   :  { %v2264_v51 = vadd.f32 %v2263_v0, %v2262_v36 }
0x175c   :  { %2546 = vpush %v2264_v51 }
0x1781   :  { %s2545_s1 = spop %2544 }
0x1782   :  { %v2243_v2 = vstv %s2545_s1 }
0x1783   :  { %v2247_v40 = vadd.f32 %v2246_v26, %v2243_v2 }
0x178d   :  { %s2547_s9 = spop %2546 }
0x178e   :  { %v2266_v1 = vstv %s2547_s9 }
0x178f   :  { %v2267_v3 = vsub.f32 %v2247_v40, %v2266_v1 }
0x1791   :  { %2289 = vst.msk [vmem:[%s3563_s3] sm:$0xff] %vm2288_vm14, %v2267_v3  ;;  %2290 = vst.msk [vmem:[%s3563_s3 + $0x8] sm:$0xff] %vm2288_vm14, %v2267_v3 }
0x1792   :  { %2292 = vst.msk [vmem:[%s3563_s3] sm:$0xff] %vm2291_vm15, %v2811_v55  ;;  %2293 = vst.msk [vmem:[%s3563_s3 + $0x8] sm:$0xff] %vm2291_vm15, %v2811_v55 }

</bundles_post_ra>
